<compile_context>
chip_gen: v7x
topology: tpu7x:2x2x1
jax: 0.10.0
libtpu: 0.0.40
codegen_flags: <defaults>
</compile_context>

<pallas_src>
import functools

import jax
import jax.numpy as jnp
from jax.experimental import pallas as pl
from jax.experimental.pallas import tpu as pltpu

_EPS = 1e-5                    # PyTorch BatchNorm1d default eps
_MXU_DTYPE = jnp.bfloat16      # MXU operand dtype (f32 accumulation everywhere)


# ------------------------------------------------------------------ roll probe
_ROLL_SIGN_CACHE = []


def _get_roll_sign():
    """Probe pltpu.roll's direction once.

    Returns s in {+1, -1} such that pltpu.roll(v, (s*o) % n, 1)[:, i] == v[:, i+o]
    (modulo wrap), or None if the probe fails (-> concat-based shift fallback).
    """
    if not _ROLL_SIGN_CACHE:
        sign = None
        try:
            def _k(x_ref, o_ref):
                o_ref[...] = pltpu.roll(x_ref[...], 1, 1)

            xp = jnp.arange(8 * 128, dtype=jnp.float32).reshape(8, 128)
            yp = pl.pallas_call(
                _k,
                out_shape=jax.ShapeDtypeStruct((8, 128), jnp.float32),
                in_specs=[pl.BlockSpec(memory_space=pltpu.MemorySpace.VMEM)],
                out_specs=pl.BlockSpec(memory_space=pltpu.MemorySpace.VMEM),
            )(xp)
            if bool(jnp.all(yp == jnp.roll(xp, 1, axis=1))):
                sign = -1          # pltpu.roll matches jnp.roll: out[i] = v[i - shift]
            elif bool(jnp.all(yp == jnp.roll(xp, -1, axis=1))):
                sign = 1           # opposite convention: out[i] = v[i + shift]
        except Exception:
            sign = None
        _ROLL_SIGN_CACHE.append(sign)
    return _ROLL_SIGN_CACHE[0]


# ----------------------------------------------------------------------- kernel
def improved_seres2block_kernel(
    x_ref, t_idx_ref, b_idx_ref, pool_ref, bnred_ref,
    sea_w1, sea_w2,
    c1_w, c1_b, bn1_g, bn1_b,
    c2_w, c2_b, bn2_g, bn2_b,
    se_w1, se_w2,
    m13_w, m13_b, m15_w, m15_b, m11_w, m11_b,
    mc1_w, mc1_b, mc2_w, mc2_b, mc3_w, mc3_b,
    mfc1_w, mfc2_w, m14_w, m14_b,
    d_bn1_g, d_bn1_b, d_c2_w, d_c2_b, d_bn2_g, d_bn2_b,
    out_ref,
    *, seq, batch, roll_sign,
):
    T = seq
    B = batch
    x = x_ref[...]                    # (C, Np) f32, Np = pad(B*T, 128)
    t_idx = t_idx_ref[...]            # (1, Np) int32: within-batch time (pads: 0)
    b_idx = b_idx_ref[...]            # (1, Np) int32: batch index (pads: B)
    pool_mat = pool_ref[...]          # (Np, B) f32: per-batch mean over T (pads: 0)
    bnred = bnred_ref[...]            # (Np, 1) f32: 1/(B*T) on valid lanes, else 0
    n_lanes = x.shape[1]

    relu = lambda v: jnp.maximum(v, 0.0)

    def mxdot(a, b):                  # MXU path: bf16 operands, f32 accumulation
        return jnp.dot(a.astype(_MXU_DTYPE), b.astype(_MXU_DTYPE),
                       preferred_element_type=jnp.float32)

    def f32dot(a, b):                 # BN statistics stay in f32
        return jnp.dot(a, b, preferred_element_type=jnp.float32)

    # Per-offset masks, built once per distinct offset (JAX does not CSE these).
    _valid, _halo = {}, {}

    def valid_mask(o):
        if o not in _valid:
            j = t_idx + o
            _valid[o] = jnp.logical_and(j >= 0, j < T)
        return _valid[o]

    def halo_mask(o, halo):
        key = (o, halo)
        if key not in _halo:
            j = t_idx + o
            _halo[key] = jnp.logical_and(
                jnp.logical_not(valid_mask(o)),
                jnp.logical_and(j >= -halo, j < T + halo))
        return _halo[key]

    # Lane shift: out[:, i] = v[:, i + o].  Wrapped / cross-batch lanes are removed
    # by the valid mask in tap(), so a circular XLU rotate is safe.
    def shift_lanes(v, o):
        if o == 0:
            return v
        if roll_sign is not None:
            return pltpu.roll(v, (roll_sign * o) % n_lanes, 1)
        # Fallback (pltpu.roll probe failed): zero-concat shift.
        z = jnp.zeros((v.shape[0], abs(o)), v.dtype)
        if o > 0:
            return jnp.concatenate([v[:, o:], z], axis=1)
        return jnp.concatenate([z, v[:, :o]], axis=1)

    # tap(v, o): out[:, b*T+t] = v[:, b*T+t+o] if 0 <= t+o < T,
    #            per-channel `fill` if t+o lies within `halo` of the valid range,
    #            0 otherwise.  (o, halo are static Python ints.)
    def tap(v, o, fill=None, halo=0):
        if o == 0:
            return v                  # offset-0 tap is always in range
        out = jnp.where(valid_mask(o), shift_lanes(v, o), 0.0)
        if fill is not None and halo > 0:
            out = jnp.where(halo_mask(o, halo), fill, out)
        return out

    # Conv1d as per-tap accumulating MXU matmuls (no im2col concat buffer).
    # w_ref: (K, Cout, Cin) bf16 ; b_ref: (Cout, 1) f32.
    def conv(v, w_ref, b_ref, K, dil, pad, fill=None, halo=0):
        acc = b_ref[...]
        for k in range(K):
            acc = acc + mxdot(w_ref[k], tap(v, k * dil - pad, fill, halo))
        return acc

    # BatchNorm1d (training-mode batch stats over the B*T valid lanes).  Stats via
    # a single-column f32 matmul; pad lanes contribute 0 through bnred.
    def bn(v, g_ref, b_ref):
        mean = f32dot(v, bnred)                      # (C', 1)
        meansq = f32dot(v * v, bnred)                # (C', 1)
        var = jnp.maximum(meansq - mean * mean, 0.0)
        scale = g_ref[...] * jax.lax.rsqrt(var + _EPS)
        shift = b_ref[...] - mean * scale
        return v * scale + shift

    # Per-batch broadcast over time lanes with a VPU select chain
    # (replaces the former depth-B broadcast matmul).
    def bcast(y):                                    # (C', B) -> (C', Np)
        out = jnp.where(b_idx == 0, y[:, 0:1], 0.0)
        for b in range(1, B):
            out = jnp.where(b_idx == b, y[:, b:b + 1], out)
        return out

    # SEAttention sigmoid gate (per-batch mean -> FC -> sigmoid -> broadcast).
    def se_gate(v, w1_ref, w2_ref):
        pooled = mxdot(v, pool_mat)                  # (C', B)
        h = relu(mxdot(w1_ref[...], pooled))
        y = jax.nn.sigmoid(mxdot(w2_ref[...], h))
        return bcast(y)

    # MultiScaleConvAttentionModule (C -> C//2).  The 4C concat is never
    # materialised; branch activations are kept in bf16 (they only feed matmuls).
    def mscam(u):
        Cu = u.shape[0]
        # branch 1: conv2 (k1, pad1) -> relu -> conv1_3 (k3, no pad) -> relu
        fill2 = relu(mc2_b[...])
        w2i = relu(mxdot(mc2_w[...], u) + mc2_b[...])
        x1 = relu(conv(w2i, m13_w, m13_b, K=3, dil=1, pad=1,
                       fill=fill2, halo=1)).astype(jnp.bfloat16)
        # branch 2: conv3 (k1, pad1) -> relu -> conv1_5 (k5, dil2, pad3) -> relu
        fill3 = relu(mc3_b[...])
        w3i = relu(mxdot(mc3_w[...], u) + mc3_b[...])
        x2 = relu(conv(w3i, m15_w, m15_b, K=5, dil=2, pad=4,
                       fill=fill3, halo=1)).astype(jnp.bfloat16)
        # branch 3: conv1_1 (k7, pad3)
        x3 = relu(conv(u, m11_w, m11_b, K=7, dil=1, pad=3)).astype(jnp.bfloat16)
        # branch 4: maxpool (k3, s1, no pad, T-2 outputs) -> conv1 (k1, pad1)
        mp = jnp.maximum(jnp.maximum(tap(u, 0), tap(u, 1)), tap(u, 2))
        mp = jnp.where(t_idx < T - 2, mp, 0.0)
        x4 = relu(conv(mp, mc1_w, mc1_b, K=1, dil=1, pad=1)).astype(jnp.bfloat16)
        # channel attention over the virtual 4C concat (only per-branch means)
        pooled = jnp.concatenate(
            [mxdot(xb, pool_mat) for xb in (x1, x2, x3, x4)], axis=0)   # (4C, B)
        h = relu(mxdot(mfc1_w[...], pooled))
        sig = jax.nn.sigmoid(mxdot(mfc2_w[...], h))                     # (4C, B)
        # 1x1 conv (4C -> C//2) split into four partial matmuls over gated branches
        out = m14_b[...]
        for i, xb in enumerate((x1, x2, x3, x4)):
            gi = bcast(sig[i * Cu:(i + 1) * Cu, :])                     # (C, Np)
            out = out + mxdot(m14_w[i], gi * xb)
        return out                                                      # (C//2, Np)

    # improved_Res2DilatedConv1D
    def dilated(v):
        o = relu(bn(mscam(v), d_bn1_g, d_bn1_b))
        o = bn(conv(o, d_c2_w, d_c2_b, K=3, dil=2, pad=2), d_bn2_g, d_bn2_b)
        return o + v

    # improved_SERes2Block.forward
    xg = x * (2.0 + se_gate(x, sea_w1, sea_w2))        # x + sea(x) + x
    o = relu(bn(conv(xg, c1_w, c1_b, K=3, dil=1, pad=1), bn1_g, bn1_b))
    o = dilated(o)
    o = bn(conv(o, c2_w, c2_b, K=3, dil=1, pad=1), bn2_g, bn2_b)
    o = o * se_gate(o, se_w1, se_w2)
    out_ref[...] = relu(o + xg)                        # shortcut == Identity


# ---------------------------------------------------------------------- wrapper
@functools.partial(jax.jit, static_argnames=("roll_sign",))
def _forward(x, params, *, roll_sign):
    B, C, T = x.shape
    N = B * T
    Npad = max(128, ((N + 127) // 128) * 128)          # lane-dense folded axis

    # Fold batch into the lane axis (layout plumbing, done in XLA) + pad lanes.
    x_fold = jnp.transpose(x, (1, 0, 2)).reshape(C, N).astype(jnp.float32)
    x_fold = jnp.pad(x_fold, ((0, 0), (0, Npad - N)))

    lane = jnp.arange(Npad, dtype=jnp.int32)
    valid = lane < N
    t_idx = jnp.where(valid, lane % T, 0).reshape(1, Npad)
    b_of = jnp.where(valid, lane // T, B)
    b_idx = b_of.reshape(1, Npad).astype(jnp.int32)
    bid = jnp.arange(B, dtype=jnp.int32)
    pool_mat = (b_of[:, None] == bid[None, :]).astype(jnp.float32) * (1.0 / T)
    bnred = (valid.astype(jnp.float32) * (1.0 / N)).reshape(Npad, 1)

    kernel = functools.partial(improved_seres2block_kernel,
                               seq=T, batch=B, roll_sign=roll_sign)
    args = (x_fold, t_idx, b_idx, pool_mat, bnred) + tuple(params)

    # Explicit scoped-VMEM limit sized from the live set (capped at the v7x
    # physical 64 MiB so the same setting is safe on all generations).
    act_bytes = C * Npad * 4
    param_bytes = sum(int(p.size) * p.dtype.itemsize for p in params)
    vmem_limit = int(min(64 << 20, max(32 << 20, 24 * act_bytes + 2 * param_bytes)))

    out = pl.pallas_call(
        kernel,
        out_shape=jax.ShapeDtypeStruct((C, Npad), jnp.float32),
        in_specs=[pl.BlockSpec(memory_space=pltpu.MemorySpace.VMEM)] * len(args),
        out_specs=pl.BlockSpec(memory_space=pltpu.MemorySpace.VMEM),
        compiler_params=pltpu.CompilerParams(vmem_limit_bytes=vmem_limit),
    )(*args)

    # TODO(synk): for large (C, T, B) add a lane-axis grid with a two-pass
    # BatchNorm batch-statistics reduction (and 'parallel' semantics to use the
    # second v7x TensorCore); kept as one VMEM-resident invocation here to
    # preserve the module's training-mode BN semantics exactly.
    out = out[:, :N]
    return jnp.transpose(out.reshape(C, B, T), (1, 0, 2))


def improved_seres2block(x, params):
    """x: (B, C, T) float32 -> (B, C, T).  params: prepare_params(init_torch_params)."""
    return _forward(x, params, roll_sign=_get_roll_sign())


# ---------------------------------------------------------- parameter construction
def init_torch_params(key, C):
    """Parameters in native PyTorch layouts (Conv1d: (Cout, Cin, K); Linear: (out, in))."""
    keys = iter(jax.random.split(key, 64))

    def rnd(shape, scale=0.1):
        return (scale * jax.random.normal(next(keys), shape)).astype(jnp.float32)

    def gamma(c):
        return (1.0 + 0.05 * jax.random.normal(next(keys), (c,))).astype(jnp.float32)

    return {
        "sea_fc1": rnd((C // 16, C)), "sea_fc2": rnd((C, C // 16)),
        "conv1_w": rnd((C, C, 3), 0.08), "conv1_b": rnd((C,), 0.05),
        "bn1_g": gamma(C), "bn1_b": rnd((C,), 0.05),
        "conv2_w": rnd((C, C, 3), 0.08), "conv2_b": rnd((C,), 0.05),
        "bn2_g": gamma(C), "bn2_b": rnd((C,), 0.05),
        "se_fc1": rnd((C // 4, C)), "se_fc2": rnd((C, C // 4)),
        "ms_c13_w": rnd((C, C, 3), 0.08), "ms_c13_b": rnd((C,), 0.05),
        "ms_c15_w": rnd((C, C, 5), 0.08), "ms_c15_b": rnd((C,), 0.05),
        "ms_c11_w": rnd((C, C, 7), 0.08), "ms_c11_b": rnd((C,), 0.05),
        "ms_conv1_w": rnd((C, C, 1), 0.08), "ms_conv1_b": rnd((C,), 0.05),
        "ms_conv2_w": rnd((C, C, 1), 0.08), "ms_conv2_b": rnd((C,), 0.05),
        "ms_conv3_w": rnd((C, C, 1), 0.08), "ms_conv3_b": rnd((C,), 0.05),
        "ms_fc1": rnd((4 * C // 64, 4 * C)), "ms_fc2": rnd((4 * C, 4 * C // 64)),
        "ms_c14_w": rnd((C // 2, 4 * C, 1), 0.08), "ms_c14_b": rnd((C // 2,), 0.05),
        "d_bn1_g": gamma(C // 2), "d_bn1_b": rnd((C // 2,), 0.05),
        "d_conv2_w": rnd((C, C // 2, 3), 0.08), "d_conv2_b": rnd((C,), 0.05),
        "d_bn2_g": gamma(C), "d_bn2_b": rnd((C,), 0.05),
    }


def prepare_params(tp):
    """PyTorch-layout params -> kernel layout.

    Matmul weights are pre-cast to bf16 (MXU operands); biases and BatchNorm
    affine parameters stay f32 (VPU path).
    """
    bf = lambda w: w.astype(jnp.bfloat16)

    def taps(w):                          # (Cout, Cin, K) -> (K, Cout, Cin) bf16
        return bf(jnp.transpose(w, (2, 0, 1)))

    def mat(w):                           # (Cout, Cin, 1) -> (Cout, Cin) bf16
        return bf(w[:, :, 0])

    def col(v):
        return v.reshape(-1, 1).astype(jnp.float32)

    C = tp["conv1_w"].shape[0]
    w14 = tp["ms_c14_w"][:, :, 0]                                        # (C//2, 4C)
    w14_split = bf(jnp.transpose(w14.reshape(C // 2, 4, C), (1, 0, 2)))  # (4, C//2, C)
    return (
        bf(tp["sea_fc1"]), bf(tp["sea_fc2"]),
        taps(tp["conv1_w"]), col(tp["conv1_b"]), col(tp["bn1_g"]), col(tp["bn1_b"]),
        taps(tp["conv2_w"]), col(tp["conv2_b"]), col(tp["bn2_g"]), col(tp["bn2_b"]),
        bf(tp["se_fc1"]), bf(tp["se_fc2"]),
        taps(tp["ms_c13_w"]), col(tp["ms_c13_b"]),
        taps(tp["ms_c15_w"]), col(tp["ms_c15_b"]),
        taps(tp["ms_c11_w"]), col(tp["ms_c11_b"]),
        taps(tp["ms_conv1_w"]), col(tp["ms_conv1_b"]),
        mat(tp["ms_conv2_w"]), col(tp["ms_conv2_b"]),
        mat(tp["ms_conv3_w"]), col(tp["ms_conv3_b"]),
        bf(tp["ms_fc1"]), bf(tp["ms_fc2"]),
        w14_split, col(tp["ms_c14_b"]),
        col(tp["d_bn1_g"]), col(tp["d_bn1_b"]),
        taps(tp["d_conv2_w"]), col(tp["d_conv2_b"]),
        col(tp["d_bn2_g"]), col(tp["d_bn2_b"]),
    )


# ---------------------------------------------------- pure-JAX reference (the spec)
def reference_forward(x, tp):
    """Direct transcription of the PyTorch forward (training-mode BatchNorm)."""
    relu = lambda v: jnp.maximum(v, 0.0)

    def conv1d(v, w, b, pad=0, dil=1):
        out = jax.lax.conv_general_dilated(
            v, w, window_strides=(1,), padding=[(pad, pad)], rhs_dilation=(dil,),
            dimension_numbers=("NCH", "OIH", "NCH"))
        return out + b[None, :, None]

    def bn(v, g, b):
        mu = jnp.mean(v, axis=(0, 2), keepdims=True)
        var = jnp.mean((v - mu) ** 2, axis=(0, 2), keepdims=True)
        return g[None, :, None] * (v - mu) / jnp.sqrt(var + _EPS) + b[None, :, None]

    def se(v, w1, w2):
        y = jnp.mean(v, axis=2)
        y = relu(y @ w1.T) @ w2.T
        return v * jax.nn.sigmoid(y)[:, :, None]

    def maxpool3(v):
        return jnp.maximum(jnp.maximum(v[:, :, :-2], v[:, :, 1:-1]), v[:, :, 2:])

    def mscam(v):
        x1 = relu(conv1d(relu(conv1d(v, tp["ms_conv2_w"], tp["ms_conv2_b"], pad=1)),
                         tp["ms_c13_w"], tp["ms_c13_b"]))
        x2 = relu(conv1d(relu(conv1d(v, tp["ms_conv3_w"], tp["ms_conv3_b"], pad=1)),
                         tp["ms_c15_w"], tp["ms_c15_b"], pad=3, dil=2))
        x3 = relu(conv1d(v, tp["ms_c11_w"], tp["ms_c11_b"], pad=3))
        x4 = relu(conv1d(maxpool3(v), tp["ms_conv1_w"], tp["ms_conv1_b"], pad=1))
        xc = jnp.concatenate([x1, x2, x3, x4], axis=1)
        y = jnp.mean(xc, axis=2)
        y = relu(y @ tp["ms_fc1"].T) @ tp["ms_fc2"].T
        xa = xc * jax.nn.sigmoid(y)[:, :, None]
        return conv1d(xa, tp["ms_c14_w"], tp["ms_c14_b"])

    def dilated(v):
        o = relu(bn(mscam(v), tp["d_bn1_g"], tp["d_bn1_b"]))
        o = bn(conv1d(o, tp["d_conv2_w"], tp["d_conv2_b"], pad=2, dil=2),
               tp["d_bn2_g"], tp["d_bn2_b"])
        return o + v

    with jax.default_matmul_precision("highest"):
        xg = x + se(x, tp["sea_fc1"], tp["sea_fc2"]) + x
        o = relu(bn(conv1d(xg, tp["conv1_w"], tp["conv1_b"], pad=1),
                    tp["bn1_g"], tp["bn1_b"]))
        o = dilated(o)
        o = bn(conv1d(o, tp["conv2_w"], tp["conv2_b"], pad=1),
               tp["bn2_g"], tp["bn2_b"])
        o = se(o, tp["se_fc1"], tp["se_fc2"])
        return relu(o + xg)


# ----------------------------------------------------------------------------- main
if __name__ == "__main__":
    B, C, T = 2, 32, 16    # C >= 16 needed by the C//16 and 4C//64 bottlenecks
    key = jax.random.PRNGKey(0)
    kx, kp = jax.random.split(key)
    x = jax.random.normal(kx, (B, C, T), dtype=jnp.float32)
    tp = init_torch_params(kp, C)
    params = prepare_params(tp)

    out = improved_seres2block(x, params)
    out = jax.block_until_ready(out)
    assert out.shape == (B, C, T), out.shape
    assert bool(jnp.all(jnp.isfinite(out)))

    ref = reference_forward(x, tp)
    max_err = float(jnp.max(jnp.abs(out - ref)))
    scale = float(jnp.max(jnp.abs(ref)))
    # bf16 MXU operands (f32 accumulation) -> allow a bf16-sized tolerance.
    assert max_err <= 2e-2 * scale + 5e-2, \
        f"kernel/reference mismatch: max abs err {max_err} (ref scale {scale})"

    print("KERNEL_OK")
</pallas_src>

<mosaic_0001>
module attributes {stable_mosaic.version = 11 : i64} {
  func.func @_k(%arg0: memref<8x128xf32, #tpu.memory_space<vmem>>, %arg1: memref<8x128xf32, #tpu.memory_space<vmem>>) attributes {dimension_semantics = [], scalar_prefetch = 0 : i64, scratch_operands = 0 : i64, tpu.core_type = #tpu.core_type<tc>} {
    %c0 = arith.constant 0 : index
    %c0_0 = arith.constant 0 : index
    %0 = vector.load %arg0[%c0, %c0_0] : memref<8x128xf32, #tpu.memory_space<vmem>>, vector<8x128xf32>
    %c1_i32 = arith.constant 1 : i32
    %1 = tpu.dynamic_rotate %0 by %c1_i32 dim 1 : vector<8x128xf32>, i32 -> vector<8x128xf32>
    %c0_1 = arith.constant 0 : index
    %c0_2 = arith.constant 0 : index
    %2 = vector.load %arg1[%c0_1, %c0_2] : memref<8x128xf32, #tpu.memory_space<vmem>>, vector<8x128xf32>
    tpu.vector_store %arg1[%c0_1, %c0_2], %1 {strides = array<i32>} : memref<8x128xf32, #tpu.memory_space<vmem>>, vector<8x128xf32>,
    return
  }
}

module attributes {stable_mosaic.version = 11 : i64} {
  func.func @improved_seres2block_kernel(%arg0: memref<32x128xf32, #tpu.memory_space<vmem>>, %arg1: memref<1x128xi32, #tpu.memory_space<vmem>>, %arg2: memref<1x128xi32, #tpu.memory_space<vmem>>, %arg3: memref<128x2xf32, #tpu.memory_space<vmem>>, %arg4: memref<128x1xf32, #tpu.memory_space<vmem>>, %arg5: memref<2x32xbf16, #tpu.memory_space<vmem>>, %arg6: memref<32x2xbf16, #tpu.memory_space<vmem>>, %arg7: memref<3x32x32xbf16, #tpu.memory_space<vmem>>, %arg8: memref<32x1xf32, #tpu.memory_space<vmem>>, %arg9: memref<32x1xf32, #tpu.memory_space<vmem>>, %arg10: memref<32x1xf32, #tpu.memory_space<vmem>>, %arg11: memref<3x32x32xbf16, #tpu.memory_space<vmem>>, %arg12: memref<32x1xf32, #tpu.memory_space<vmem>>, %arg13: memref<32x1xf32, #tpu.memory_space<vmem>>, %arg14: memref<32x1xf32, #tpu.memory_space<vmem>>, %arg15: memref<8x32xbf16, #tpu.memory_space<vmem>>, %arg16: memref<32x8xbf16, #tpu.memory_space<vmem>>, %arg17: memref<3x32x32xbf16, #tpu.memory_space<vmem>>, %arg18: memref<32x1xf32, #tpu.memory_space<vmem>>, %arg19: memref<5x32x32xbf16, #tpu.memory_space<vmem>>, %arg20: memref<32x1xf32, #tpu.memory_space<vmem>>, %arg21: memref<7x32x32xbf16, #tpu.memory_space<vmem>>, %arg22: memref<32x1xf32, #tpu.memory_space<vmem>>, %arg23: memref<1x32x32xbf16, #tpu.memory_space<vmem>>, %arg24: memref<32x1xf32, #tpu.memory_space<vmem>>, %arg25: memref<32x32xbf16, #tpu.memory_space<vmem>>, %arg26: memref<32x1xf32, #tpu.memory_space<vmem>>, %arg27: memref<32x32xbf16, #tpu.memory_space<vmem>>, %arg28: memref<32x1xf32, #tpu.memory_space<vmem>>, %arg29: memref<2x128xbf16, #tpu.memory_space<vmem>>, %arg30: memref<128x2xbf16, #tpu.memory_space<vmem>>, %arg31: memref<4x16x32xbf16, #tpu.memory_space<vmem>>, %arg32: memref<16x1xf32, #tpu.memory_space<vmem>>, %arg33: memref<16x1xf32, #tpu.memory_space<vmem>>, %arg34: memref<16x1xf32, #tpu.memory_space<vmem>>, %arg35: memref<3x32x16xbf16, #tpu.memory_space<vmem>>, %arg36: memref<32x1xf32, #tpu.memory_space<vmem>>, %arg37: memref<32x1xf32, #tpu.memory_space<vmem>>, %arg38: memref<32x1xf32, #tpu.memory_space<vmem>>, %arg39: memref<32x128xf32, #tpu.memory_space<vmem>>) attributes {dimension_semantics = [], scalar_prefetch = 0 : i64, scratch_operands = 0 : i64, tpu.core_type = #tpu.core_type<tc>} {
    %c0 = arith.constant 0 : index
    %c0_0 = arith.constant 0 : index
    %0 = vector.load %arg0[%c0, %c0_0] : memref<32x128xf32, #tpu.memory_space<vmem>>, vector<32x128xf32>
    %c0_1 = arith.constant 0 : index
    %c0_2 = arith.constant 0 : index
    %1 = vector.load %arg1[%c0_1, %c0_2] : memref<1x128xi32, #tpu.memory_space<vmem>>, vector<1x128xi32>
    %c0_3 = arith.constant 0 : index
    %c0_4 = arith.constant 0 : index
    %2 = vector.load %arg2[%c0_3, %c0_4] : memref<1x128xi32, #tpu.memory_space<vmem>>, vector<1x128xi32>
    %c0_5 = arith.constant 0 : index
    %c0_6 = arith.constant 0 : index
    %3 = vector.load %arg3[%c0_5, %c0_6] : memref<128x2xf32, #tpu.memory_space<vmem>>, vector<128x2xf32>
    %c0_7 = arith.constant 0 : index
    %c0_8 = arith.constant 0 : index
    %4 = vector.load %arg4[%c0_7, %c0_8] : memref<128x1xf32, #tpu.memory_space<vmem>>, vector<128x1xf32>
    %5 = arith.truncf %0 : vector<32x128xf32> to vector<32x128xbf16>
    %6 = arith.truncf %3 : vector<128x2xf32> to vector<128x2xbf16>
    %cst = arith.constant dense<0.000000e+00> : vector<32x2xf32>
    %7 = tpu.matmul %5, %6, %cst {dimension_numbers = #tpu.dot_dimension_numbers<[1], [0], [0], [1], [0, 0, 1, 1], [], []>} : vector<32x128xbf16>, vector<128x2xbf16>, vector<32x2xf32> -> vector<32x2xf32>
    %c0_9 = arith.constant 0 : index
    %c0_10 = arith.constant 0 : index
    %8 = vector.load %arg5[%c0_9, %c0_10] : memref<2x32xbf16, #tpu.memory_space<vmem>>, vector<2x32xbf16>
    %9 = arith.truncf %7 : vector<32x2xf32> to vector<32x2xbf16>
    %cst_11 = arith.constant dense<0.000000e+00> : vector<2x2xf32>
    %10 = tpu.matmul %8, %9, %cst_11 {dimension_numbers = #tpu.dot_dimension_numbers<[1], [0], [0], [1], [0, 0, 1, 1], [], []>} : vector<2x32xbf16>, vector<32x2xbf16>, vector<2x2xf32> -> vector<2x2xf32>
    %cst_12 = arith.constant 0.000000e+00 : f32
    %11 = vector.broadcast %cst_12 : f32 to vector<2x2xf32>
    %12 = arith.maximumf %10, %11 : vector<2x2xf32>
    %c0_13 = arith.constant 0 : index
    %c0_14 = arith.constant 0 : index
    %13 = vector.load %arg6[%c0_13, %c0_14] : memref<32x2xbf16, #tpu.memory_space<vmem>>, vector<32x2xbf16>
    %14 = arith.truncf %12 : vector<2x2xf32> to vector<2x2xbf16>
    %cst_15 = arith.constant dense<0.000000e+00> : vector<32x2xf32>
    %15 = tpu.matmul %13, %14, %cst_15 {dimension_numbers = #tpu.dot_dimension_numbers<[1], [0], [0], [1], [0, 0, 1, 1], [], []>} : vector<32x2xbf16>, vector<2x2xbf16>, vector<32x2xf32> -> vector<32x2xf32>
    %16 = arith.negf %15 : vector<32x2xf32>
    %17 = math.exp %16 : vector<32x2xf32>
    %cst_16 = arith.constant 1.000000e+00 : f32
    %18 = vector.broadcast %cst_16 : f32 to vector<32x2xf32>
    %19 = arith.addf %18, %17 : vector<32x2xf32>
    %20 = arith.divf %18, %19 : vector<32x2xf32>
    %c0_i32 = arith.constant 0 : i32
    %21 = vector.broadcast %c0_i32 : i32 to vector<1x128xi32>
    %22 = arith.cmpi eq, %2, %21 : vector<1x128xi32>
    %23 = vector.extract_strided_slice %20 {offsets = [0, 0], sizes = [32, 1], strides = [1, 1]} : vector<32x2xf32> to vector<32x1xf32>
    %cst_17 = arith.constant 0.000000e+00 : f32
    %24 = vector.shape_cast %22 : vector<1x128xi1> to vector<1x128xi1>
    %25 = vector.broadcast %24 : vector<1x128xi1> to vector<32x128xi1>
    %26 = vector.shape_cast %23 : vector<32x1xf32> to vector<32x1xf32>
    %27 = vector.broadcast %26 : vector<32x1xf32> to vector<32x128xf32>
    %28 = vector.broadcast %cst_17 : f32 to vector<32x128xf32>
    %29 = arith.select %25, %27, %28 : vector<32x128xi1>, vector<32x128xf32>
    %c1_i32 = arith.constant 1 : i32
    %30 = vector.broadcast %c1_i32 : i32 to vector<1x128xi32>
    %31 = arith.cmpi eq, %2, %30 : vector<1x128xi32>
    %32 = vector.extract_strided_slice %20 {offsets = [0, 1], sizes = [32, 1], strides = [1, 1]} : vector<32x2xf32> to vector<32x1xf32>
    %33 = vector.shape_cast %31 : vector<1x128xi1> to vector<1x128xi1>
    %34 = vector.broadcast %33 : vector<1x128xi1> to vector<32x128xi1>
    %35 = vector.shape_cast %32 : vector<32x1xf32> to vector<32x1xf32>
    %36 = vector.broadcast %35 : vector<32x1xf32> to vector<32x128xf32>
    %37 = arith.select %34, %36, %29 : vector<32x128xi1>, vector<32x128xf32>
    %cst_18 = arith.constant 2.000000e+00 : f32
    %38 = vector.broadcast %cst_18 : f32 to vector<32x128xf32>
    %39 = arith.addf %38, %37 : vector<32x128xf32>
    %40 = arith.mulf %0, %39 : vector<32x128xf32>
    %c0_19 = arith.constant 0 : index
    %c0_20 = arith.constant 0 : index
    %41 = vector.load %arg8[%c0_19, %c0_20] : memref<32x1xf32, #tpu.memory_space<vmem>>, vector<32x1xf32>
    %c0_21 = arith.constant 0 : index
    %c0_22 = arith.constant 0 : index
    %c0_23 = arith.constant 0 : index
    %42 = vector.load %arg7[%c0_21, %c0_22, %c0_23] : memref<3x32x32xbf16, #tpu.memory_space<vmem>>, vector<1x32x32xbf16>
    %43 = vector.shape_cast %42 : vector<1x32x32xbf16> to vector<32x32xbf16>
    %c-1_i32 = arith.constant -1 : i32
    %44 = vector.broadcast %c-1_i32 : i32 to vector<1x128xi32>
    %45 = arith.addi %1, %44 : vector<1x128xi32>
    %c0_i32_24 = arith.constant 0 : i32
    %46 = vector.broadcast %c0_i32_24 : i32 to vector<1x128xi32>
    %47 = arith.cmpi sge, %45, %46 : vector<1x128xi32>
    %c16_i32 = arith.constant 16 : i32
    %48 = vector.broadcast %c16_i32 : i32 to vector<1x128xi32>
    %49 = arith.cmpi slt, %45, %48 : vector<1x128xi32>
    %50 = arith.andi %47, %49 : vector<1x128xi1>
    %cst_25 = arith.constant 0.000000e+00 : f32
    %51 = vector.broadcast %cst_25 : f32 to vector<32x1xf32>
    %52 = vector.extract_strided_slice %40 {offsets = [0, 0], sizes = [32, 127], strides = [1, 1]} : vector<32x128xf32> to vector<32x127xf32>
    %53 = tpu.concatenate %51, %52 in 1 : vector<32x1xf32>, vector<32x127xf32> -> vector<32x128xf32>
    %cst_26 = arith.constant 0.000000e+00 : f32
    %54 = vector.shape_cast %50 : vector<1x128xi1> to vector<1x128xi1>
    %55 = vector.broadcast %54 : vector<1x128xi1> to vector<32x128xi1>
    %56 = vector.broadcast %cst_26 : f32 to vector<32x128xf32>
    %57 = arith.select %55, %53, %56 : vector<32x128xi1>, vector<32x128xf32>
    %58 = arith.truncf %57 : vector<32x128xf32> to vector<32x128xbf16>
    %cst_27 = arith.constant dense<0.000000e+00> : vector<32x128xf32>
    %59 = tpu.matmul %43, %58, %cst_27 {dimension_numbers = #tpu.dot_dimension_numbers<[1], [0], [0], [1], [0, 0, 1, 1], [], []>} : vector<32x32xbf16>, vector<32x128xbf16>, vector<32x128xf32> -> vector<32x128xf32>
    %60 = vector.broadcast %41 : vector<32x1xf32> to vector<32x128xf32>
    %61 = arith.addf %60, %59 : vector<32x128xf32>
    %c1 = arith.constant 1 : index
    %c0_28 = arith.constant 0 : index
    %c0_29 = arith.constant 0 : index
    %62 = vector.load %arg7[%c1, %c0_28, %c0_29] : memref<3x32x32xbf16, #tpu.memory_space<vmem>>, vector<1x32x32xbf16>
    %63 = vector.shape_cast %62 : vector<1x32x32xbf16> to vector<32x32xbf16>
    %64 = arith.truncf %40 : vector<32x128xf32> to vector<32x128xbf16>
    %cst_30 = arith.constant dense<0.000000e+00> : vector<32x128xf32>
    %65 = tpu.matmul %63, %64, %cst_30 {dimension_numbers = #tpu.dot_dimension_numbers<[1], [0], [0], [1], [0, 0, 1, 1], [], []>} : vector<32x32xbf16>, vector<32x128xbf16>, vector<32x128xf32> -> vector<32x128xf32>
    %66 = arith.addf %61, %65 : vector<32x128xf32>
    %c2 = arith.constant 2 : index
    %c0_31 = arith.constant 0 : index
    %c0_32 = arith.constant 0 : index
    %67 = vector.load %arg7[%c2, %c0_31, %c0_32] : memref<3x32x32xbf16, #tpu.memory_space<vmem>>, vector<1x32x32xbf16>
    %68 = vector.shape_cast %67 : vector<1x32x32xbf16> to vector<32x32xbf16>
    %c1_i32_33 = arith.constant 1 : i32
    %69 = vector.broadcast %c1_i32_33 : i32 to vector<1x128xi32>
    %70 = arith.addi %1, %69 : vector<1x128xi32>
    %c0_i32_34 = arith.constant 0 : i32
    %71 = vector.broadcast %c0_i32_34 : i32 to vector<1x128xi32>
    %72 = arith.cmpi sge, %70, %71 : vector<1x128xi32>
    %c16_i32_35 = arith.constant 16 : i32
    %73 = vector.broadcast %c16_i32_35 : i32 to vector<1x128xi32>
    %74 = arith.cmpi slt, %70, %73 : vector<1x128xi32>
    %75 = arith.andi %72, %74 : vector<1x128xi1>
    %cst_36 = arith.constant 0.000000e+00 : f32
    %76 = vector.broadcast %cst_36 : f32 to vector<32x1xf32>
    %77 = vector.extract_strided_slice %40 {offsets = [0, 1], sizes = [32, 127], strides = [1, 1]} : vector<32x128xf32> to vector<32x127xf32>
    %78 = tpu.concatenate %77, %76 in 1 : vector<32x127xf32>, vector<32x1xf32> -> vector<32x128xf32>
    %cst_37 = arith.constant 0.000000e+00 : f32
    %79 = vector.shape_cast %75 : vector<1x128xi1> to vector<1x128xi1>
    %80 = vector.broadcast %79 : vector<1x128xi1> to vector<32x128xi1>
    %81 = vector.broadcast %cst_37 : f32 to vector<32x128xf32>
    %82 = arith.select %80, %78, %81 : vector<32x128xi1>, vector<32x128xf32>
    %83 = arith.truncf %82 : vector<32x128xf32> to vector<32x128xbf16>
    %cst_38 = arith.constant dense<0.000000e+00> : vector<32x128xf32>
    %84 = tpu.matmul %68, %83, %cst_38 {dimension_numbers = #tpu.dot_dimension_numbers<[1], [0], [0], [1], [0, 0, 1, 1], [], []>} : vector<32x32xbf16>, vector<32x128xbf16>, vector<32x128xf32> -> vector<32x128xf32>
    %85 = arith.addf %66, %84 : vector<32x128xf32>
    %cst_39 = arith.constant dense<0.000000e+00> : vector<32x1xf32>
    %86 = tpu.matmul %85, %4, %cst_39 {dimension_numbers = #tpu.dot_dimension_numbers<[1], [0], [0], [1], [0, 0, 1, 1], [], []>} : vector<32x128xf32>, vector<128x1xf32>, vector<32x1xf32> -> vector<32x1xf32>
    %87 = arith.mulf %85, %85 : vector<32x128xf32>
    %cst_40 = arith.constant dense<0.000000e+00> : vector<32x1xf32>
    %88 = tpu.matmul %87, %4, %cst_40 {dimension_numbers = #tpu.dot_dimension_numbers<[1], [0], [0], [1], [0, 0, 1, 1], [], []>} : vector<32x128xf32>, vector<128x1xf32>, vector<32x1xf32> -> vector<32x1xf32>
    %89 = arith.mulf %86, %86 : vector<32x1xf32>
    %90 = arith.subf %88, %89 : vector<32x1xf32>
    %cst_41 = arith.constant 0.000000e+00 : f32
    %91 = vector.broadcast %cst_41 : f32 to vector<32x1xf32>
    %92 = arith.maximumf %90, %91 : vector<32x1xf32>
    %c0_42 = arith.constant 0 : index
    %c0_43 = arith.constant 0 : index
    %93 = vector.load %arg9[%c0_42, %c0_43] : memref<32x1xf32, #tpu.memory_space<vmem>>, vector<32x1xf32>
    %cst_44 = arith.constant 9.99999974E-6 : f32
    %94 = vector.broadcast %cst_44 : f32 to vector<32x1xf32>
    %95 = arith.addf %92, %94 : vector<32x1xf32>
    %96 = math.rsqrt %95 : vector<32x1xf32>
    %97 = arith.mulf %93, %96 : vector<32x1xf32>
    %c0_45 = arith.constant 0 : index
    %c0_46 = arith.constant 0 : index
    %98 = vector.load %arg10[%c0_45, %c0_46] : memref<32x1xf32, #tpu.memory_space<vmem>>, vector<32x1xf32>
    %99 = arith.mulf %86, %97 : vector<32x1xf32>
    %100 = arith.subf %98, %99 : vector<32x1xf32>
    %101 = vector.broadcast %97 : vector<32x1xf32> to vector<32x128xf32>
    %102 = arith.mulf %85, %101 : vector<32x128xf32>
    %103 = vector.broadcast %100 : vector<32x1xf32> to vector<32x128xf32>
    %104 = arith.addf %102, %103 : vector<32x128xf32>
    %cst_47 = arith.constant 0.000000e+00 : f32
    %105 = vector.broadcast %cst_47 : f32 to vector<32x128xf32>
    %106 = arith.maximumf %104, %105 : vector<32x128xf32>
    %c0_48 = arith.constant 0 : index
    %c0_49 = arith.constant 0 : index
    %107 = vector.load %arg26[%c0_48, %c0_49] : memref<32x1xf32, #tpu.memory_space<vmem>>, vector<32x1xf32>
    %cst_50 = arith.constant 0.000000e+00 : f32
    %108 = vector.broadcast %cst_50 : f32 to vector<32x1xf32>
    %109 = arith.maximumf %107, %108 : vector<32x1xf32>
    %c0_51 = arith.constant 0 : index
    %c0_52 = arith.constant 0 : index
    %110 = vector.load %arg25[%c0_51, %c0_52] : memref<32x32xbf16, #tpu.memory_space<vmem>>, vector<32x32xbf16>
    %111 = arith.truncf %106 : vector<32x128xf32> to vector<32x128xbf16>
    %cst_53 = arith.constant dense<0.000000e+00> : vector<32x128xf32>
    %112 = tpu.matmul %110, %111, %cst_53 {dimension_numbers = #tpu.dot_dimension_numbers<[1], [0], [0], [1], [0, 0, 1, 1], [], []>} : vector<32x32xbf16>, vector<32x128xbf16>, vector<32x128xf32> -> vector<32x128xf32>
    %c0_54 = arith.constant 0 : index
    %c0_55 = arith.constant 0 : index
    %113 = vector.load %arg26[%c0_54, %c0_55] : memref<32x1xf32, #tpu.memory_space<vmem>>, vector<32x1xf32>
    %114 = vector.broadcast %113 : vector<32x1xf32> to vector<32x128xf32>
    %115 = arith.addf %112, %114 : vector<32x128xf32>
    %cst_56 = arith.constant 0.000000e+00 : f32
    %116 = vector.broadcast %cst_56 : f32 to vector<32x128xf32>
    %117 = arith.maximumf %115, %116 : vector<32x128xf32>
    %c0_57 = arith.constant 0 : index
    %c0_58 = arith.constant 0 : index
    %118 = vector.load %arg18[%c0_57, %c0_58] : memref<32x1xf32, #tpu.memory_space<vmem>>, vector<32x1xf32>
    %c0_59 = arith.constant 0 : index
    %c0_60 = arith.constant 0 : index
    %c0_61 = arith.constant 0 : index
    %119 = vector.load %arg17[%c0_59, %c0_60, %c0_61] : memref<3x32x32xbf16, #tpu.memory_space<vmem>>, vector<1x32x32xbf16>
    %120 = vector.shape_cast %119 : vector<1x32x32xbf16> to vector<32x32xbf16>
    %cst_62 = arith.constant 0.000000e+00 : f32
    %121 = vector.broadcast %cst_62 : f32 to vector<32x1xf32>
    %122 = vector.extract_strided_slice %117 {offsets = [0, 0], sizes = [32, 127], strides = [1, 1]} : vector<32x128xf32> to vector<32x127xf32>
    %123 = tpu.concatenate %121, %122 in 1 : vector<32x1xf32>, vector<32x127xf32> -> vector<32x128xf32>
    %cst_63 = arith.constant 0.000000e+00 : f32
    %124 = vector.shape_cast %50 : vector<1x128xi1> to vector<1x128xi1>
    %125 = vector.broadcast %124 : vector<1x128xi1> to vector<32x128xi1>
    %126 = vector.broadcast %cst_63 : f32 to vector<32x128xf32>
    %127 = arith.select %125, %123, %126 : vector<32x128xi1>, vector<32x128xf32>
    %c-1_i32_64 = arith.constant -1 : i32
    %128 = vector.broadcast %c-1_i32_64 : i32 to vector<1x128xi32>
    %129 = arith.addi %1, %128 : vector<1x128xi32>
    %cst_65 = arith.constant dense<true> : vector<1x128xi1>
    %130 = arith.xori %50, %cst_65 : vector<1x128xi1>
    %c-1_i32_66 = arith.constant -1 : i32
    %131 = vector.broadcast %c-1_i32_66 : i32 to vector<1x128xi32>
    %132 = arith.cmpi sge, %129, %131 : vector<1x128xi32>
    %c17_i32 = arith.constant 17 : i32
    %133 = vector.broadcast %c17_i32 : i32 to vector<1x128xi32>
    %134 = arith.cmpi slt, %129, %133 : vector<1x128xi32>
    %135 = arith.andi %132, %134 : vector<1x128xi1>
    %136 = arith.andi %130, %135 : vector<1x128xi1>
    %137 = vector.shape_cast %136 : vector<1x128xi1> to vector<1x128xi1>
    %138 = vector.broadcast %137 : vector<1x128xi1> to vector<32x128xi1>
    %139 = vector.shape_cast %109 : vector<32x1xf32> to vector<32x1xf32>
    %140 = vector.broadcast %139 : vector<32x1xf32> to vector<32x128xf32>
    %141 = arith.select %138, %140, %127 : vector<32x128xi1>, vector<32x128xf32>
    %142 = arith.truncf %141 : vector<32x128xf32> to vector<32x128xbf16>
    %cst_67 = arith.constant dense<0.000000e+00> : vector<32x128xf32>
    %143 = tpu.matmul %120, %142, %cst_67 {dimension_numbers = #tpu.dot_dimension_numbers<[1], [0], [0], [1], [0, 0, 1, 1], [], []>} : vector<32x32xbf16>, vector<32x128xbf16>, vector<32x128xf32> -> vector<32x128xf32>
    %144 = vector.broadcast %118 : vector<32x1xf32> to vector<32x128xf32>
    %145 = arith.addf %144, %143 : vector<32x128xf32>
    %c1_68 = arith.constant 1 : index
    %c0_69 = arith.constant 0 : index
    %c0_70 = arith.constant 0 : index
    %146 = vector.load %arg17[%c1_68, %c0_69, %c0_70] : memref<3x32x32xbf16, #tpu.memory_space<vmem>>, vector<1x32x32xbf16>
    %147 = vector.shape_cast %146 : vector<1x32x32xbf16> to vector<32x32xbf16>
    %148 = arith.truncf %117 : vector<32x128xf32> to vector<32x128xbf16>
    %cst_71 = arith.constant dense<0.000000e+00> : vector<32x128xf32>
    %149 = tpu.matmul %147, %148, %cst_71 {dimension_numbers = #tpu.dot_dimension_numbers<[1], [0], [0], [1], [0, 0, 1, 1], [], []>} : vector<32x32xbf16>, vector<32x128xbf16>, vector<32x128xf32> -> vector<32x128xf32>
    %150 = arith.addf %145, %149 : vector<32x128xf32>
    %c2_72 = arith.constant 2 : index
    %c0_73 = arith.constant 0 : index
    %c0_74 = arith.constant 0 : index
    %151 = vector.load %arg17[%c2_72, %c0_73, %c0_74] : memref<3x32x32xbf16, #tpu.memory_space<vmem>>, vector<1x32x32xbf16>
    %152 = vector.shape_cast %151 : vector<1x32x32xbf16> to vector<32x32xbf16>
    %cst_75 = arith.constant 0.000000e+00 : f32
    %153 = vector.broadcast %cst_75 : f32 to vector<32x1xf32>
    %154 = vector.extract_strided_slice %117 {offsets = [0, 1], sizes = [32, 127], strides = [1, 1]} : vector<32x128xf32> to vector<32x127xf32>
    %155 = tpu.concatenate %154, %153 in 1 : vector<32x127xf32>, vector<32x1xf32> -> vector<32x128xf32>
    %cst_76 = arith.constant 0.000000e+00 : f32
    %156 = vector.shape_cast %75 : vector<1x128xi1> to vector<1x128xi1>
    %157 = vector.broadcast %156 : vector<1x128xi1> to vector<32x128xi1>
    %158 = vector.broadcast %cst_76 : f32 to vector<32x128xf32>
    %159 = arith.select %157, %155, %158 : vector<32x128xi1>, vector<32x128xf32>
    %c1_i32_77 = arith.constant 1 : i32
    %160 = vector.broadcast %c1_i32_77 : i32 to vector<1x128xi32>
    %161 = arith.addi %1, %160 : vector<1x128xi32>
    %cst_78 = arith.constant dense<true> : vector<1x128xi1>
    %162 = arith.xori %75, %cst_78 : vector<1x128xi1>
    %c-1_i32_79 = arith.constant -1 : i32
    %163 = vector.broadcast %c-1_i32_79 : i32 to vector<1x128xi32>
    %164 = arith.cmpi sge, %161, %163 : vector<1x128xi32>
    %c17_i32_80 = arith.constant 17 : i32
    %165 = vector.broadcast %c17_i32_80 : i32 to vector<1x128xi32>
    %166 = arith.cmpi slt, %161, %165 : vector<1x128xi32>
    %167 = arith.andi %164, %166 : vector<1x128xi1>
    %168 = arith.andi %162, %167 : vector<1x128xi1>
    %169 = vector.shape_cast %168 : vector<1x128xi1> to vector<1x128xi1>
    %170 = vector.broadcast %169 : vector<1x128xi1> to vector<32x128xi1>
    %171 = vector.shape_cast %109 : vector<32x1xf32> to vector<32x1xf32>
    %172 = vector.broadcast %171 : vector<32x1xf32> to vector<32x128xf32>
    %173 = arith.select %170, %172, %159 : vector<32x128xi1>, vector<32x128xf32>
    %174 = arith.truncf %173 : vector<32x128xf32> to vector<32x128xbf16>
    %cst_81 = arith.constant dense<0.000000e+00> : vector<32x128xf32>
    %175 = tpu.matmul %152, %174, %cst_81 {dimension_numbers = #tpu.dot_dimension_numbers<[1], [0], [0], [1], [0, 0, 1, 1], [], []>} : vector<32x32xbf16>, vector<32x128xbf16>, vector<32x128xf32> -> vector<32x128xf32>
    %176 = arith.addf %150, %175 : vector<32x128xf32>
    %cst_82 = arith.constant 0.000000e+00 : f32
    %177 = vector.broadcast %cst_82 : f32 to vector<32x128xf32>
    %178 = arith.maximumf %176, %177 : vector<32x128xf32>
    %179 = arith.truncf %178 : vector<32x128xf32> to vector<32x128xbf16>
    %c0_83 = arith.constant 0 : index
    %c0_84 = arith.constant 0 : index
    %180 = vector.load %arg28[%c0_83, %c0_84] : memref<32x1xf32, #tpu.memory_space<vmem>>, vector<32x1xf32>
    %cst_85 = arith.constant 0.000000e+00 : f32
    %181 = vector.broadcast %cst_85 : f32 to vector<32x1xf32>
    %182 = arith.maximumf %180, %181 : vector<32x1xf32>
    %c0_86 = arith.constant 0 : index
    %c0_87 = arith.constant 0 : index
    %183 = vector.load %arg27[%c0_86, %c0_87] : memref<32x32xbf16, #tpu.memory_space<vmem>>, vector<32x32xbf16>
    %184 = arith.truncf %106 : vector<32x128xf32> to vector<32x128xbf16>
    %cst_88 = arith.constant dense<0.000000e+00> : vector<32x128xf32>
    %185 = tpu.matmul %183, %184, %cst_88 {dimension_numbers = #tpu.dot_dimension_numbers<[1], [0], [0], [1], [0, 0, 1, 1], [], []>} : vector<32x32xbf16>, vector<32x128xbf16>, vector<32x128xf32> -> vector<32x128xf32>
    %c0_89 = arith.constant 0 : index
    %c0_90 = arith.constant 0 : index
    %186 = vector.load %arg28[%c0_89, %c0_90] : memref<32x1xf32, #tpu.memory_space<vmem>>, vector<32x1xf32>
    %187 = vector.broadcast %186 : vector<32x1xf32> to vector<32x128xf32>
    %188 = arith.addf %185, %187 : vector<32x128xf32>
    %cst_91 = arith.constant 0.000000e+00 : f32
    %189 = vector.broadcast %cst_91 : f32 to vector<32x128xf32>
    %190 = arith.maximumf %188, %189 : vector<32x128xf32>
    %c0_92 = arith.constant 0 : index
    %c0_93 = arith.constant 0 : index
    %191 = vector.load %arg20[%c0_92, %c0_93] : memref<32x1xf32, #tpu.memory_space<vmem>>, vector<32x1xf32>
    %c0_94 = arith.constant 0 : index
    %c0_95 = arith.constant 0 : index
    %c0_96 = arith.constant 0 : index
    %192 = vector.load %arg19[%c0_94, %c0_95, %c0_96] : memref<5x32x32xbf16, #tpu.memory_space<vmem>>, vector<1x32x32xbf16>
    %193 = vector.shape_cast %192 : vector<1x32x32xbf16> to vector<32x32xbf16>
    %c-4_i32 = arith.constant -4 : i32
    %194 = vector.broadcast %c-4_i32 : i32 to vector<1x128xi32>
    %195 = arith.addi %1, %194 : vector<1x128xi32>
    %c0_i32_97 = arith.constant 0 : i32
    %196 = vector.broadcast %c0_i32_97 : i32 to vector<1x128xi32>
    %197 = arith.cmpi sge, %195, %196 : vector<1x128xi32>
    %c16_i32_98 = arith.constant 16 : i32
    %198 = vector.broadcast %c16_i32_98 : i32 to vector<1x128xi32>
    %199 = arith.cmpi slt, %195, %198 : vector<1x128xi32>
    %200 = arith.andi %197, %199 : vector<1x128xi1>
    %cst_99 = arith.constant 0.000000e+00 : f32
    %201 = vector.broadcast %cst_99 : f32 to vector<32x4xf32>
    %202 = vector.extract_strided_slice %190 {offsets = [0, 0], sizes = [32, 124], strides = [1, 1]} : vector<32x128xf32> to vector<32x124xf32>
    %203 = tpu.concatenate %201, %202 in 1 : vector<32x4xf32>, vector<32x124xf32> -> vector<32x128xf32>
    %cst_100 = arith.constant 0.000000e+00 : f32
    %204 = vector.shape_cast %200 : vector<1x128xi1> to vector<1x128xi1>
    %205 = vector.broadcast %204 : vector<1x128xi1> to vector<32x128xi1>
    %206 = vector.broadcast %cst_100 : f32 to vector<32x128xf32>
    %207 = arith.select %205, %203, %206 : vector<32x128xi1>, vector<32x128xf32>
    %c-4_i32_101 = arith.constant -4 : i32
    %208 = vector.broadcast %c-4_i32_101 : i32 to vector<1x128xi32>
    %209 = arith.addi %1, %208 : vector<1x128xi32>
    %cst_102 = arith.constant dense<true> : vector<1x128xi1>
    %210 = arith.xori %200, %cst_102 : vector<1x128xi1>
    %c-1_i32_103 = arith.constant -1 : i32
    %211 = vector.broadcast %c-1_i32_103 : i32 to vector<1x128xi32>
    %212 = arith.cmpi sge, %209, %211 : vector<1x128xi32>
    %c17_i32_104 = arith.constant 17 : i32
    %213 = vector.broadcast %c17_i32_104 : i32 to vector<1x128xi32>
    %214 = arith.cmpi slt, %209, %213 : vector<1x128xi32>
    %215 = arith.andi %212, %214 : vector<1x128xi1>
    %216 = arith.andi %210, %215 : vector<1x128xi1>
    %217 = vector.shape_cast %216 : vector<1x128xi1> to vector<1x128xi1>
    %218 = vector.broadcast %217 : vector<1x128xi1> to vector<32x128xi1>
    %219 = vector.shape_cast %182 : vector<32x1xf32> to vector<32x1xf32>
    %220 = vector.broadcast %219 : vector<32x1xf32> to vector<32x128xf32>
    %221 = arith.select %218, %220, %207 : vector<32x128xi1>, vector<32x128xf32>
    %222 = arith.truncf %221 : vector<32x128xf32> to vector<32x128xbf16>
    %cst_105 = arith.constant dense<0.000000e+00> : vector<32x128xf32>
    %223 = tpu.matmul %193, %222, %cst_105 {dimension_numbers = #tpu.dot_dimension_numbers<[1], [0], [0], [1], [0, 0, 1, 1], [], []>} : vector<32x32xbf16>, vector<32x128xbf16>, vector<32x128xf32> -> vector<32x128xf32>
    %224 = vector.broadcast %191 : vector<32x1xf32> to vector<32x128xf32>
    %225 = arith.addf %224, %223 : vector<32x128xf32>
    %c1_106 = arith.constant 1 : index
    %c0_107 = arith.constant 0 : index
    %c0_108 = arith.constant 0 : index
    %226 = vector.load %arg19[%c1_106, %c0_107, %c0_108] : memref<5x32x32xbf16, #tpu.memory_space<vmem>>, vector<1x32x32xbf16>
    %227 = vector.shape_cast %226 : vector<1x32x32xbf16> to vector<32x32xbf16>
    %c-2_i32 = arith.constant -2 : i32
    %228 = vector.broadcast %c-2_i32 : i32 to vector<1x128xi32>
    %229 = arith.addi %1, %228 : vector<1x128xi32>
    %c0_i32_109 = arith.constant 0 : i32
    %230 = vector.broadcast %c0_i32_109 : i32 to vector<1x128xi32>
    %231 = arith.cmpi sge, %229, %230 : vector<1x128xi32>
    %c16_i32_110 = arith.constant 16 : i32
    %232 = vector.broadcast %c16_i32_110 : i32 to vector<1x128xi32>
    %233 = arith.cmpi slt, %229, %232 : vector<1x128xi32>
    %234 = arith.andi %231, %233 : vector<1x128xi1>
    %cst_111 = arith.constant 0.000000e+00 : f32
    %235 = vector.broadcast %cst_111 : f32 to vector<32x2xf32>
    %236 = vector.extract_strided_slice %190 {offsets = [0, 0], sizes = [32, 126], strides = [1, 1]} : vector<32x128xf32> to vector<32x126xf32>
    %237 = tpu.concatenate %235, %236 in 1 : vector<32x2xf32>, vector<32x126xf32> -> vector<32x128xf32>
    %cst_112 = arith.constant 0.000000e+00 : f32
    %238 = vector.shape_cast %234 : vector<1x128xi1> to vector<1x128xi1>
    %239 = vector.broadcast %238 : vector<1x128xi1> to vector<32x128xi1>
    %240 = vector.broadcast %cst_112 : f32 to vector<32x128xf32>
    %241 = arith.select %239, %237, %240 : vector<32x128xi1>, vector<32x128xf32>
    %c-2_i32_113 = arith.constant -2 : i32
    %242 = vector.broadcast %c-2_i32_113 : i32 to vector<1x128xi32>
    %243 = arith.addi %1, %242 : vector<1x128xi32>
    %cst_114 = arith.constant dense<true> : vector<1x128xi1>
    %244 = arith.xori %234, %cst_114 : vector<1x128xi1>
    %c-1_i32_115 = arith.constant -1 : i32
    %245 = vector.broadcast %c-1_i32_115 : i32 to vector<1x128xi32>
    %246 = arith.cmpi sge, %243, %245 : vector<1x128xi32>
    %c17_i32_116 = arith.constant 17 : i32
    %247 = vector.broadcast %c17_i32_116 : i32 to vector<1x128xi32>
    %248 = arith.cmpi slt, %243, %247 : vector<1x128xi32>
    %249 = arith.andi %246, %248 : vector<1x128xi1>
    %250 = arith.andi %244, %249 : vector<1x128xi1>
    %251 = vector.shape_cast %250 : vector<1x128xi1> to vector<1x128xi1>
    %252 = vector.broadcast %251 : vector<1x128xi1> to vector<32x128xi1>
    %253 = vector.shape_cast %182 : vector<32x1xf32> to vector<32x1xf32>
    %254 = vector.broadcast %253 : vector<32x1xf32> to vector<32x128xf32>
    %255 = arith.select %252, %254, %241 : vector<32x128xi1>, vector<32x128xf32>
    %256 = arith.truncf %255 : vector<32x128xf32> to vector<32x128xbf16>
    %cst_117 = arith.constant dense<0.000000e+00> : vector<32x128xf32>
    %257 = tpu.matmul %227, %256, %cst_117 {dimension_numbers = #tpu.dot_dimension_numbers<[1], [0], [0], [1], [0, 0, 1, 1], [], []>} : vector<32x32xbf16>, vector<32x128xbf16>, vector<32x128xf32> -> vector<32x128xf32>
    %258 = arith.addf %225, %257 : vector<32x128xf32>
    %c2_118 = arith.constant 2 : index
    %c0_119 = arith.constant 0 : index
    %c0_120 = arith.constant 0 : index
    %259 = vector.load %arg19[%c2_118, %c0_119, %c0_120] : memref<5x32x32xbf16, #tpu.memory_space<vmem>>, vector<1x32x32xbf16>
    %260 = vector.shape_cast %259 : vector<1x32x32xbf16> to vector<32x32xbf16>
    %261 = arith.truncf %190 : vector<32x128xf32> to vector<32x128xbf16>
    %cst_121 = arith.constant dense<0.000000e+00> : vector<32x128xf32>
    %262 = tpu.matmul %260, %261, %cst_121 {dimension_numbers = #tpu.dot_dimension_numbers<[1], [0], [0], [1], [0, 0, 1, 1], [], []>} : vector<32x32xbf16>, vector<32x128xbf16>, vector<32x128xf32> -> vector<32x128xf32>
    %263 = arith.addf %258, %262 : vector<32x128xf32>
    %c3 = arith.constant 3 : index
    %c0_122 = arith.constant 0 : index
    %c0_123 = arith.constant 0 : index
    %264 = vector.load %arg19[%c3, %c0_122, %c0_123] : memref<5x32x32xbf16, #tpu.memory_space<vmem>>, vector<1x32x32xbf16>
    %265 = vector.shape_cast %264 : vector<1x32x32xbf16> to vector<32x32xbf16>
    %c2_i32 = arith.constant 2 : i32
    %266 = vector.broadcast %c2_i32 : i32 to vector<1x128xi32>
    %267 = arith.addi %1, %266 : vector<1x128xi32>
    %c0_i32_124 = arith.constant 0 : i32
    %268 = vector.broadcast %c0_i32_124 : i32 to vector<1x128xi32>
    %269 = arith.cmpi sge, %267, %268 : vector<1x128xi32>
    %c16_i32_125 = arith.constant 16 : i32
    %270 = vector.broadcast %c16_i32_125 : i32 to vector<1x128xi32>
    %271 = arith.cmpi slt, %267, %270 : vector<1x128xi32>
    %272 = arith.andi %269, %271 : vector<1x128xi1>
    %cst_126 = arith.constant 0.000000e+00 : f32
    %273 = vector.broadcast %cst_126 : f32 to vector<32x2xf32>
    %274 = vector.extract_strided_slice %190 {offsets = [0, 2], sizes = [32, 126], strides = [1, 1]} : vector<32x128xf32> to vector<32x126xf32>
    %275 = tpu.concatenate %274, %273 in 1 : vector<32x126xf32>, vector<32x2xf32> -> vector<32x128xf32>
    %cst_127 = arith.constant 0.000000e+00 : f32
    %276 = vector.shape_cast %272 : vector<1x128xi1> to vector<1x128xi1>
    %277 = vector.broadcast %276 : vector<1x128xi1> to vector<32x128xi1>
    %278 = vector.broadcast %cst_127 : f32 to vector<32x128xf32>
    %279 = arith.select %277, %275, %278 : vector<32x128xi1>, vector<32x128xf32>
    %c2_i32_128 = arith.constant 2 : i32
    %280 = vector.broadcast %c2_i32_128 : i32 to vector<1x128xi32>
    %281 = arith.addi %1, %280 : vector<1x128xi32>
    %cst_129 = arith.constant dense<true> : vector<1x128xi1>
    %282 = arith.xori %272, %cst_129 : vector<1x128xi1>
    %c-1_i32_130 = arith.constant -1 : i32
    %283 = vector.broadcast %c-1_i32_130 : i32 to vector<1x128xi32>
    %284 = arith.cmpi sge, %281, %283 : vector<1x128xi32>
    %c17_i32_131 = arith.constant 17 : i32
    %285 = vector.broadcast %c17_i32_131 : i32 to vector<1x128xi32>
    %286 = arith.cmpi slt, %281, %285 : vector<1x128xi32>
    %287 = arith.andi %284, %286 : vector<1x128xi1>
    %288 = arith.andi %282, %287 : vector<1x128xi1>
    %289 = vector.shape_cast %288 : vector<1x128xi1> to vector<1x128xi1>
    %290 = vector.broadcast %289 : vector<1x128xi1> to vector<32x128xi1>
    %291 = vector.shape_cast %182 : vector<32x1xf32> to vector<32x1xf32>
    %292 = vector.broadcast %291 : vector<32x1xf32> to vector<32x128xf32>
    %293 = arith.select %290, %292, %279 : vector<32x128xi1>, vector<32x128xf32>
    %294 = arith.truncf %293 : vector<32x128xf32> to vector<32x128xbf16>
    %cst_132 = arith.constant dense<0.000000e+00> : vector<32x128xf32>
    %295 = tpu.matmul %265, %294, %cst_132 {dimension_numbers = #tpu.dot_dimension_numbers<[1], [0], [0], [1], [0, 0, 1, 1], [], []>} : vector<32x32xbf16>, vector<32x128xbf16>, vector<32x128xf32> -> vector<32x128xf32>
    %296 = arith.addf %263, %295 : vector<32x128xf32>
    %c4 = arith.constant 4 : index
    %c0_133 = arith.constant 0 : index
    %c0_134 = arith.constant 0 : index
    %297 = vector.load %arg19[%c4, %c0_133, %c0_134] : memref<5x32x32xbf16, #tpu.memory_space<vmem>>, vector<1x32x32xbf16>
    %298 = vector.shape_cast %297 : vector<1x32x32xbf16> to vector<32x32xbf16>
    %c4_i32 = arith.constant 4 : i32
    %299 = vector.broadcast %c4_i32 : i32 to vector<1x128xi32>
    %300 = arith.addi %1, %299 : vector<1x128xi32>
    %c0_i32_135 = arith.constant 0 : i32
    %301 = vector.broadcast %c0_i32_135 : i32 to vector<1x128xi32>
    %302 = arith.cmpi sge, %300, %301 : vector<1x128xi32>
    %c16_i32_136 = arith.constant 16 : i32
    %303 = vector.broadcast %c16_i32_136 : i32 to vector<1x128xi32>
    %304 = arith.cmpi slt, %300, %303 : vector<1x128xi32>
    %305 = arith.andi %302, %304 : vector<1x128xi1>
    %cst_137 = arith.constant 0.000000e+00 : f32
    %306 = vector.broadcast %cst_137 : f32 to vector<32x4xf32>
    %307 = vector.extract_strided_slice %190 {offsets = [0, 4], sizes = [32, 124], strides = [1, 1]} : vector<32x128xf32> to vector<32x124xf32>
    %308 = tpu.concatenate %307, %306 in 1 : vector<32x124xf32>, vector<32x4xf32> -> vector<32x128xf32>
    %cst_138 = arith.constant 0.000000e+00 : f32
    %309 = vector.shape_cast %305 : vector<1x128xi1> to vector<1x128xi1>
    %310 = vector.broadcast %309 : vector<1x128xi1> to vector<32x128xi1>
    %311 = vector.broadcast %cst_138 : f32 to vector<32x128xf32>
    %312 = arith.select %310, %308, %311 : vector<32x128xi1>, vector<32x128xf32>
    %c4_i32_139 = arith.constant 4 : i32
    %313 = vector.broadcast %c4_i32_139 : i32 to vector<1x128xi32>
    %314 = arith.addi %1, %313 : vector<1x128xi32>
    %cst_140 = arith.constant dense<true> : vector<1x128xi1>
    %315 = arith.xori %305, %cst_140 : vector<1x128xi1>
    %c-1_i32_141 = arith.constant -1 : i32
    %316 = vector.broadcast %c-1_i32_141 : i32 to vector<1x128xi32>
    %317 = arith.cmpi sge, %314, %316 : vector<1x128xi32>
    %c17_i32_142 = arith.constant 17 : i32
    %318 = vector.broadcast %c17_i32_142 : i32 to vector<1x128xi32>
    %319 = arith.cmpi slt, %314, %318 : vector<1x128xi32>
    %320 = arith.andi %317, %319 : vector<1x128xi1>
    %321 = arith.andi %315, %320 : vector<1x128xi1>
    %322 = vector.shape_cast %321 : vector<1x128xi1> to vector<1x128xi1>
    %323 = vector.broadcast %322 : vector<1x128xi1> to vector<32x128xi1>
    %324 = vector.shape_cast %182 : vector<32x1xf32> to vector<32x1xf32>
    %325 = vector.broadcast %324 : vector<32x1xf32> to vector<32x128xf32>
    %326 = arith.select %323, %325, %312 : vector<32x128xi1>, vector<32x128xf32>
    %327 = arith.truncf %326 : vector<32x128xf32> to vector<32x128xbf16>
    %cst_143 = arith.constant dense<0.000000e+00> : vector<32x128xf32>
    %328 = tpu.matmul %298, %327, %cst_143 {dimension_numbers = #tpu.dot_dimension_numbers<[1], [0], [0], [1], [0, 0, 1, 1], [], []>} : vector<32x32xbf16>, vector<32x128xbf16>, vector<32x128xf32> -> vector<32x128xf32>
    %329 = arith.addf %296, %328 : vector<32x128xf32>
    %cst_144 = arith.constant 0.000000e+00 : f32
    %330 = vector.broadcast %cst_144 : f32 to vector<32x128xf32>
    %331 = arith.maximumf %329, %330 : vector<32x128xf32>
    %332 = arith.truncf %331 : vector<32x128xf32> to vector<32x128xbf16>
    %c0_145 = arith.constant 0 : index
    %c0_146 = arith.constant 0 : index
    %333 = vector.load %arg22[%c0_145, %c0_146] : memref<32x1xf32, #tpu.memory_space<vmem>>, vector<32x1xf32>
    %c0_147 = arith.constant 0 : index
    %c0_148 = arith.constant 0 : index
    %c0_149 = arith.constant 0 : index
    %334 = vector.load %arg21[%c0_147, %c0_148, %c0_149] : memref<7x32x32xbf16, #tpu.memory_space<vmem>>, vector<1x32x32xbf16>
    %335 = vector.shape_cast %334 : vector<1x32x32xbf16> to vector<32x32xbf16>
    %c-3_i32 = arith.constant -3 : i32
    %336 = vector.broadcast %c-3_i32 : i32 to vector<1x128xi32>
    %337 = arith.addi %1, %336 : vector<1x128xi32>
    %c0_i32_150 = arith.constant 0 : i32
    %338 = vector.broadcast %c0_i32_150 : i32 to vector<1x128xi32>
    %339 = arith.cmpi sge, %337, %338 : vector<1x128xi32>
    %c16_i32_151 = arith.constant 16 : i32
    %340 = vector.broadcast %c16_i32_151 : i32 to vector<1x128xi32>
    %341 = arith.cmpi slt, %337, %340 : vector<1x128xi32>
    %342 = arith.andi %339, %341 : vector<1x128xi1>
    %cst_152 = arith.constant 0.000000e+00 : f32
    %343 = vector.broadcast %cst_152 : f32 to vector<32x3xf32>
    %344 = vector.extract_strided_slice %106 {offsets = [0, 0], sizes = [32, 125], strides = [1, 1]} : vector<32x128xf32> to vector<32x125xf32>
    %345 = tpu.concatenate %343, %344 in 1 : vector<32x3xf32>, vector<32x125xf32> -> vector<32x128xf32>
    %cst_153 = arith.constant 0.000000e+00 : f32
    %346 = vector.shape_cast %342 : vector<1x128xi1> to vector<1x128xi1>
    %347 = vector.broadcast %346 : vector<1x128xi1> to vector<32x128xi1>
    %348 = vector.broadcast %cst_153 : f32 to vector<32x128xf32>
    %349 = arith.select %347, %345, %348 : vector<32x128xi1>, vector<32x128xf32>
    %350 = arith.truncf %349 : vector<32x128xf32> to vector<32x128xbf16>
    %cst_154 = arith.constant dense<0.000000e+00> : vector<32x128xf32>
    %351 = tpu.matmul %335, %350, %cst_154 {dimension_numbers = #tpu.dot_dimension_numbers<[1], [0], [0], [1], [0, 0, 1, 1], [], []>} : vector<32x32xbf16>, vector<32x128xbf16>, vector<32x128xf32> -> vector<32x128xf32>
    %352 = vector.broadcast %333 : vector<32x1xf32> to vector<32x128xf32>
    %353 = arith.addf %352, %351 : vector<32x128xf32>
    %c1_155 = arith.constant 1 : index
    %c0_156 = arith.constant 0 : index
    %c0_157 = arith.constant 0 : index
    %354 = vector.load %arg21[%c1_155, %c0_156, %c0_157] : memref<7x32x32xbf16, #tpu.memory_space<vmem>>, vector<1x32x32xbf16>
    %355 = vector.shape_cast %354 : vector<1x32x32xbf16> to vector<32x32xbf16>
    %cst_158 = arith.constant 0.000000e+00 : f32
    %356 = vector.broadcast %cst_158 : f32 to vector<32x2xf32>
    %357 = vector.extract_strided_slice %106 {offsets = [0, 0], sizes = [32, 126], strides = [1, 1]} : vector<32x128xf32> to vector<32x126xf32>
    %358 = tpu.concatenate %356, %357 in 1 : vector<32x2xf32>, vector<32x126xf32> -> vector<32x128xf32>
    %cst_159 = arith.constant 0.000000e+00 : f32
    %359 = vector.shape_cast %234 : vector<1x128xi1> to vector<1x128xi1>
    %360 = vector.broadcast %359 : vector<1x128xi1> to vector<32x128xi1>
    %361 = vector.broadcast %cst_159 : f32 to vector<32x128xf32>
    %362 = arith.select %360, %358, %361 : vector<32x128xi1>, vector<32x128xf32>
    %363 = arith.truncf %362 : vector<32x128xf32> to vector<32x128xbf16>
    %cst_160 = arith.constant dense<0.000000e+00> : vector<32x128xf32>
    %364 = tpu.matmul %355, %363, %cst_160 {dimension_numbers = #tpu.dot_dimension_numbers<[1], [0], [0], [1], [0, 0, 1, 1], [], []>} : vector<32x32xbf16>, vector<32x128xbf16>, vector<32x128xf32> -> vector<32x128xf32>
    %365 = arith.addf %353, %364 : vector<32x128xf32>
    %c2_161 = arith.constant 2 : index
    %c0_162 = arith.constant 0 : index
    %c0_163 = arith.constant 0 : index
    %366 = vector.load %arg21[%c2_161, %c0_162, %c0_163] : memref<7x32x32xbf16, #tpu.memory_space<vmem>>, vector<1x32x32xbf16>
    %367 = vector.shape_cast %366 : vector<1x32x32xbf16> to vector<32x32xbf16>
    %cst_164 = arith.constant 0.000000e+00 : f32
    %368 = vector.broadcast %cst_164 : f32 to vector<32x1xf32>
    %369 = vector.extract_strided_slice %106 {offsets = [0, 0], sizes = [32, 127], strides = [1, 1]} : vector<32x128xf32> to vector<32x127xf32>
    %370 = tpu.concatenate %368, %369 in 1 : vector<32x1xf32>, vector<32x127xf32> -> vector<32x128xf32>
    %cst_165 = arith.constant 0.000000e+00 : f32
    %371 = vector.shape_cast %50 : vector<1x128xi1> to vector<1x128xi1>
    %372 = vector.broadcast %371 : vector<1x128xi1> to vector<32x128xi1>
    %373 = vector.broadcast %cst_165 : f32 to vector<32x128xf32>
    %374 = arith.select %372, %370, %373 : vector<32x128xi1>, vector<32x128xf32>
    %375 = arith.truncf %374 : vector<32x128xf32> to vector<32x128xbf16>
    %cst_166 = arith.constant dense<0.000000e+00> : vector<32x128xf32>
    %376 = tpu.matmul %367, %375, %cst_166 {dimension_numbers = #tpu.dot_dimension_numbers<[1], [0], [0], [1], [0, 0, 1, 1], [], []>} : vector<32x32xbf16>, vector<32x128xbf16>, vector<32x128xf32> -> vector<32x128xf32>
    %377 = arith.addf %365, %376 : vector<32x128xf32>
    %c3_167 = arith.constant 3 : index
    %c0_168 = arith.constant 0 : index
    %c0_169 = arith.constant 0 : index
    %378 = vector.load %arg21[%c3_167, %c0_168, %c0_169] : memref<7x32x32xbf16, #tpu.memory_space<vmem>>, vector<1x32x32xbf16>
    %379 = vector.shape_cast %378 : vector<1x32x32xbf16> to vector<32x32xbf16>
    %380 = arith.truncf %106 : vector<32x128xf32> to vector<32x128xbf16>
    %cst_170 = arith.constant dense<0.000000e+00> : vector<32x128xf32>
    %381 = tpu.matmul %379, %380, %cst_170 {dimension_numbers = #tpu.dot_dimension_numbers<[1], [0], [0], [1], [0, 0, 1, 1], [], []>} : vector<32x32xbf16>, vector<32x128xbf16>, vector<32x128xf32> -> vector<32x128xf32>
    %382 = arith.addf %377, %381 : vector<32x128xf32>
    %c4_171 = arith.constant 4 : index
    %c0_172 = arith.constant 0 : index
    %c0_173 = arith.constant 0 : index
    %383 = vector.load %arg21[%c4_171, %c0_172, %c0_173] : memref<7x32x32xbf16, #tpu.memory_space<vmem>>, vector<1x32x32xbf16>
    %384 = vector.shape_cast %383 : vector<1x32x32xbf16> to vector<32x32xbf16>
    %cst_174 = arith.constant 0.000000e+00 : f32
    %385 = vector.broadcast %cst_174 : f32 to vector<32x1xf32>
    %386 = vector.extract_strided_slice %106 {offsets = [0, 1], sizes = [32, 127], strides = [1, 1]} : vector<32x128xf32> to vector<32x127xf32>
    %387 = tpu.concatenate %386, %385 in 1 : vector<32x127xf32>, vector<32x1xf32> -> vector<32x128xf32>
    %cst_175 = arith.constant 0.000000e+00 : f32
    %388 = vector.shape_cast %75 : vector<1x128xi1> to vector<1x128xi1>
    %389 = vector.broadcast %388 : vector<1x128xi1> to vector<32x128xi1>
    %390 = vector.broadcast %cst_175 : f32 to vector<32x128xf32>
    %391 = arith.select %389, %387, %390 : vector<32x128xi1>, vector<32x128xf32>
    %392 = arith.truncf %391 : vector<32x128xf32> to vector<32x128xbf16>
    %cst_176 = arith.constant dense<0.000000e+00> : vector<32x128xf32>
    %393 = tpu.matmul %384, %392, %cst_176 {dimension_numbers = #tpu.dot_dimension_numbers<[1], [0], [0], [1], [0, 0, 1, 1], [], []>} : vector<32x32xbf16>, vector<32x128xbf16>, vector<32x128xf32> -> vector<32x128xf32>
    %394 = arith.addf %382, %393 : vector<32x128xf32>
    %c5 = arith.constant 5 : index
    %c0_177 = arith.constant 0 : index
    %c0_178 = arith.constant 0 : index
    %395 = vector.load %arg21[%c5, %c0_177, %c0_178] : memref<7x32x32xbf16, #tpu.memory_space<vmem>>, vector<1x32x32xbf16>
    %396 = vector.shape_cast %395 : vector<1x32x32xbf16> to vector<32x32xbf16>
    %cst_179 = arith.constant 0.000000e+00 : f32
    %397 = vector.broadcast %cst_179 : f32 to vector<32x2xf32>
    %398 = vector.extract_strided_slice %106 {offsets = [0, 2], sizes = [32, 126], strides = [1, 1]} : vector<32x128xf32> to vector<32x126xf32>
    %399 = tpu.concatenate %398, %397 in 1 : vector<32x126xf32>, vector<32x2xf32> -> vector<32x128xf32>
    %cst_180 = arith.constant 0.000000e+00 : f32
    %400 = vector.shape_cast %272 : vector<1x128xi1> to vector<1x128xi1>
    %401 = vector.broadcast %400 : vector<1x128xi1> to vector<32x128xi1>
    %402 = vector.broadcast %cst_180 : f32 to vector<32x128xf32>
    %403 = arith.select %401, %399, %402 : vector<32x128xi1>, vector<32x128xf32>
    %404 = arith.truncf %403 : vector<32x128xf32> to vector<32x128xbf16>
    %cst_181 = arith.constant dense<0.000000e+00> : vector<32x128xf32>
    %405 = tpu.matmul %396, %404, %cst_181 {dimension_numbers = #tpu.dot_dimension_numbers<[1], [0], [0], [1], [0, 0, 1, 1], [], []>} : vector<32x32xbf16>, vector<32x128xbf16>, vector<32x128xf32> -> vector<32x128xf32>
    %406 = arith.addf %394, %405 : vector<32x128xf32>
    %c6 = arith.constant 6 : index
    %c0_182 = arith.constant 0 : index
    %c0_183 = arith.constant 0 : index
    %407 = vector.load %arg21[%c6, %c0_182, %c0_183] : memref<7x32x32xbf16, #tpu.memory_space<vmem>>, vector<1x32x32xbf16>
    %408 = vector.shape_cast %407 : vector<1x32x32xbf16> to vector<32x32xbf16>
    %c3_i32 = arith.constant 3 : i32
    %409 = vector.broadcast %c3_i32 : i32 to vector<1x128xi32>
    %410 = arith.addi %1, %409 : vector<1x128xi32>
    %c0_i32_184 = arith.constant 0 : i32
    %411 = vector.broadcast %c0_i32_184 : i32 to vector<1x128xi32>
    %412 = arith.cmpi sge, %410, %411 : vector<1x128xi32>
    %c16_i32_185 = arith.constant 16 : i32
    %413 = vector.broadcast %c16_i32_185 : i32 to vector<1x128xi32>
    %414 = arith.cmpi slt, %410, %413 : vector<1x128xi32>
    %415 = arith.andi %412, %414 : vector<1x128xi1>
    %cst_186 = arith.constant 0.000000e+00 : f32
    %416 = vector.broadcast %cst_186 : f32 to vector<32x3xf32>
    %417 = vector.extract_strided_slice %106 {offsets = [0, 3], sizes = [32, 125], strides = [1, 1]} : vector<32x128xf32> to vector<32x125xf32>
    %418 = tpu.concatenate %417, %416 in 1 : vector<32x125xf32>, vector<32x3xf32> -> vector<32x128xf32>
    %cst_187 = arith.constant 0.000000e+00 : f32
    %419 = vector.shape_cast %415 : vector<1x128xi1> to vector<1x128xi1>
    %420 = vector.broadcast %419 : vector<1x128xi1> to vector<32x128xi1>
    %421 = vector.broadcast %cst_187 : f32 to vector<32x128xf32>
    %422 = arith.select %420, %418, %421 : vector<32x128xi1>, vector<32x128xf32>
    %423 = arith.truncf %422 : vector<32x128xf32> to vector<32x128xbf16>
    %cst_188 = arith.constant dense<0.000000e+00> : vector<32x128xf32>
    %424 = tpu.matmul %408, %423, %cst_188 {dimension_numbers = #tpu.dot_dimension_numbers<[1], [0], [0], [1], [0, 0, 1, 1], [], []>} : vector<32x32xbf16>, vector<32x128xbf16>, vector<32x128xf32> -> vector<32x128xf32>
    %425 = arith.addf %406, %424 : vector<32x128xf32>
    %cst_189 = arith.constant 0.000000e+00 : f32
    %426 = vector.broadcast %cst_189 : f32 to vector<32x128xf32>
    %427 = arith.maximumf %425, %426 : vector<32x128xf32>
    %428 = arith.truncf %427 : vector<32x128xf32> to vector<32x128xbf16>
    %cst_190 = arith.constant 0.000000e+00 : f32
    %429 = vector.broadcast %cst_190 : f32 to vector<32x1xf32>
    %430 = vector.extract_strided_slice %106 {offsets = [0, 1], sizes = [32, 127], strides = [1, 1]} : vector<32x128xf32> to vector<32x127xf32>
    %431 = tpu.concatenate %430, %429 in 1 : vector<32x127xf32>, vector<32x1xf32> -> vector<32x128xf32>
    %cst_191 = arith.constant 0.000000e+00 : f32
    %432 = vector.shape_cast %75 : vector<1x128xi1> to vector<1x128xi1>
    %433 = vector.broadcast %432 : vector<1x128xi1> to vector<32x128xi1>
    %434 = vector.broadcast %cst_191 : f32 to vector<32x128xf32>
    %435 = arith.select %433, %431, %434 : vector<32x128xi1>, vector<32x128xf32>
    %436 = arith.maximumf %106, %435 : vector<32x128xf32>
    %cst_192 = arith.constant 0.000000e+00 : f32
    %437 = vector.broadcast %cst_192 : f32 to vector<32x2xf32>
    %438 = vector.extract_strided_slice %106 {offsets = [0, 2], sizes = [32, 126], strides = [1, 1]} : vector<32x128xf32> to vector<32x126xf32>
    %439 = tpu.concatenate %438, %437 in 1 : vector<32x126xf32>, vector<32x2xf32> -> vector<32x128xf32>
    %cst_193 = arith.constant 0.000000e+00 : f32
    %440 = vector.shape_cast %272 : vector<1x128xi1> to vector<1x128xi1>
    %441 = vector.broadcast %440 : vector<1x128xi1> to vector<32x128xi1>
    %442 = vector.broadcast %cst_193 : f32 to vector<32x128xf32>
    %443 = arith.select %441, %439, %442 : vector<32x128xi1>, vector<32x128xf32>
    %444 = arith.maximumf %436, %443 : vector<32x128xf32>
    %c14_i32 = arith.constant 14 : i32
    %445 = vector.broadcast %c14_i32 : i32 to vector<1x128xi32>
    %446 = arith.cmpi slt, %1, %445 : vector<1x128xi32>
    %cst_194 = arith.constant 0.000000e+00 : f32
    %447 = vector.shape_cast %446 : vector<1x128xi1> to vector<1x128xi1>
    %448 = vector.broadcast %447 : vector<1x128xi1> to vector<32x128xi1>
    %449 = vector.broadcast %cst_194 : f32 to vector<32x128xf32>
    %450 = arith.select %448, %444, %449 : vector<32x128xi1>, vector<32x128xf32>
    %c0_195 = arith.constant 0 : index
    %c0_196 = arith.constant 0 : index
    %451 = vector.load %arg24[%c0_195, %c0_196] : memref<32x1xf32, #tpu.memory_space<vmem>>, vector<32x1xf32>
    %c0_197 = arith.constant 0 : index
    %c0_198 = arith.constant 0 : index
    %c0_199 = arith.constant 0 : index
    %452 = vector.load %arg23[%c0_197, %c0_198, %c0_199] : memref<1x32x32xbf16, #tpu.memory_space<vmem>>, vector<1x32x32xbf16>
    %453 = vector.shape_cast %452 : vector<1x32x32xbf16> to vector<32x32xbf16>
    %cst_200 = arith.constant 0.000000e+00 : f32
    %454 = vector.broadcast %cst_200 : f32 to vector<32x1xf32>
    %455 = vector.extract_strided_slice %450 {offsets = [0, 0], sizes = [32, 127], strides = [1, 1]} : vector<32x128xf32> to vector<32x127xf32>
    %456 = tpu.concatenate %454, %455 in 1 : vector<32x1xf32>, vector<32x127xf32> -> vector<32x128xf32>
    %cst_201 = arith.constant 0.000000e+00 : f32
    %457 = vector.shape_cast %50 : vector<1x128xi1> to vector<1x128xi1>
    %458 = vector.broadcast %457 : vector<1x128xi1> to vector<32x128xi1>
    %459 = vector.broadcast %cst_201 : f32 to vector<32x128xf32>
    %460 = arith.select %458, %456, %459 : vector<32x128xi1>, vector<32x128xf32>
    %461 = arith.truncf %460 : vector<32x128xf32> to vector<32x128xbf16>
    %cst_202 = arith.constant dense<0.000000e+00> : vector<32x128xf32>
    %462 = tpu.matmul %453, %461, %cst_202 {dimension_numbers = #tpu.dot_dimension_numbers<[1], [0], [0], [1], [0, 0, 1, 1], [], []>} : vector<32x32xbf16>, vector<32x128xbf16>, vector<32x128xf32> -> vector<32x128xf32>
    %463 = vector.broadcast %451 : vector<32x1xf32> to vector<32x128xf32>
    %464 = arith.addf %463, %462 : vector<32x128xf32>
    %cst_203 = arith.constant 0.000000e+00 : f32
    %465 = vector.broadcast %cst_203 : f32 to vector<32x128xf32>
    %466 = arith.maximumf %464, %465 : vector<32x128xf32>
    %467 = arith.truncf %466 : vector<32x128xf32> to vector<32x128xbf16>
    %468 = arith.truncf %3 : vector<128x2xf32> to vector<128x2xbf16>
    %cst_204 = arith.constant dense<0.000000e+00> : vector<32x2xf32>
    %469 = tpu.matmul %179, %468, %cst_204 {dimension_numbers = #tpu.dot_dimension_numbers<[1], [0], [0], [1], [0, 0, 1, 1], [], []>} : vector<32x128xbf16>, vector<128x2xbf16>, vector<32x2xf32> -> vector<32x2xf32>
    %470 = arith.truncf %3 : vector<128x2xf32> to vector<128x2xbf16>
    %cst_205 = arith.constant dense<0.000000e+00> : vector<32x2xf32>
    %471 = tpu.matmul %332, %470, %cst_205 {dimension_numbers = #tpu.dot_dimension_numbers<[1], [0], [0], [1], [0, 0, 1, 1], [], []>} : vector<32x128xbf16>, vector<128x2xbf16>, vector<32x2xf32> -> vector<32x2xf32>
    %472 = arith.truncf %3 : vector<128x2xf32> to vector<128x2xbf16>
    %cst_206 = arith.constant dense<0.000000e+00> : vector<32x2xf32>
    %473 = tpu.matmul %428, %472, %cst_206 {dimension_numbers = #tpu.dot_dimension_numbers<[1], [0], [0], [1], [0, 0, 1, 1], [], []>} : vector<32x128xbf16>, vector<128x2xbf16>, vector<32x2xf32> -> vector<32x2xf32>
    %474 = arith.truncf %3 : vector<128x2xf32> to vector<128x2xbf16>
    %cst_207 = arith.constant dense<0.000000e+00> : vector<32x2xf32>
    %475 = tpu.matmul %467, %474, %cst_207 {dimension_numbers = #tpu.dot_dimension_numbers<[1], [0], [0], [1], [0, 0, 1, 1], [], []>} : vector<32x128xbf16>, vector<128x2xbf16>, vector<32x2xf32> -> vector<32x2xf32>
    %476 = tpu.concatenate %469, %471, %473, %475 in 0 : vector<32x2xf32>, vector<32x2xf32>, vector<32x2xf32>, vector<32x2xf32> -> vector<128x2xf32>
    %c0_208 = arith.constant 0 : index
    %c0_209 = arith.constant 0 : index
    %477 = vector.load %arg29[%c0_208, %c0_209] : memref<2x128xbf16, #tpu.memory_space<vmem>>, vector<2x128xbf16>
    %478 = arith.truncf %476 : vector<128x2xf32> to vector<128x2xbf16>
    %cst_210 = arith.constant dense<0.000000e+00> : vector<2x2xf32>
    %479 = tpu.matmul %477, %478, %cst_210 {dimension_numbers = #tpu.dot_dimension_numbers<[1], [0], [0], [1], [0, 0, 1, 1], [], []>} : vector<2x128xbf16>, vector<128x2xbf16>, vector<2x2xf32> -> vector<2x2xf32>
    %cst_211 = arith.constant 0.000000e+00 : f32
    %480 = vector.broadcast %cst_211 : f32 to vector<2x2xf32>
    %481 = arith.maximumf %479, %480 : vector<2x2xf32>
    %c0_212 = arith.constant 0 : index
    %c0_213 = arith.constant 0 : index
    %482 = vector.load %arg30[%c0_212, %c0_213] : memref<128x2xbf16, #tpu.memory_space<vmem>>, vector<128x2xbf16>
    %483 = arith.truncf %481 : vector<2x2xf32> to vector<2x2xbf16>
    %cst_214 = arith.constant dense<0.000000e+00> : vector<128x2xf32>
    %484 = tpu.matmul %482, %483, %cst_214 {dimension_numbers = #tpu.dot_dimension_numbers<[1], [0], [0], [1], [0, 0, 1, 1], [], []>} : vector<128x2xbf16>, vector<2x2xbf16>, vector<128x2xf32> -> vector<128x2xf32>
    %485 = arith.negf %484 : vector<128x2xf32>
    %486 = math.exp %485 : vector<128x2xf32>
    %cst_215 = arith.constant 1.000000e+00 : f32
    %487 = vector.broadcast %cst_215 : f32 to vector<128x2xf32>
    %488 = arith.addf %487, %486 : vector<128x2xf32>
    %489 = arith.divf %487, %488 : vector<128x2xf32>
    %c0_216 = arith.constant 0 : index
    %c0_217 = arith.constant 0 : index
    %490 = vector.load %arg32[%c0_216, %c0_217] : memref<16x1xf32, #tpu.memory_space<vmem>>, vector<16x1xf32>
    %491 = vector.extract_strided_slice %489 {offsets = [0, 0], sizes = [32, 2], strides = [1, 1]} : vector<128x2xf32> to vector<32x2xf32>
    %c0_i32_218 = arith.constant 0 : i32
    %492 = vector.broadcast %c0_i32_218 : i32 to vector<1x128xi32>
    %493 = arith.cmpi eq, %2, %492 : vector<1x128xi32>
    %494 = vector.extract_strided_slice %491 {offsets = [0, 0], sizes = [32, 1], strides = [1, 1]} : vector<32x2xf32> to vector<32x1xf32>
    %cst_219 = arith.constant 0.000000e+00 : f32
    %495 = vector.shape_cast %493 : vector<1x128xi1> to vector<1x128xi1>
    %496 = vector.broadcast %495 : vector<1x128xi1> to vector<32x128xi1>
    %497 = vector.shape_cast %494 : vector<32x1xf32> to vector<32x1xf32>
    %498 = vector.broadcast %497 : vector<32x1xf32> to vector<32x128xf32>
    %499 = vector.broadcast %cst_219 : f32 to vector<32x128xf32>
    %500 = arith.select %496, %498, %499 : vector<32x128xi1>, vector<32x128xf32>
    %c1_i32_220 = arith.constant 1 : i32
    %501 = vector.broadcast %c1_i32_220 : i32 to vector<1x128xi32>
    %502 = arith.cmpi eq, %2, %501 : vector<1x128xi32>
    %503 = vector.extract_strided_slice %491 {offsets = [0, 1], sizes = [32, 1], strides = [1, 1]} : vector<32x2xf32> to vector<32x1xf32>
    %504 = vector.shape_cast %502 : vector<1x128xi1> to vector<1x128xi1>
    %505 = vector.broadcast %504 : vector<1x128xi1> to vector<32x128xi1>
    %506 = vector.shape_cast %503 : vector<32x1xf32> to vector<32x1xf32>
    %507 = vector.broadcast %506 : vector<32x1xf32> to vector<32x128xf32>
    %508 = arith.select %505, %507, %500 : vector<32x128xi1>, vector<32x128xf32>
    %c0_221 = arith.constant 0 : index
    %c0_222 = arith.constant 0 : index
    %c0_223 = arith.constant 0 : index
    %509 = vector.load %arg31[%c0_221, %c0_222, %c0_223] : memref<4x16x32xbf16, #tpu.memory_space<vmem>>, vector<1x16x32xbf16>
    %510 = vector.shape_cast %509 : vector<1x16x32xbf16> to vector<16x32xbf16>
    %511 = arith.extf %179 : vector<32x128xbf16> to vector<32x128xf32>
    %512 = arith.mulf %508, %511 : vector<32x128xf32>
    %513 = arith.truncf %512 : vector<32x128xf32> to vector<32x128xbf16>
    %cst_224 = arith.constant dense<0.000000e+00> : vector<16x128xf32>
    %514 = tpu.matmul %510, %513, %cst_224 {dimension_numbers = #tpu.dot_dimension_numbers<[1], [0], [0], [1], [0, 0, 1, 1], [], []>} : vector<16x32xbf16>, vector<32x128xbf16>, vector<16x128xf32> -> vector<16x128xf32>
    %515 = vector.broadcast %490 : vector<16x1xf32> to vector<16x128xf32>
    %516 = arith.addf %515, %514 : vector<16x128xf32>
    %517 = vector.extract_strided_slice %489 {offsets = [32, 0], sizes = [32, 2], strides = [1, 1]} : vector<128x2xf32> to vector<32x2xf32>
    %c0_i32_225 = arith.constant 0 : i32
    %518 = vector.broadcast %c0_i32_225 : i32 to vector<1x128xi32>
    %519 = arith.cmpi eq, %2, %518 : vector<1x128xi32>
    %520 = vector.extract_strided_slice %517 {offsets = [0, 0], sizes = [32, 1], strides = [1, 1]} : vector<32x2xf32> to vector<32x1xf32>
    %cst_226 = arith.constant 0.000000e+00 : f32
    %521 = vector.shape_cast %519 : vector<1x128xi1> to vector<1x128xi1>
    %522 = vector.broadcast %521 : vector<1x128xi1> to vector<32x128xi1>
    %523 = vector.shape_cast %520 : vector<32x1xf32> to vector<32x1xf32>
    %524 = vector.broadcast %523 : vector<32x1xf32> to vector<32x128xf32>
    %525 = vector.broadcast %cst_226 : f32 to vector<32x128xf32>
    %526 = arith.select %522, %524, %525 : vector<32x128xi1>, vector<32x128xf32>
    %c1_i32_227 = arith.constant 1 : i32
    %527 = vector.broadcast %c1_i32_227 : i32 to vector<1x128xi32>
    %528 = arith.cmpi eq, %2, %527 : vector<1x128xi32>
    %529 = vector.extract_strided_slice %517 {offsets = [0, 1], sizes = [32, 1], strides = [1, 1]} : vector<32x2xf32> to vector<32x1xf32>
    %530 = vector.shape_cast %528 : vector<1x128xi1> to vector<1x128xi1>
    %531 = vector.broadcast %530 : vector<1x128xi1> to vector<32x128xi1>
    %532 = vector.shape_cast %529 : vector<32x1xf32> to vector<32x1xf32>
    %533 = vector.broadcast %532 : vector<32x1xf32> to vector<32x128xf32>
    %534 = arith.select %531, %533, %526 : vector<32x128xi1>, vector<32x128xf32>
    %c1_228 = arith.constant 1 : index
    %c0_229 = arith.constant 0 : index
    %c0_230 = arith.constant 0 : index
    %535 = vector.load %arg31[%c1_228, %c0_229, %c0_230] : memref<4x16x32xbf16, #tpu.memory_space<vmem>>, vector<1x16x32xbf16>
    %536 = vector.shape_cast %535 : vector<1x16x32xbf16> to vector<16x32xbf16>
    %537 = arith.extf %332 : vector<32x128xbf16> to vector<32x128xf32>
    %538 = arith.mulf %534, %537 : vector<32x128xf32>
    %539 = arith.truncf %538 : vector<32x128xf32> to vector<32x128xbf16>
    %cst_231 = arith.constant dense<0.000000e+00> : vector<16x128xf32>
    %540 = tpu.matmul %536, %539, %cst_231 {dimension_numbers = #tpu.dot_dimension_numbers<[1], [0], [0], [1], [0, 0, 1, 1], [], []>} : vector<16x32xbf16>, vector<32x128xbf16>, vector<16x128xf32> -> vector<16x128xf32>
    %541 = arith.addf %516, %540 : vector<16x128xf32>
    %542 = vector.extract_strided_slice %489 {offsets = [64, 0], sizes = [32, 2], strides = [1, 1]} : vector<128x2xf32> to vector<32x2xf32>
    %c0_i32_232 = arith.constant 0 : i32
    %543 = vector.broadcast %c0_i32_232 : i32 to vector<1x128xi32>
    %544 = arith.cmpi eq, %2, %543 : vector<1x128xi32>
    %545 = vector.extract_strided_slice %542 {offsets = [0, 0], sizes = [32, 1], strides = [1, 1]} : vector<32x2xf32> to vector<32x1xf32>
    %cst_233 = arith.constant 0.000000e+00 : f32
    %546 = vector.shape_cast %544 : vector<1x128xi1> to vector<1x128xi1>
    %547 = vector.broadcast %546 : vector<1x128xi1> to vector<32x128xi1>
    %548 = vector.shape_cast %545 : vector<32x1xf32> to vector<32x1xf32>
    %549 = vector.broadcast %548 : vector<32x1xf32> to vector<32x128xf32>
    %550 = vector.broadcast %cst_233 : f32 to vector<32x128xf32>
    %551 = arith.select %547, %549, %550 : vector<32x128xi1>, vector<32x128xf32>
    %c1_i32_234 = arith.constant 1 : i32
    %552 = vector.broadcast %c1_i32_234 : i32 to vector<1x128xi32>
    %553 = arith.cmpi eq, %2, %552 : vector<1x128xi32>
    %554 = vector.extract_strided_slice %542 {offsets = [0, 1], sizes = [32, 1], strides = [1, 1]} : vector<32x2xf32> to vector<32x1xf32>
    %555 = vector.shape_cast %553 : vector<1x128xi1> to vector<1x128xi1>
    %556 = vector.broadcast %555 : vector<1x128xi1> to vector<32x128xi1>
    %557 = vector.shape_cast %554 : vector<32x1xf32> to vector<32x1xf32>
    %558 = vector.broadcast %557 : vector<32x1xf32> to vector<32x128xf32>
    %559 = arith.select %556, %558, %551 : vector<32x128xi1>, vector<32x128xf32>
    %c2_235 = arith.constant 2 : index
    %c0_236 = arith.constant 0 : index
    %c0_237 = arith.constant 0 : index
    %560 = vector.load %arg31[%c2_235, %c0_236, %c0_237] : memref<4x16x32xbf16, #tpu.memory_space<vmem>>, vector<1x16x32xbf16>
    %561 = vector.shape_cast %560 : vector<1x16x32xbf16> to vector<16x32xbf16>
    %562 = arith.extf %428 : vector<32x128xbf16> to vector<32x128xf32>
    %563 = arith.mulf %559, %562 : vector<32x128xf32>
    %564 = arith.truncf %563 : vector<32x128xf32> to vector<32x128xbf16>
    %cst_238 = arith.constant dense<0.000000e+00> : vector<16x128xf32>
    %565 = tpu.matmul %561, %564, %cst_238 {dimension_numbers = #tpu.dot_dimension_numbers<[1], [0], [0], [1], [0, 0, 1, 1], [], []>} : vector<16x32xbf16>, vector<32x128xbf16>, vector<16x128xf32> -> vector<16x128xf32>
    %566 = arith.addf %541, %565 : vector<16x128xf32>
    %567 = vector.extract_strided_slice %489 {offsets = [96, 0], sizes = [32, 2], strides = [1, 1]} : vector<128x2xf32> to vector<32x2xf32>
    %c0_i32_239 = arith.constant 0 : i32
    %568 = vector.broadcast %c0_i32_239 : i32 to vector<1x128xi32>
    %569 = arith.cmpi eq, %2, %568 : vector<1x128xi32>
    %570 = vector.extract_strided_slice %567 {offsets = [0, 0], sizes = [32, 1], strides = [1, 1]} : vector<32x2xf32> to vector<32x1xf32>
    %cst_240 = arith.constant 0.000000e+00 : f32
    %571 = vector.shape_cast %569 : vector<1x128xi1> to vector<1x128xi1>
    %572 = vector.broadcast %571 : vector<1x128xi1> to vector<32x128xi1>
    %573 = vector.shape_cast %570 : vector<32x1xf32> to vector<32x1xf32>
    %574 = vector.broadcast %573 : vector<32x1xf32> to vector<32x128xf32>
    %575 = vector.broadcast %cst_240 : f32 to vector<32x128xf32>
    %576 = arith.select %572, %574, %575 : vector<32x128xi1>, vector<32x128xf32>
    %c1_i32_241 = arith.constant 1 : i32
    %577 = vector.broadcast %c1_i32_241 : i32 to vector<1x128xi32>
    %578 = arith.cmpi eq, %2, %577 : vector<1x128xi32>
    %579 = vector.extract_strided_slice %567 {offsets = [0, 1], sizes = [32, 1], strides = [1, 1]} : vector<32x2xf32> to vector<32x1xf32>
    %580 = vector.shape_cast %578 : vector<1x128xi1> to vector<1x128xi1>
    %581 = vector.broadcast %580 : vector<1x128xi1> to vector<32x128xi1>
    %582 = vector.shape_cast %579 : vector<32x1xf32> to vector<32x1xf32>
    %583 = vector.broadcast %582 : vector<32x1xf32> to vector<32x128xf32>
    %584 = arith.select %581, %583, %576 : vector<32x128xi1>, vector<32x128xf32>
    %c3_242 = arith.constant 3 : index
    %c0_243 = arith.constant 0 : index
    %c0_244 = arith.constant 0 : index
    %585 = vector.load %arg31[%c3_242, %c0_243, %c0_244] : memref<4x16x32xbf16, #tpu.memory_space<vmem>>, vector<1x16x32xbf16>
    %586 = vector.shape_cast %585 : vector<1x16x32xbf16> to vector<16x32xbf16>
    %587 = arith.extf %467 : vector<32x128xbf16> to vector<32x128xf32>
    %588 = arith.mulf %584, %587 : vector<32x128xf32>
    %589 = arith.truncf %588 : vector<32x128xf32> to vector<32x128xbf16>
    %cst_245 = arith.constant dense<0.000000e+00> : vector<16x128xf32>
    %590 = tpu.matmul %586, %589, %cst_245 {dimension_numbers = #tpu.dot_dimension_numbers<[1], [0], [0], [1], [0, 0, 1, 1], [], []>} : vector<16x32xbf16>, vector<32x128xbf16>, vector<16x128xf32> -> vector<16x128xf32>
    %591 = arith.addf %566, %590 : vector<16x128xf32>
    %cst_246 = arith.constant dense<0.000000e+00> : vector<16x1xf32>
    %592 = tpu.matmul %591, %4, %cst_246 {dimension_numbers = #tpu.dot_dimension_numbers<[1], [0], [0], [1], [0, 0, 1, 1], [], []>} : vector<16x128xf32>, vector<128x1xf32>, vector<16x1xf32> -> vector<16x1xf32>
    %593 = arith.mulf %591, %591 : vector<16x128xf32>
    %cst_247 = arith.constant dense<0.000000e+00> : vector<16x1xf32>
    %594 = tpu.matmul %593, %4, %cst_247 {dimension_numbers = #tpu.dot_dimension_numbers<[1], [0], [0], [1], [0, 0, 1, 1], [], []>} : vector<16x128xf32>, vector<128x1xf32>, vector<16x1xf32> -> vector<16x1xf32>
    %595 = arith.mulf %592, %592 : vector<16x1xf32>
    %596 = arith.subf %594, %595 : vector<16x1xf32>
    %cst_248 = arith.constant 0.000000e+00 : f32
    %597 = vector.broadcast %cst_248 : f32 to vector<16x1xf32>
    %598 = arith.maximumf %596, %597 : vector<16x1xf32>
    %c0_249 = arith.constant 0 : index
    %c0_250 = arith.constant 0 : index
    %599 = vector.load %arg33[%c0_249, %c0_250] : memref<16x1xf32, #tpu.memory_space<vmem>>, vector<16x1xf32>
    %cst_251 = arith.constant 9.99999974E-6 : f32
    %600 = vector.broadcast %cst_251 : f32 to vector<16x1xf32>
    %601 = arith.addf %598, %600 : vector<16x1xf32>
    %602 = math.rsqrt %601 : vector<16x1xf32>
    %603 = arith.mulf %599, %602 : vector<16x1xf32>
    %c0_252 = arith.constant 0 : index
    %c0_253 = arith.constant 0 : index
    %604 = vector.load %arg34[%c0_252, %c0_253] : memref<16x1xf32, #tpu.memory_space<vmem>>, vector<16x1xf32>
    %605 = arith.mulf %592, %603 : vector<16x1xf32>
    %606 = arith.subf %604, %605 : vector<16x1xf32>
    %607 = vector.broadcast %603 : vector<16x1xf32> to vector<16x128xf32>
    %608 = arith.mulf %591, %607 : vector<16x128xf32>
    %609 = vector.broadcast %606 : vector<16x1xf32> to vector<16x128xf32>
    %610 = arith.addf %608, %609 : vector<16x128xf32>
    %cst_254 = arith.constant 0.000000e+00 : f32
    %611 = vector.broadcast %cst_254 : f32 to vector<16x128xf32>
    %612 = arith.maximumf %610, %611 : vector<16x128xf32>
    %c0_255 = arith.constant 0 : index
    %c0_256 = arith.constant 0 : index
    %613 = vector.load %arg36[%c0_255, %c0_256] : memref<32x1xf32, #tpu.memory_space<vmem>>, vector<32x1xf32>
    %c0_257 = arith.constant 0 : index
    %c0_258 = arith.constant 0 : index
    %c0_259 = arith.constant 0 : index
    %614 = vector.load %arg35[%c0_257, %c0_258, %c0_259] : memref<3x32x16xbf16, #tpu.memory_space<vmem>>, vector<1x32x16xbf16>
    %615 = vector.shape_cast %614 : vector<1x32x16xbf16> to vector<32x16xbf16>
    %cst_260 = arith.constant 0.000000e+00 : f32
    %616 = vector.broadcast %cst_260 : f32 to vector<16x2xf32>
    %617 = vector.extract_strided_slice %612 {offsets = [0, 0], sizes = [16, 126], strides = [1, 1]} : vector<16x128xf32> to vector<16x126xf32>
    %618 = tpu.concatenate %616, %617 in 1 : vector<16x2xf32>, vector<16x126xf32> -> vector<16x128xf32>
    %cst_261 = arith.constant 0.000000e+00 : f32
    %619 = vector.shape_cast %234 : vector<1x128xi1> to vector<1x128xi1>
    %620 = vector.broadcast %619 : vector<1x128xi1> to vector<16x128xi1>
    %621 = vector.broadcast %cst_261 : f32 to vector<16x128xf32>
    %622 = arith.select %620, %618, %621 : vector<16x128xi1>, vector<16x128xf32>
    %623 = arith.truncf %622 : vector<16x128xf32> to vector<16x128xbf16>
    %cst_262 = arith.constant dense<0.000000e+00> : vector<32x128xf32>
    %624 = tpu.matmul %615, %623, %cst_262 {dimension_numbers = #tpu.dot_dimension_numbers<[1], [0], [0], [1], [0, 0, 1, 1], [], []>} : vector<32x16xbf16>, vector<16x128xbf16>, vector<32x128xf32> -> vector<32x128xf32>
    %625 = vector.broadcast %613 : vector<32x1xf32> to vector<32x128xf32>
    %626 = arith.addf %625, %624 : vector<32x128xf32>
    %c1_263 = arith.constant 1 : index
    %c0_264 = arith.constant 0 : index
    %c0_265 = arith.constant 0 : index
    %627 = vector.load %arg35[%c1_263, %c0_264, %c0_265] : memref<3x32x16xbf16, #tpu.memory_space<vmem>>, vector<1x32x16xbf16>
    %628 = vector.shape_cast %627 : vector<1x32x16xbf16> to vector<32x16xbf16>
    %629 = arith.truncf %612 : vector<16x128xf32> to vector<16x128xbf16>
    %cst_266 = arith.constant dense<0.000000e+00> : vector<32x128xf32>
    %630 = tpu.matmul %628, %629, %cst_266 {dimension_numbers = #tpu.dot_dimension_numbers<[1], [0], [0], [1], [0, 0, 1, 1], [], []>} : vector<32x16xbf16>, vector<16x128xbf16>, vector<32x128xf32> -> vector<32x128xf32>
    %631 = arith.addf %626, %630 : vector<32x128xf32>
    %c2_267 = arith.constant 2 : index
    %c0_268 = arith.constant 0 : index
    %c0_269 = arith.constant 0 : index
    %632 = vector.load %arg35[%c2_267, %c0_268, %c0_269] : memref<3x32x16xbf16, #tpu.memory_space<vmem>>, vector<1x32x16xbf16>
    %633 = vector.shape_cast %632 : vector<1x32x16xbf16> to vector<32x16xbf16>
    %cst_270 = arith.constant 0.000000e+00 : f32
    %634 = vector.broadcast %cst_270 : f32 to vector<16x2xf32>
    %635 = vector.extract_strided_slice %612 {offsets = [0, 2], sizes = [16, 126], strides = [1, 1]} : vector<16x128xf32> to vector<16x126xf32>
    %636 = tpu.concatenate %635, %634 in 1 : vector<16x126xf32>, vector<16x2xf32> -> vector<16x128xf32>
    %cst_271 = arith.constant 0.000000e+00 : f32
    %637 = vector.shape_cast %272 : vector<1x128xi1> to vector<1x128xi1>
    %638 = vector.broadcast %637 : vector<1x128xi1> to vector<16x128xi1>
    %639 = vector.broadcast %cst_271 : f32 to vector<16x128xf32>
    %640 = arith.select %638, %636, %639 : vector<16x128xi1>, vector<16x128xf32>
    %641 = arith.truncf %640 : vector<16x128xf32> to vector<16x128xbf16>
    %cst_272 = arith.constant dense<0.000000e+00> : vector<32x128xf32>
    %642 = tpu.matmul %633, %641, %cst_272 {dimension_numbers = #tpu.dot_dimension_numbers<[1], [0], [0], [1], [0, 0, 1, 1], [], []>} : vector<32x16xbf16>, vector<16x128xbf16>, vector<32x128xf32> -> vector<32x128xf32>
    %643 = arith.addf %631, %642 : vector<32x128xf32>
    %cst_273 = arith.constant dense<0.000000e+00> : vector<32x1xf32>
    %644 = tpu.matmul %643, %4, %cst_273 {dimension_numbers = #tpu.dot_dimension_numbers<[1], [0], [0], [1], [0, 0, 1, 1], [], []>} : vector<32x128xf32>, vector<128x1xf32>, vector<32x1xf32> -> vector<32x1xf32>
    %645 = arith.mulf %643, %643 : vector<32x128xf32>
    %cst_274 = arith.constant dense<0.000000e+00> : vector<32x1xf32>
    %646 = tpu.matmul %645, %4, %cst_274 {dimension_numbers = #tpu.dot_dimension_numbers<[1], [0], [0], [1], [0, 0, 1, 1], [], []>} : vector<32x128xf32>, vector<128x1xf32>, vector<32x1xf32> -> vector<32x1xf32>
    %647 = arith.mulf %644, %644 : vector<32x1xf32>
    %648 = arith.subf %646, %647 : vector<32x1xf32>
    %cst_275 = arith.constant 0.000000e+00 : f32
    %649 = vector.broadcast %cst_275 : f32 to vector<32x1xf32>
    %650 = arith.maximumf %648, %649 : vector<32x1xf32>
    %c0_276 = arith.constant 0 : index
    %c0_277 = arith.constant 0 : index
    %651 = vector.load %arg37[%c0_276, %c0_277] : memref<32x1xf32, #tpu.memory_space<vmem>>, vector<32x1xf32>
    %cst_278 = arith.constant 9.99999974E-6 : f32
    %652 = vector.broadcast %cst_278 : f32 to vector<32x1xf32>
    %653 = arith.addf %650, %652 : vector<32x1xf32>
    %654 = math.rsqrt %653 : vector<32x1xf32>
    %655 = arith.mulf %651, %654 : vector<32x1xf32>
    %c0_279 = arith.constant 0 : index
    %c0_280 = arith.constant 0 : index
    %656 = vector.load %arg38[%c0_279, %c0_280] : memref<32x1xf32, #tpu.memory_space<vmem>>, vector<32x1xf32>
    %657 = arith.mulf %644, %655 : vector<32x1xf32>
    %658 = arith.subf %656, %657 : vector<32x1xf32>
    %659 = vector.broadcast %655 : vector<32x1xf32> to vector<32x128xf32>
    %660 = arith.mulf %643, %659 : vector<32x128xf32>
    %661 = vector.broadcast %658 : vector<32x1xf32> to vector<32x128xf32>
    %662 = arith.addf %660, %661 : vector<32x128xf32>
    %663 = arith.addf %662, %106 : vector<32x128xf32>
    %c0_281 = arith.constant 0 : index
    %c0_282 = arith.constant 0 : index
    %664 = vector.load %arg12[%c0_281, %c0_282] : memref<32x1xf32, #tpu.memory_space<vmem>>, vector<32x1xf32>
    %c0_283 = arith.constant 0 : index
    %c0_284 = arith.constant 0 : index
    %c0_285 = arith.constant 0 : index
    %665 = vector.load %arg11[%c0_283, %c0_284, %c0_285] : memref<3x32x32xbf16, #tpu.memory_space<vmem>>, vector<1x32x32xbf16>
    %666 = vector.shape_cast %665 : vector<1x32x32xbf16> to vector<32x32xbf16>
    %cst_286 = arith.constant 0.000000e+00 : f32
    %667 = vector.broadcast %cst_286 : f32 to vector<32x1xf32>
    %668 = vector.extract_strided_slice %663 {offsets = [0, 0], sizes = [32, 127], strides = [1, 1]} : vector<32x128xf32> to vector<32x127xf32>
    %669 = tpu.concatenate %667, %668 in 1 : vector<32x1xf32>, vector<32x127xf32> -> vector<32x128xf32>
    %cst_287 = arith.constant 0.000000e+00 : f32
    %670 = vector.shape_cast %50 : vector<1x128xi1> to vector<1x128xi1>
    %671 = vector.broadcast %670 : vector<1x128xi1> to vector<32x128xi1>
    %672 = vector.broadcast %cst_287 : f32 to vector<32x128xf32>
    %673 = arith.select %671, %669, %672 : vector<32x128xi1>, vector<32x128xf32>
    %674 = arith.truncf %673 : vector<32x128xf32> to vector<32x128xbf16>
    %cst_288 = arith.constant dense<0.000000e+00> : vector<32x128xf32>
    %675 = tpu.matmul %666, %674, %cst_288 {dimension_numbers = #tpu.dot_dimension_numbers<[1], [0], [0], [1], [0, 0, 1, 1], [], []>} : vector<32x32xbf16>, vector<32x128xbf16>, vector<32x128xf32> -> vector<32x128xf32>
    %676 = vector.broadcast %664 : vector<32x1xf32> to vector<32x128xf32>
    %677 = arith.addf %676, %675 : vector<32x128xf32>
    %c1_289 = arith.constant 1 : index
    %c0_290 = arith.constant 0 : index
    %c0_291 = arith.constant 0 : index
    %678 = vector.load %arg11[%c1_289, %c0_290, %c0_291] : memref<3x32x32xbf16, #tpu.memory_space<vmem>>, vector<1x32x32xbf16>
    %679 = vector.shape_cast %678 : vector<1x32x32xbf16> to vector<32x32xbf16>
    %680 = arith.truncf %663 : vector<32x128xf32> to vector<32x128xbf16>
    %cst_292 = arith.constant dense<0.000000e+00> : vector<32x128xf32>
    %681 = tpu.matmul %679, %680, %cst_292 {dimension_numbers = #tpu.dot_dimension_numbers<[1], [0], [0], [1], [0, 0, 1, 1], [], []>} : vector<32x32xbf16>, vector<32x128xbf16>, vector<32x128xf32> -> vector<32x128xf32>
    %682 = arith.addf %677, %681 : vector<32x128xf32>
    %c2_293 = arith.constant 2 : index
    %c0_294 = arith.constant 0 : index
    %c0_295 = arith.constant 0 : index
    %683 = vector.load %arg11[%c2_293, %c0_294, %c0_295] : memref<3x32x32xbf16, #tpu.memory_space<vmem>>, vector<1x32x32xbf16>
    %684 = vector.shape_cast %683 : vector<1x32x32xbf16> to vector<32x32xbf16>
    %cst_296 = arith.constant 0.000000e+00 : f32
    %685 = vector.broadcast %cst_296 : f32 to vector<32x1xf32>
    %686 = vector.extract_strided_slice %663 {offsets = [0, 1], sizes = [32, 127], strides = [1, 1]} : vector<32x128xf32> to vector<32x127xf32>
    %687 = tpu.concatenate %686, %685 in 1 : vector<32x127xf32>, vector<32x1xf32> -> vector<32x128xf32>
    %cst_297 = arith.constant 0.000000e+00 : f32
    %688 = vector.shape_cast %75 : vector<1x128xi1> to vector<1x128xi1>
    %689 = vector.broadcast %688 : vector<1x128xi1> to vector<32x128xi1>
    %690 = vector.broadcast %cst_297 : f32 to vector<32x128xf32>
    %691 = arith.select %689, %687, %690 : vector<32x128xi1>, vector<32x128xf32>
    %692 = arith.truncf %691 : vector<32x128xf32> to vector<32x128xbf16>
    %cst_298 = arith.constant dense<0.000000e+00> : vector<32x128xf32>
    %693 = tpu.matmul %684, %692, %cst_298 {dimension_numbers = #tpu.dot_dimension_numbers<[1], [0], [0], [1], [0, 0, 1, 1], [], []>} : vector<32x32xbf16>, vector<32x128xbf16>, vector<32x128xf32> -> vector<32x128xf32>
    %694 = arith.addf %682, %693 : vector<32x128xf32>
    %cst_299 = arith.constant dense<0.000000e+00> : vector<32x1xf32>
    %695 = tpu.matmul %694, %4, %cst_299 {dimension_numbers = #tpu.dot_dimension_numbers<[1], [0], [0], [1], [0, 0, 1, 1], [], []>} : vector<32x128xf32>, vector<128x1xf32>, vector<32x1xf32> -> vector<32x1xf32>
    %696 = arith.mulf %694, %694 : vector<32x128xf32>
    %cst_300 = arith.constant dense<0.000000e+00> : vector<32x1xf32>
    %697 = tpu.matmul %696, %4, %cst_300 {dimension_numbers = #tpu.dot_dimension_numbers<[1], [0], [0], [1], [0, 0, 1, 1], [], []>} : vector<32x128xf32>, vector<128x1xf32>, vector<32x1xf32> -> vector<32x1xf32>
    %698 = arith.mulf %695, %695 : vector<32x1xf32>
    %699 = arith.subf %697, %698 : vector<32x1xf32>
    %cst_301 = arith.constant 0.000000e+00 : f32
    %700 = vector.broadcast %cst_301 : f32 to vector<32x1xf32>
    %701 = arith.maximumf %699, %700 : vector<32x1xf32>
    %c0_302 = arith.constant 0 : index
    %c0_303 = arith.constant 0 : index
    %702 = vector.load %arg13[%c0_302, %c0_303] : memref<32x1xf32, #tpu.memory_space<vmem>>, vector<32x1xf32>
    %cst_304 = arith.constant 9.99999974E-6 : f32
    %703 = vector.broadcast %cst_304 : f32 to vector<32x1xf32>
    %704 = arith.addf %701, %703 : vector<32x1xf32>
    %705 = math.rsqrt %704 : vector<32x1xf32>
    %706 = arith.mulf %702, %705 : vector<32x1xf32>
    %c0_305 = arith.constant 0 : index
    %c0_306 = arith.constant 0 : index
    %707 = vector.load %arg14[%c0_305, %c0_306] : memref<32x1xf32, #tpu.memory_space<vmem>>, vector<32x1xf32>
    %708 = arith.mulf %695, %706 : vector<32x1xf32>
    %709 = arith.subf %707, %708 : vector<32x1xf32>
    %710 = vector.broadcast %706 : vector<32x1xf32> to vector<32x128xf32>
    %711 = arith.mulf %694, %710 : vector<32x128xf32>
    %712 = vector.broadcast %709 : vector<32x1xf32> to vector<32x128xf32>
    %713 = arith.addf %711, %712 : vector<32x128xf32>
    %714 = arith.truncf %713 : vector<32x128xf32> to vector<32x128xbf16>
    %715 = arith.truncf %3 : vector<128x2xf32> to vector<128x2xbf16>
    %cst_307 = arith.constant dense<0.000000e+00> : vector<32x2xf32>
    %716 = tpu.matmul %714, %715, %cst_307 {dimension_numbers = #tpu.dot_dimension_numbers<[1], [0], [0], [1], [0, 0, 1, 1], [], []>} : vector<32x128xbf16>, vector<128x2xbf16>, vector<32x2xf32> -> vector<32x2xf32>
    %c0_308 = arith.constant 0 : index
    %c0_309 = arith.constant 0 : index
    %717 = vector.load %arg15[%c0_308, %c0_309] : memref<8x32xbf16, #tpu.memory_space<vmem>>, vector<8x32xbf16>
    %718 = arith.truncf %716 : vector<32x2xf32> to vector<32x2xbf16>
    %cst_310 = arith.constant dense<0.000000e+00> : vector<8x2xf32>
    %719 = tpu.matmul %717, %718, %cst_310 {dimension_numbers = #tpu.dot_dimension_numbers<[1], [0], [0], [1], [0, 0, 1, 1], [], []>} : vector<8x32xbf16>, vector<32x2xbf16>, vector<8x2xf32> -> vector<8x2xf32>
    %cst_311 = arith.constant 0.000000e+00 : f32
    %720 = vector.broadcast %cst_311 : f32 to vector<8x2xf32>
    %721 = arith.maximumf %719, %720 : vector<8x2xf32>
    %c0_312 = arith.constant 0 : index
    %c0_313 = arith.constant 0 : index
    %722 = vector.load %arg16[%c0_312, %c0_313] : memref<32x8xbf16, #tpu.memory_space<vmem>>, vector<32x8xbf16>
    %723 = arith.truncf %721 : vector<8x2xf32> to vector<8x2xbf16>
    %cst_314 = arith.constant dense<0.000000e+00> : vector<32x2xf32>
    %724 = tpu.matmul %722, %723, %cst_314 {dimension_numbers = #tpu.dot_dimension_numbers<[1], [0], [0], [1], [0, 0, 1, 1], [], []>} : vector<32x8xbf16>, vector<8x2xbf16>, vector<32x2xf32> -> vector<32x2xf32>
    %725 = arith.negf %724 : vector<32x2xf32>
    %726 = math.exp %725 : vector<32x2xf32>
    %cst_315 = arith.constant 1.000000e+00 : f32
    %727 = vector.broadcast %cst_315 : f32 to vector<32x2xf32>
    %728 = arith.addf %727, %726 : vector<32x2xf32>
    %729 = arith.divf %727, %728 : vector<32x2xf32>
    %c0_i32_316 = arith.constant 0 : i32
    %730 = vector.broadcast %c0_i32_316 : i32 to vector<1x128xi32>
    %731 = arith.cmpi eq, %2, %730 : vector<1x128xi32>
    %732 = vector.extract_strided_slice %729 {offsets = [0, 0], sizes = [32, 1], strides = [1, 1]} : vector<32x2xf32> to vector<32x1xf32>
    %cst_317 = arith.constant 0.000000e+00 : f32
    %733 = vector.shape_cast %731 : vector<1x128xi1> to vector<1x128xi1>
    %734 = vector.broadcast %733 : vector<1x128xi1> to vector<32x128xi1>
    %735 = vector.shape_cast %732 : vector<32x1xf32> to vector<32x1xf32>
    %736 = vector.broadcast %735 : vector<32x1xf32> to vector<32x128xf32>
    %737 = vector.broadcast %cst_317 : f32 to vector<32x128xf32>
    %738 = arith.select %734, %736, %737 : vector<32x128xi1>, vector<32x128xf32>
    %c1_i32_318 = arith.constant 1 : i32
    %739 = vector.broadcast %c1_i32_318 : i32 to vector<1x128xi32>
    %740 = arith.cmpi eq, %2, %739 : vector<1x128xi32>
    %741 = vector.extract_strided_slice %729 {offsets = [0, 1], sizes = [32, 1], strides = [1, 1]} : vector<32x2xf32> to vector<32x1xf32>
    %742 = vector.shape_cast %740 : vector<1x128xi1> to vector<1x128xi1>
    %743 = vector.broadcast %742 : vector<1x128xi1> to vector<32x128xi1>
    %744 = vector.shape_cast %741 : vector<32x1xf32> to vector<32x1xf32>
    %745 = vector.broadcast %744 : vector<32x1xf32> to vector<32x128xf32>
    %746 = arith.select %743, %745, %738 : vector<32x128xi1>, vector<32x128xf32>
    %747 = arith.mulf %713, %746 : vector<32x128xf32>
    %748 = arith.addf %747, %40 : vector<32x128xf32>
    %cst_319 = arith.constant 0.000000e+00 : f32
    %749 = vector.broadcast %cst_319 : f32 to vector<32x128xf32>
    %750 = arith.maximumf %748, %749 : vector<32x128xf32>
    %c0_320 = arith.constant 0 : index
    %c0_321 = arith.constant 0 : index
    %751 = vector.load %arg39[%c0_320, %c0_321] : memref<32x128xf32, #tpu.memory_space<vmem>>, vector<32x128xf32>
    tpu.vector_store %arg39[%c0_320, %c0_321], %750 {strides = array<i32>} : memref<32x128xf32, #tpu.memory_space<vmem>>, vector<32x128xf32>,
    return
  }
}

</mosaic_0001>

<bundles_post_ra>
// kernel: tpu_custom_call.1
= control target key start
LH: loop header
LB: loop body
LE: loop exit
PB: predicated region body
PF: predicated region fallthrough
CT: control target
= control target key end

     0   :  { %6 = vsyncpa [#allocation3], 0  ;;  %s128_s0 = inlined_call_operand.hbm [shape: f32[8,128], index: 0, kind: input, shape index: {}]   ;;  %s129_s1 = inlined_call_operand.hbm [shape: f32[8,128], index: 1, kind: output, shape index: {}]  }
   0x1   :  { %7 = vsyncpa [#allocation4], 0  ;;  %s91_s6 = smov [#allocation2]   ;;  %s43_s10 = scalar_lea.hbm %s128_s0, 128 }
   0x2   :  { %s14_s7 = sshll.u32 %s91_s6, 4  ;;  %p44_p0 = scmp.ne.s32.totalorder %s128_s0, %s43_s10  ;;  %s15_s7 = int_to_ptr.vmem [resolvable:$true] %s14_s7 }
   0x3   :  { %p47_p1 = scmp.lt.u32.totalorder %s43_s10, %s128_s0 }
   0x5   :  { %p49_p2 = pnand %p47_p1, %p44_p0 }
   0x7   :  { %52 = shalt.err (!%p49_p2)
}
   0x8   :  { %s53_s15 = scalar_lea.vmem %s15_s7, 128  ;;  %p58_p4 = scmp.lt.s32.totalorder %s15_s7, %s15_s7 }
   0x9   :  { %p54_p3 = scmp.ne.s32.totalorder %s15_s7, %s53_s15  ;;  %p59_p5 = scmp.lt.s32.totalorder %s53_s15, %s53_s15 }
   0xb   :  { %p60_p6 = por %p59_p5, %p58_p4 }
   0xd   :  { %p61_p7 = pnand %p60_p6, %p54_p3 }
   0xf   :  { %64 = shalt.err (!%p61_p7)
}
  0x10   :  { %17 = dma.hbm_to_vmem [thread:$0]  %s128_s0, 128, %s15_s7, [#allocation3]  }
  0x11   :  { %87 = dma.done.wait [#allocation3], 128  }
  0x12   :  { %88 = vsyncadd [#allocation3], 4294967168  ;;  %v21_v0 = vld [vmem:[#allocation2] sm:$0xff]  ;;  %s92_s18 = smov 1   ;;  %s93_s19 = smov [#allocation5]  }
  0x13   :  { %22 = vrot.lane.b32.xlu0 %v21_v0, %s92_s18  ;;  %s31_s20 = sshll.u32 %s93_s19, 4  ;;  %s32_s20 = int_to_ptr.vmem [resolvable:$true] %s31_s20 }
  0x14   :  { %s65_s21 = scalar_lea.vmem %s32_s20, 128  ;;  %p70_p9 = scmp.lt.s32.totalorder %s32_s20, %s32_s20 }
  0x15   :  { %p66_p8 = scmp.ne.s32.totalorder %s32_s20, %s65_s21  ;;  %p71_p10 = scmp.lt.s32.totalorder %s65_s21, %s65_s21 }
  0x17   :  { %p72_p11 = por %p71_p10, %p70_p9 }
  0x19   :  { %p73_p12 = pnand %p72_p11, %p66_p8 }
  0x85   :  { %v23_v1 = vpop.permute.xlu0 %22 }
  0x86   :  { %24 = vst [vmem:[#allocation5] sm:$0xff] %v23_v1 }
  0x87   :  { %76 = shalt.err (!%p73_p12)
}
  0x88   :  { %s77_s0 = scalar_lea.hbm %s129_s1, 128 }
  0x89   :  { %p78_p13 = scmp.ne.s32.totalorder %s129_s1, %s77_s0  ;;  %p81_p0 = scmp.lt.u32.totalorder %s77_s0, %s129_s1 }
  0x8b   :  { %p83_p1 = pnand %p81_p0, %p78_p13 }
  0x8d   :  { %86 = shalt.err (!%p83_p1)
}
  0x8e   :  { %34 = dma.vmem_to_hbm [thread:$0]  %s32_s20, 128, %s129_s1, [#allocation4]  }
  0x8f   :  { %89 = dma.done.wait [#allocation4], 128  }
  0x90   :  { %90 = vsyncadd [#allocation4], 4294967168 }
  0x91   :  { %38 = vsyncpa [#allocation3], 1 }
  0x92   :  { %39 = vsyncpa [#allocation4], 1 }

// kernel: _forward.1
= control target key start
LH: loop header
LB: loop body
LE: loop exit
PB: predicated region body
PF: predicated region fallthrough
CT: control target
= control target key end

     0   :  { %s7888_s3 = smov 3   ;;  %v9704_v30 = vmov 0.0   ;;  %vm9717_vm0 = vmmov 0   ;;  %s7891_s10 = smov 5   ;;  %vm9720_vm1 = vcmask 261120   ;;  %vm9719_vm2 = vcmask 15360   ;;  %s9701_s0 = inlined_call_operand.smem [shape: u32[40], index: -1, kind: input, shape index: {}] }
   0x1   :  { %s7945_s6 = sld [smem:[%s9701_s0 + %s7888_s3]]   ;;  %6337 = vmatprep.subr.bf16.mxu1 %v9704_v30  ;;  %6341 = vmatprep.mubr.msk.bf16.mxu1 %vm9717_vm0, %v9704_v30  ;;  %s7892_s14 = smov 6   ;;  %vm9716_vm3 = vcmask 1040384   ;;  %v9706_v47 = vmov 0   ;;  %v9702_v48 = vmov 1   ;;  %vm9722_vm11 = vcmask 7168  }
   0x2   :  { %s7950_s9 = sld [smem:[%s9701_s0]]   ;;  %7460 = vset.pattern.permute.xlu0 %v9706_v47  ;;  %7461 = vset.pattern.permute.xlu1 %v9702_v48  ;;  %s7895_s18 = smov 2  }
   0x3   :  { %s5603_s13 = sld [smem:[%s9701_s0 + %s7891_s10]]   ;;  %s7896_s22 = smov 7  }
   0x4   :  { %s5604_s17 = sld [smem:[%s9701_s0 + %s7892_s14]]   ;;  %s7897_s26 = smov 1  }
   0x5   :  { %s5600_s21 = sld [smem:[%s9701_s0 + %s7895_s18]]   ;;  %s7898_s27 = smov 127  }
   0x6   :  { %s8065_s25 = sld [smem:[%s9701_s0 + %s7896_s22]]   ;;  %s7899_s28 = smov 8  }
   0x7   :  { %v169_v0 = vld [vmem:[%s7945_s6] sm:$0xff]  ;;  %v170_v1 = vld [vmem:[%s7945_s6 + $0x8] sm:$0xff]  ;;  %v171_v2 = vld [vmem:[%s7945_s6 + $0x10] sm:$0xff]  ;;  %s5606_s1 = sld [smem:[%s9701_s0 + %s7899_s28]]   ;;  %s7900_s2 = smov 4  }
   0x8   :  { %v7955_v3 = vpack.c.bf16 %v170_v1, %v169_v0  ;;  %v172_v4 = vld [vmem:[%s7945_s6 + $0x18] sm:$0xff]  ;;  %v173_v6 = vld [vmem:[%s7945_s6 + $0x20] sm:$0xff]  ;;  %v174_v7 = vld [vmem:[%s7945_s6 + $0x28] sm:$0xff]  ;;  %s7901_s10 = smov 9   ;;  %s7902_s14 = smov 10  }
   0x9   :  { %v7958_v5 = vpack.c.bf16 %v172_v4, %v171_v2  ;;  %v7965_v8 = vpack.c.bf16 %v174_v7, %v173_v6  ;;  %v7968_v9 = vld [vmem:[%s7950_s9] sm:$0xff]  ;;  %v7971_v10 = vld [vmem:[%s7950_s9 + $0x8] sm:$0xff]  ;;  %v175_v11 = vld [vmem:[%s7945_s6 + $0x30] sm:$0xff]  ;;  %v409_v7 = vlaneseq  ;;  %s7903_s19 = smov 26   ;;  %s7904_s23 = smov 28  }
   0xa   :  { %6317 = vmatprep.subr.bf16.mxu0 %v7955_v3  ;;  %v176_v12 = vld [vmem:[%s7945_s6 + $0x38] sm:$0xff]  ;;  %v201_v13 = vpack.c.bf16 %v7971_v10, %v7968_v9  ;;  %v177_v15 = vld [vmem:[%s7945_s6 + $0x40] sm:$0xff]  ;;  %v178_v16 = vld [vmem:[%s7945_s6 + $0x48] sm:$0xff]  ;;  %s5624_s22 = sld [smem:[%s9701_s0 + %s7903_s19]]   ;;  %s7905_s29 = smov 25  }
   0xb   :  { %6318 = vmatpush3.bf16.msra.mxu0 %v7955_v3  ;;  %v7979_v14 = vpack.c.bf16 %v176_v12, %v175_v11  ;;  %v7985_v17 = vpack.c.bf16 %v178_v16, %v177_v15  ;;  %v179_v18 = vld [vmem:[%s7945_s6 + $0x50] sm:$0xff]  ;;  %v180_v19 = vld [vmem:[%s7945_s6 + $0x58] sm:$0xff]  ;;  %v181_v21 = vld [vmem:[%s7945_s6 + $0x60] sm:$0xff]  ;;  %v410_v12 = vshrl.u32 %v409_v7, 7  ;;  %s5626_s28 = sld [smem:[%s9701_s0 + %s7904_s23]]   ;;  %s7906_s5 = smov 27  }
   0xc   :  { %6319 = vmatprep.subr.bf16.mxu0 %v7958_v5  ;;  %6333 = vmatprep.mubr.bf16.mxu0 %v201_v13  ;;  %v7991_v20 = vpack.c.bf16 %v180_v19, %v179_v18  ;;  %v182_v22 = vld [vmem:[%s7945_s6 + $0x68] sm:$0xff]  ;;  %v183_v24 = vld [vmem:[%s7945_s6 + $0x70] sm:$0xff]  ;;  %v184_v25 = vld [vmem:[%s7945_s6 + $0x78] sm:$0xff]  ;;  %s8106_s6 = sld [smem:[%s9701_s0 + %s7900_s2]]   ;;  %s7909_s19 = smov 126  }
   0xd   :  { %v7997_v23 = vpack.c.bf16 %v182_v22, %v181_v21  ;;  %v8003_v26 = vpack.c.bf16 %v184_v25, %v183_v24  ;;  %v8007_v27 = vld [vmem:[%s7950_s9 + $0x10] sm:$0xff]  ;;  %v8010_v28 = vld [vmem:[%s7950_s9 + $0x18] sm:$0xff]  ;;  %v260_v37 = vld [vmem:[%s5603_s13] sm:$0x1]  ;;  %v8042_v13 = vsub.s32 0, %v410_v12  ;;  %v9745_v24 = vmov 0  ;;  %s8154_s9 = sld [smem:[%s9701_s0 + %s7897_s26]]  }
   0xe   :  { %v202_v29 = vpack.c.bf16 %v8010_v28, %v8007_v27  ;;  %v7693_v38 = vld [vmem:[%s5604_s17] sm:$0xff]   ;;  %v7694_v46 = vld [vmem:[%s5604_s17 + $0x8] sm:$0xff]   ;;  %s5607_s13 = sld [smem:[%s9701_s0 + %s7901_s10]]   ;;  %s7907_s10 = smov 17  }
   0xf   :  { %6320 = vmatpush3.bf16.msra.mxu0 %v7958_v5  ;;  %v168_v11 = vld [vmem:[%s5600_s21] sm:$0x1]  ;;  %s5608_s17 = sld [smem:[%s9701_s0 + %s7902_s14]]   ;;  %s7908_s14 = smov 19  }
  0x10   :  { %6321 = vmatprep.subr.bf16.mxu0 %v7965_v8  ;;  %vm407_vm4 = vcmp.eq.s32.totalorder %v168_v11, 0  ;;  %vm438_vm5 = vcmp.eq.s32.totalorder %v168_v11, 1  ;;  %s8302_s4 = sld [smem:[%s9701_s0 + %s7905_s29]]   ;;  %s7912_s23 = smov 125  }
  0x11   :  { %v408_v15 = vsel %vm407_vm4, 1, %v9706_v47  ;;  %v439_v16 = vsel %vm438_vm5, 1, %v9706_v47  ;;  %vm9721_vm5 = vcmask 1039360   ;;  %s8307_s8 = sld [smem:[%s9701_s0 + %s7906_s5]]   ;;  %s7915_s29 = smov 23  }
  0x12   :  { %v412_v18 = vrot.slane %v408_v15, %v8042_v13  ;;  %v443_v22 = vrot.slane %v439_v16, %v8042_v13  ;;  %v193_v7 = vld [vmem:[%s8106_s6 + $0x40] sm:$0xff]  ;;  %v194_v11 = vld [vmem:[%s8106_s6 + $0x48] sm:$0xff]  ;;  %v195_v15 = vld [vmem:[%s8106_s6 + $0x50] sm:$0xff]  ;;  %s7916_s5 = smov 20   ;;  %s7923_s7 = smov 33  }
  0x13   :  { %6322 = vmatpush3.bf16.msra.mxu0 %v7965_v8  ;;  %v8133_v12 = vpack.c.bf16 %v194_v11, %v193_v7  ;;  %v196_v16 = vld [vmem:[%s8106_s6 + $0x58] sm:$0xff]  ;;  %v9768_v11 = vmov 0  ;;  %s5631_s11 = sld [smem:[%s9701_s0 + %s7923_s7]]   ;;  %s7924_s12 = smov 34  }
  0x14   :  { %6323 = vmatprep.subr.bf16.mxu0 %v7979_v14  ;;  %vm8048_vm6 = vcmp.eq.s32.totalorder %v412_v18, 1  ;;  %vm8052_vm7 = vcmp.eq.s32.totalorder %v443_v22, 1  ;;  %v8139_v18 = vpack.c.bf16 %v196_v16, %v195_v15  ;;  %s5632_s15 = sld [smem:[%s9701_s0 + %s7924_s12]]   ;;  %s7925_s16 = smov 35  }
  0x15   :  { %v9746_v24 = vsel %vm8048_vm6, 4294967295, %v9745_v24  ;;  %9755 = vst [vmem:[#allocation8_spill] sm:$0xff] %v8133_v12  ;;  %s7926_s20 = smov 36   ;;  %s7930_s7 = smov 11  }
  0x16   :  { %9747 = vst [vmem:[#allocation2_spill] sm:$0xff] %v9746_v24  ;;  %9756 = vst [vmem:[#allocation9_spill] sm:$0xff] %v8139_v18 }
  0x17   :  { %6324 = vmatpush3.bf16.msra.mxu0 %v7979_v14 }
  0x18   :  { %6325 = vmatprep.subr.bf16.mxu0 %v7985_v17 }
  0x1b   :  { %6326 = vmatpush3.bf16.msra.mxu0 %v7985_v17 }
  0x1c   :  { %6327 = vmatprep.subr.bf16.mxu0 %v7991_v20 }
  0x1f   :  { %6328 = vmatpush3.bf16.msra.mxu0 %v7991_v20 }
  0x20   :  { %6329 = vmatprep.subr.bf16.mxu0 %v7997_v23 }
  0x23   :  { %6330 = vmatpush3.bf16.msra.mxu0 %v7997_v23 }
  0x24   :  { %6331 = vmatprep.subr.bf16.mxu0 %v8003_v26 }
  0x27   :  { %6332 = vmatpush3.bf16.msra.mxu0 %v8003_v26 }
  0x2a   :  { %6334 = vmatmul.mubr.bf16.vlgmr.msra.gmra.mrb[0].mxu0 %v202_v29  ;;  %v9748_v29 = vmov 0 }
  0x2b   :  { %v9749_v29 = vsel %vm8052_vm7, 4294967295, %v9748_v29 }
  0x2c   :  { %9750 = vst [vmem:[#allocation3_spill] sm:$0xff] %v9749_v29 }
  0xfd   :  { %v6335_v31 = vpop.f32.mrb[0].mxu0 }
  0xfe   :  { %v245_v32 = vpop.f32.mrb[1].mxu0 }
  0xff   :  { %v6336_v33 = vpop.f32.mrb[2].mxu0 }
 0x100   :  { %v262_v34 = vpack.c.bf16 %v6336_v33, %v6335_v31  ;;  %v248_v35 = vpop.f32.mrb[3].mxu0 }
 0x101   :  { %v261_v36 = vpack.c.bf16 %v248_v35, %v245_v32 }
 0x103   :  { %6338 = vmatpush3.bf16.msra.mxu1 %v261_v36 }
 0x104   :  { %6339 = vmatprep.subr.bf16.mxu1 %v9704_v30 }
 0x107   :  { %6340 = vmatpush3.bf16.msra.mxu1 %v262_v34 }
 0x10a   :  { %6342 = vmatmul.mubr.msk.bf16.vlgmr.msra.gmra.mrb[0].mxu1 %vm9720_vm1, %v260_v37 }
 0x10b   :  { %6347 = vmatprep.mubr.msk.bf16.mxu1 %vm9719_vm2, %v7693_v38 }
 0x1dd   :  { %v301_v39 = vpop.f32.mrb[0].mxu1 }
 0x1de   :  { %v307_v40 = vmax.f32 %v301_v39, 0.0  ;;  %v6343_v41 = vpop.f32.mrb[1].mxu1 }
 0x1df   :  { %v304_v42 = vpop.f32.mrb[2].mxu1 }
 0x1e0   :  { %v312_v43 = vpack.c.bf16 %v307_v40, %v307_v40  ;;  %v6344_v44 = vpop.f32.mrb[3].mxu1 }
 0x1e2   :  { %v332_v45 = vsel %vm9716_vm3, %v312_v43, 0  ;;  %7409 = vmatprep.subr.msk.bf16.mxu1 %vm9716_vm3, %v312_v43  ;;  %vm9727_vm3 = vmmov 1  }
 0x1e3   :  { %6346 = vmatpush3.bf16.msra.mxu1 %v332_v45 }
 0x1e6   :  { %6348 = vmatmul.mubr.msk.bf16.vlgmr.msra.gmra.mrb[4].mxu1 %vm9719_vm2, %v7694_v46 }
 0x2b9   :  { %v6349_v49 = vpop.f32.mrb[4].mxu1 }
 0x2ba   :  { %v5645_v50 = vmul.f32 -1.442695, %v6349_v49  ;;  %v368_v51 = vpop.f32.mrb[5].mxu1 }
 0x2bb   :  { %v5643_v52 = vmul.f32 -1.442695, %v368_v51  ;;  %v6350_v53 = vpop.f32.mrb[6].mxu1 }
 0x2bc   :  { %7763 = vpow2.f32 %v5645_v50  ;;  %v5646_v54 = vmul.f32 -1.442695, %v6350_v53  ;;  %v371_v55 = vpop.f32.mrb[7].mxu1  ;;  %v7695_v53 = vld [vmem:[%s8065_s25] sm:$0xff]  }
 0x2bd   :  { %7765 = vpow2.f32 %v5643_v52  ;;  %v5644_v56 = vmul.f32 -1.442695, %v371_v55  ;;  %6355 = vmatprep.mubr.msk.bf16.mxu1 %vm9720_vm1, %v7695_v53  ;;  %v185_v55 = vld [vmem:[%s8106_s6] sm:$0xff] }
 0x2be   :  { %7767 = vpow2.f32 %v5646_v54 }
 0x2bf   :  { %7769 = vpow2.f32 %v5644_v56  ;;  %v186_v56 = vld [vmem:[%s8106_s6 + $0x8] sm:$0xff] }
 0x2c6   :  { %v7764_v57 = vpop.eup %7763 }
 0x2c7   :  { %v7766_v58 = vpop.eup %7765  ;;  %v397_v59 = vadd.f32 1.0, %v7764_v57  ;;  %v475_v57 = vld [vmem:[%s5606_s1 + $0x10] sm:$0xff] }
 0x2c8   :  { %v7768_v60 = vpop.eup %7767  ;;  %v395_v61 = vadd.f32 1.0, %v7766_v58  ;;  %v8110_v58 = vpack.c.bf16 %v186_v56, %v185_v55  ;;  %v7696_v56 = vld [vmem:[%s8065_s25 + $0x8] sm:$0xff]  }
 0x2c9   :  { %7771 = vrcp.f32 %v397_v59  ;;  %v7770_v62 = vpop.eup %7769  ;;  %v398_v63 = vadd.f32 1.0, %v7768_v60  ;;  %v187_v59 = vld [vmem:[%s8106_s6 + $0x10] sm:$0xff]  ;;  %v188_v60 = vld [vmem:[%s8106_s6 + $0x18] sm:$0xff] }
 0x2ca   :  { %7773 = vrcp.f32 %v395_v61  ;;  %v396_v0 = vadd.f32 1.0, %v7770_v62  ;;  %v8114_v61 = vpack.c.bf16 %v188_v60, %v187_v59  ;;  %v189_v62 = vld [vmem:[%s8106_s6 + $0x20] sm:$0xff]  ;;  %7044 = vmatprep.subr.bf16.mxu0 %v8110_v58 }
 0x2cb   :  { %7775 = vrcp.f32 %v398_v63  ;;  %v190_v63 = vld [vmem:[%s8106_s6 + $0x28] sm:$0xff]  ;;  %7046 = vmatpush3.bf16.msra.mxu0 %v8110_v58 }
 0x2cc   :  { %7777 = vrcp.f32 %v396_v0  ;;  %v476_v0 = vld [vmem:[%s5606_s1 + $0x18] sm:$0xff]  ;;  %7048 = vmatprep.subr.bf16.mxu0 %v8114_v61 }
 0x2cf   :  { %7050 = vmatpush3.bf16.msra.mxu0 %v8114_v61 }
 0x2d3   :  { %v7772_v1 = vpop.eup %7771 }
 0x2d4   :  { %v7774_v2 = vpop.eup %7773  ;;  %426 = vperm.xlu0 %7460, %v7772_v1  }
 0x2d5   :  { %446 = vperm.xlu1 %7461, %v7774_v2   ;;  %v7776_v4 = vpop.eup %7775 }
 0x2d6   :  { %v7778_v6 = vpop.eup %7777 }
 0x2d8   :  { %416 = vperm.xlu0 %7460, %v7774_v2   ;;  %v191_v2 = vld [vmem:[%s8106_s6 + $0x30] sm:$0xff] }
 0x2d9   :  { %7462 = vset.pattern.permute.xlu1 %v9706_v47 }
 0x2da   :  { %431 = vperm.xlu1 %7462, %v7776_v4  }
 0x2dc   :  { %421 = vperm.xlu0 %7460, %v7778_v6  }
 0x2de   :  { %7464 = vset.pattern.permute.xlu1 %v9702_v48 }
 0x2df   :  { %450 = vperm.xlu1 %7464, %v7778_v6  }
 0x2e0   :  { %7463 = vset.pattern.permute.xlu0 %v9702_v48 }
 0x2e1   :  { %454 = vperm.xlu0 %7463, %v7772_v1   ;;  %v8121_v1 = vpack.c.bf16 %v190_v63, %v189_v62  ;;  %v7697_v62 = vld [vmem:[%s8065_s25 + $0x10] sm:$0xff]  }
 0x2e3   :  { %458 = vperm.xlu1 %7464, %v7776_v4   ;;  %v192_v4 = vld [vmem:[%s8106_s6 + $0x38] sm:$0xff]  ;;  %7052 = vmatprep.subr.bf16.mxu0 %v8121_v1 }
 0x2e4   :  { %v8127_v6 = vpack.c.bf16 %v192_v4, %v191_v2  ;;  %7054 = vmatpush3.bf16.msra.mxu0 %v8121_v1 }
 0x2e5   :  { %7486 = vset.pattern.permute.xlu0 %v9706_v47 }
 0x2e6   :  { %7056 = vmatprep.subr.bf16.mxu0 %v8127_v6 }
 0x2e7   :  { %7485 = vset.pattern.permute.xlu1 %v9706_v47 }
 0x2e8   :  { %7058 = vmatpush3.bf16.msra.mxu0 %v8127_v6 }
 0x2e9   :  { %7060 = vmatprep.subr.bf16.mxu0 %v8133_v12 }
 0x2ec   :  { %7062 = vmatpush3.bf16.msra.mxu0 %v8133_v12 }
 0x2ed   :  { %7064 = vmatprep.subr.bf16.mxu0 %v8139_v18 }
 0x2f0   :  { %7066 = vmatpush3.bf16.msra.mxu0 %v8139_v18 }
 0x353   :  { %v427_v19 = vpop.permute.xlu0 %426 }
 0x354   :  { %v447_v21 = vpop.permute.xlu1 %446  ;;  %v436_v39 = vsel %vm8048_vm6, %v427_v19, 0.0  ;;  %v197_v19 = vld [vmem:[%s8106_s6 + $0x60] sm:$0xff] }
 0x357   :  { %v417_v25 = vpop.permute.xlu0 %416 }
 0x358   :  { %v434_v31 = vsel %vm8048_vm6, %v417_v25, 0.0  ;;  %v8157_v25 = vld [vmem:[%s8154_s9] sm:$0x1] }
 0x359   :  { %v432_v32 = vpop.permute.xlu1 %431  ;;  %v461_v33 = vsel %vm8052_vm7, %v447_v21, %v434_v31  ;;  %v198_v21 = vld [vmem:[%s8106_s6 + $0x68] sm:$0xff]  ;;  %v8160_v31 = vadd.s32 4294967295, %v8157_v25 }
 0x35a   :  { %v465_v35 = vadd.f32 2.0, %v461_v33  ;;  %v437_v44 = vsel %vm8048_vm6, %v432_v32, 0.0  ;;  %v8145_v22 = vpack.c.bf16 %v198_v21, %v197_v19  ;;  %v7698_v21 = vld [vmem:[%s8065_s25 + $0x18] sm:$0xff]  }
 0x35b   :  { %v422_v34 = vpop.permute.xlu0 %421  ;;  %vm482_vm8 = vcmp.ge.s32.totalorder %v8160_v31, 0  ;;  %vm483_vm9 = vcmp.lt.s32.totalorder %v8160_v31, 16 }
 0x35c   :  { %v435_v36 = vsel %vm8048_vm6, %v422_v34, 0.0  ;;  %v8074_v43 = vmul.f32 %v465_v35, %v7968_v9  ;;  %9757 = vst [vmem:[#allocation10_spill] sm:$0xff] %v8145_v22  ;;  %7068 = vmatprep.subr.bf16.mxu0 %v8145_v22  ;;  %vm8164_vm10 = vmand %vm482_vm8, %vm483_vm9  ;;  %v8173_v35 = vadd.s32 1, %v8157_v25 }
 0x35d   :  { %7070 = vmatpush3.bf16.msra.mxu0 %v8145_v22  ;;  %v506_v33 = vsel %vm8164_vm10, 1, %v9706_v47  ;;  %vm1191_vm0 = vmxor %vm8164_vm10, %vm9727_vm3 }
 0x35e   :  { %v451_v37 = vpop.permute.xlu1 %450  ;;  %9751 = vst [vmem:[#allocation4_spill] sm:$0xff] %v8074_v43  ;;  %v510_v34 = vrot.slane %v506_v33, %v8042_v13  ;;  %vm689_vm13 = vcmp.ge.s32.totalorder %v8173_v35, 0  ;;  %vm690_vm14 = vcmp.lt.s32.totalorder %v8173_v35, 16 }
 0x35f   :  { %v462_v38 = vsel %vm8052_vm7, %v451_v37, %v435_v36  ;;  %vm8190_vm4 = vmand %vm689_vm13, %vm690_vm14  ;;  %vm1192_vm13 = vcmp.ge.s32.totalorder %v8160_v31, 4294967295  ;;  %vm1193_vm14 = vcmp.lt.s32.totalorder %v8160_v31, 17  ;;  %v1619_v31 = vadd.s32 4294967292, %v8157_v25 }
 0x360   :  { %v466_v40 = vadd.f32 2.0, %v462_v38  ;;  %v455_v41 = vpop.permute.xlu0 %454  ;;  %vm8175_vm12 = vcmp.eq.s32.totalorder %v510_v34, 1  ;;  %vm1194_vm2 = vmand %vm1192_vm13, %vm1193_vm14 }
 0x361   :  { %v463_v42 = vsel %vm8052_vm7, %v455_v41, %v436_v39  ;;  %vm8186_vm15 = vmpackc.low %vm8175_vm12, %vm8175_vm12  ;;  %vm1620_vm13 = vcmp.ge.s32.totalorder %v1619_v31, 0 }
 0x362   :  { %v8079_v45 = vmul.f32 %v466_v40, %v7971_v10  ;;  %v467_v46 = vadd.f32 2.0, %v463_v42  ;;  %v459_v49 = vpop.permute.xlu1 %458  ;;  %v9762_v42 = vmov 0  ;;  %vm8429_vm10 = vmxor %vm8190_vm4, %vm9727_vm3 }
 0x363   :  { %v464_v50 = vsel %vm8052_vm7, %v459_v49, %v437_v44  ;;  %v9763_v42 = vsel %vm8186_vm15, 4294967295, %v9762_v42 }
 0x364   :  { %9752 = vst [vmem:[#allocation5_spill] sm:$0xff] %v8079_v45  ;;  %v468_v51 = vadd.f32 2.0, %v464_v50  ;;  %v7465_v52 = vpack.i.bf16 %v8079_v45, %v8074_v43  ;;  %v8087_v54 = vmul.f32 %v467_v46, %v8007_v27  ;;  %v473_v27 = vld [vmem:[%s5606_s1] sm:$0xff]  ;;  %v612_v55 = vpack.c.bf16 %v8079_v45, %v8074_v43 }
 0x366   :  { %9753 = vst [vmem:[#allocation6_spill] sm:$0xff] %v8087_v54  ;;  %v8090_v9 = vmul.f32 %v468_v51, %v8010_v28  ;;  %7466 = vrot.lane.b32.xlu1 %v7465_v52, %s7897_s26  ;;  %v474_v28 = vld [vmem:[%s5606_s1 + $0x8] sm:$0xff]  ;;  %s7922_s1 = smov 32  }
 0x368   :  { %9754 = vst [vmem:[#allocation7_spill] sm:$0xff] %v8090_v9  ;;  %v7470_v10 = vpack.i.bf16 %v8090_v9, %v8087_v54  ;;  %v613_v63 = vpack.c.bf16 %v8090_v9, %v8087_v54 }
 0x36a   :  { %7476 = vrot.lane.b32.xlu1 %v7465_v52, %s7898_s27  ;;  %7471 = vrot.lane.b32.xlu0 %v7470_v10, %s7897_s26 }
 0x36e   :  { %7481 = vrot.lane.b32.xlu0 %v7470_v10, %s7898_s27  ;;  %585 = vperm.xlu1 %7485, %v473_v27   ;;  %v709_v10 = vsel %vm8190_vm4, 1, %v9706_v47 }
 0x372   :  { %590 = vperm.xlu0 %7486, %v474_v28   ;;  %595 = vperm.xlu1 %7485, %v475_v57   ;;  %v713_v57 = vrot.slane %v709_v10, %v8042_v13 }
 0x374   :  { %vm8215_vm8 = vcmp.eq.s32.totalorder %v713_v57, 1 }
 0x375   :  { %vm8225_vm9 = vmpackc.low %vm8215_vm8, %vm8215_vm8 }
 0x376   :  { %600 = vperm.xlu1 %7485, %v476_v0   ;;  %v9769_v11 = vsel %vm8225_vm9, 4294967295, %v9768_v11 }
 0x3d8   :  { %v7467_v36 = vpop.permute.xlu1 %7466 }
 0x3d9   :  { %v7469_v38 = vunpack.i.h.bf16 %v7467_v36  ;;  %v7468_v39 = vunpack.i.l.bf16 %v7467_v36  ;;  %v7699_v36 = vld [vmem:[%s8065_s25 + $0x20] sm:$0xff]  }
 0x3db   :  { %v503_v40 = vsel %vm9722_vm11, 0.0, %v7469_v38  ;;  %v502_v41 = vsel %vm9722_vm11, 0.0, %v7468_v39  ;;  %v7700_v39 = vld [vmem:[%s8065_s25 + $0x28] sm:$0xff]   ;;  %s7921_s25 = smov 31  }
 0x3dc   :  { %v5650_v44 = vpack.c.bf16 %v503_v40, %v502_v41  ;;  %v7472_v46 = vpop.permute.xlu0 %7471  ;;  %v7477_v27 = vpop.permute.xlu1 %7476  ;;  %v199_v40 = vld [vmem:[%s8106_s6 + $0x70] sm:$0xff]  ;;  %v200_v41 = vld [vmem:[%s8106_s6 + $0x78] sm:$0xff]  ;;  %s9268_s30 = sld [smem:[%s9701_s0 + %s7921_s25]]   ;;  %s7928_s25 = smov 38  }
 0x3dd   :  { %v7474_v50 = vunpack.i.h.bf16 %v7472_v46  ;;  %v7473_v51 = vunpack.i.l.bf16 %v7472_v46  ;;  %v7479_v59 = vunpack.i.h.bf16 %v7477_v27  ;;  %v7478_v60 = vunpack.i.l.bf16 %v7477_v27  ;;  %s9273_s6 = sld [smem:[%s9701_s0 + %s7922_s1]]   ;;  %s7929_s1 = smov 12  }
 0x3de   :  { %6351 = vmatprep.subr.msk.bf16.mxu1 %vm8186_vm15, %v5650_v44 }
 0x3df   :  { %v505_v52 = vsel %vm9722_vm11, 0.0, %v7474_v50  ;;  %v504_v53 = vsel %vm9722_vm11, 0.0, %v7473_v51  ;;  %6352 = vmatpush3.bf16.msk.msra.mxu1 %vm8186_vm15, %v5650_v44  ;;  %v706_v2 = vsel %vm9721_vm5, %v7479_v59, 0.0  ;;  %v705_v4 = vsel %vm9721_vm5, %v7478_v60, 0.0 }
 0x3e0   :  { %v5653_v28 = vpack.c.bf16 %v505_v52, %v504_v53  ;;  %v7482_v7 = vpop.permute.xlu0 %7481  ;;  %v5672_v15 = vpack.c.bf16 %v706_v2, %v705_v4  ;;  %v8261_v44 = vpack.c.bf16 %v200_v41, %v199_v40  ;;  %vm1420_vm11 = vcmp.lt.s32.totalorder %v8173_v35, 17 }
 0x3e1   :  { %v7484_v16 = vunpack.i.h.bf16 %v7482_v7  ;;  %v7483_v19 = vunpack.i.l.bf16 %v7482_v7 }
 0x3e2   :  { %6353 = vmatprep.subr.msk.bf16.mxu1 %vm8186_vm15, %v5653_v28  ;;  %9770 = vst [vmem:[#allocation11_spill] sm:$0xff] %v8261_v44  ;;  %7072 = vmatprep.subr.bf16.mxu0 %v8261_v44 }
 0x3e3   :  { %6354 = vmatpush3.bf16.msk.msra.mxu1 %vm8186_vm15, %v5653_v28  ;;  %v708_v33 = vsel %vm9721_vm5, %v7484_v16, 0.0  ;;  %v707_v34 = vsel %vm9721_vm5, %v7483_v19, 0.0  ;;  %7074 = vmatpush3.bf16.msra.mxu0 %v8261_v44  ;;  %vm1419_vm5 = vcmp.ge.s32.totalorder %v8173_v35, 4294967295 }
 0x3e4   :  { %6359 = vmatprep.subr.bf16.mxu1 %v612_v55  ;;  %v5675_v38 = vpack.c.bf16 %v708_v33, %v707_v34 }
 0x3e6   :  { %6356 = vmatmul.mubr.msk.bf16.vlgmr.msra.gmra.mrb[8].mxu1 %vm9720_vm1, %v7696_v56 }
 0x3e7   :  { %6360 = vmatpush3.bf16.msra.mxu1 %v612_v55  ;;  %6363 = vmatprep.mubr.msk.bf16.mxu1 %vm9720_vm1, %v7697_v62 }
 0x3e8   :  { %6361 = vmatprep.subr.bf16.mxu1 %v613_v63 }
 0x3eb   :  { %6362 = vmatpush3.bf16.msra.mxu1 %v613_v63 }
 0x3ec   :  { %6367 = vmatprep.subr.msk.bf16.mxu1 %vm8225_vm9, %v5672_v15 }
 0x3ed   :  { %v586_v46 = vpop.permute.xlu1 %585 }
 0x3f1   :  { %v596_v50 = vpop.permute.xlu1 %595  ;;  %v591_v53 = vpop.permute.xlu0 %590 }
 0x3f2   :  { %6364 = vmatmul.mubr.msk.bf16.vlgmr.msra.gmra.mrb[8].mxu1 %vm9720_vm1, %v7698_v21 }
 0x3f3   :  { %6368 = vmatpush3.bf16.msk.msra.mxu1 %vm8225_vm9, %v5672_v15  ;;  %6371 = vmatprep.mubr.msk.bf16.mxu1 %vm9720_vm1, %v7699_v36 }
 0x3f4   :  { %6369 = vmatprep.subr.msk.bf16.mxu1 %vm8225_vm9, %v5675_v38 }
 0x3f5   :  { %v601_v55 = vpop.permute.xlu1 %600 }
 0x3f7   :  { %6370 = vmatpush3.bf16.msk.msra.mxu1 %vm8225_vm9, %v5675_v38 }
 0x3f8   :  { %7076 = vmatprep.subr.bf16.mxu1 %v8110_v58 }
 0x3fe   :  { %6372 = vmatmul.mubr.msk.bf16.vlgmr.msra.gmra.mrb[8].mxu1 %vm9720_vm1, %v7700_v39 }
 0x3ff   :  { %7078 = vmatpush3.bf16.msra.mxu1 %v8110_v58 }
 0x400   :  { %7080 = vmatprep.subr.bf16.mxu1 %v8114_v61 }
 0x403   :  { %7082 = vmatpush3.bf16.msra.mxu1 %v8114_v61 }
 0x404   :  { %7084 = vmatprep.subr.bf16.mxu1 %v8121_v1 }
 0x407   :  { %7086 = vmatpush3.bf16.msra.mxu1 %v8121_v1 }
 0x408   :  { %7088 = vmatprep.subr.bf16.mxu1 %v8127_v6 }
 0x40b   :  { %7090 = vmatpush3.bf16.msra.mxu1 %v8127_v6 }
 0x40c   :  { %7092 = vmatprep.subr.bf16.mxu1 %v8133_v12 }
 0x40f   :  { %7094 = vmatpush3.bf16.msra.mxu1 %v8133_v12 }
 0x410   :  { %7096 = vmatprep.subr.bf16.mxu1 %v8139_v18 }
 0x413   :  { %7098 = vmatpush3.bf16.msra.mxu1 %v8139_v18 }
 0x414   :  { %7100 = vmatprep.subr.bf16.mxu1 %v8145_v22 }
 0x417   :  { %7102 = vmatpush3.bf16.msra.mxu1 %v8145_v22 }
 0x418   :  { %7104 = vmatprep.subr.bf16.mxu1 %v8261_v44 }
 0x41b   :  { %7106 = vmatpush3.bf16.msra.mxu1 %v8261_v44 }
 0x4d1   :  { %v6373_v51 = vpop.f32.mrb[8].mxu1 }
 0x4d2   :  { %v771_v52 = vpop.f32.mrb[9].mxu1  ;;  %v8269_v28 = vadd.f32 %v6373_v51, %v596_v50 }
 0x4d3   :  { %v8267_v10 = vadd.f32 %v771_v52, %v586_v46  ;;  %v6374_v27 = vpop.f32.mrb[10].mxu1 }
 0x4d4   :  { %v774_v56 = vpop.f32.mrb[11].mxu1  ;;  %v8276_v60 = vadd.f32 %v6374_v27, %v601_v55  ;;  %v877_v63 = vmul.f32 %v8269_v28, %v8269_v28 }
 0x4d5   :  { %v8271_v57 = vadd.f32 %v774_v56, %v591_v53  ;;  %6407 = vmatprep.mubr.f32.mxu0 %v8267_v10  ;;  %v875_v59 = vmul.f32 %v8267_v10, %v8267_v10 }
 0x4d6   :  { %v878_v2 = vmul.f32 %v8276_v60, %v8276_v60 }
 0x4d7   :  { %v876_v62 = vmul.f32 %v8271_v57, %v8271_v57  ;;  %6408 = vmatmul.mubr.f32.vlgmr.msra.gmra.mrb[4].mxu0 %v8271_v57  ;;  %6445 = vmatprep.mubr.f32.mxu1 %v875_v59 }
 0x4d8   :  { %6410 = vmatprep.mubr.f32.mxu0 %v8269_v28 }
 0x4d9   :  { %6446 = vmatmul.mubr.f32.vlgmr.msra.gmra.mrb[12].mxu1 %v876_v62 }
 0x4da   :  { %6448 = vmatprep.mubr.f32.mxu1 %v877_v63 }
 0x4db   :  { %6411 = vmatmul.mubr.f32.gmra.mrb[6].mxu0 %v8276_v60 }
 0x4dd   :  { %6449 = vmatmul.mubr.f32.gmra.mrb[14].mxu1 %v878_v2  ;;  %v977_v2 = vld [vmem:[%s5607_s13 + $0x8] sm:$0xff] }
 0x5aa   :  { %v6409_v4 = vpop.f32.mrb[4].mxu0 }
 0x5ab   :  { %v965_v7 = vmul.f32 %v6409_v4, %v6409_v4  ;;  %v856_v15 = vpop.f32.mrb[5].mxu0 }
 0x5ac   :  { %v964_v16 = vmul.f32 %v856_v15, %v856_v15  ;;  %v6447_v19 = vpop.f32.mrb[12].mxu1 }
 0x5ad   :  { %v969_v21 = vsub.f32 %v6447_v19, %v965_v7  ;;  %v945_v33 = vpop.f32.mrb[13].mxu1  ;;  %v976_v7 = vld [vmem:[%s5607_s13] sm:$0xff] }
 0x5ae   :  { %v968_v34 = vsub.f32 %v945_v33, %v964_v16  ;;  %v6412_v36 = vpop.f32.mrb[6].mxu0 }
 0x5af   :  { %v973_v38 = vmax.f32 %v969_v21, 0.0  ;;  %v967_v39 = vmul.f32 %v6412_v36, %v6412_v36  ;;  %v866_v40 = vpop.f32.mrb[7].mxu0 }
 0x5b0   :  { %v972_v41 = vmax.f32 %v968_v34, 0.0  ;;  %v966_v46 = vmul.f32 %v866_v40, %v866_v40  ;;  %v6450_v50 = vpop.f32.mrb[14].mxu1  ;;  %v993_v34 = vld [vmem:[%s5608_s17 + $0x8] sm:$0xff] }
 0x5b1   :  { %v981_v51 = vadd.f32 1e-05, %v973_v38  ;;  %v971_v52 = vsub.f32 %v6450_v50, %v967_v39  ;;  %v955_v53 = vpop.f32.mrb[15].mxu1  ;;  %v979_v38 = vld [vmem:[%s5607_s13 + $0x18] sm:$0xff] }
 0x5b2   :  { %v980_v27 = vadd.f32 1e-05, %v972_v41  ;;  %v970_v55 = vsub.f32 %v955_v53, %v966_v46  ;;  %v992_v41 = vld [vmem:[%s5608_s17] sm:$0xff]  ;;  %v978_v46 = vld [vmem:[%s5607_s13 + $0x10] sm:$0xff]  ;;  %s8363_s13 = sld [smem:[%s9701_s0 + %s7907_s10]]   ;;  %s7917_s10 = smov 22  }
 0x5b3   :  { %7779 = vrsqrt.f32 %v981_v51  ;;  %v975_v56 = vmax.f32 %v971_v52, 0.0 }
 0x5b4   :  { %7781 = vrsqrt.f32 %v980_v27  ;;  %v974_v59 = vmax.f32 %v970_v55, 0.0 }
 0x5b5   :  { %v983_v62 = vadd.f32 1e-05, %v975_v56 }
 0x5b6   :  { %v982_v63 = vadd.f32 1e-05, %v974_v59 }
 0x5b7   :  { %7783 = vrsqrt.f32 %v983_v62 }
 0x5b8   :  { %7785 = vrsqrt.f32 %v982_v63  ;;  %v994_v63 = vld [vmem:[%s5608_s17 + $0x10] sm:$0xff] }
 0x5bd   :  { %v7780_v16 = vpop.eup %7779 }
 0x5be   :  { %v7782_v19 = vpop.eup %7781  ;;  %v989_v21 = vmul.f32 %v7780_v16, %v977_v2  ;;  %v1058_v16 = vld [vmem:[%s5624_s22 + $0x10] sm:$0xff] }
 0x5bf   :  { %v988_v33 = vmul.f32 %v7782_v19, %v976_v7  ;;  %v1059_v7 = vld [vmem:[%s5624_s22 + $0x18] sm:$0xff]  ;;  %v8309_v19 = vld [vmem:[%s5626_s28 + $0x8] sm:$0xff] }
 0x5c0   :  { %1011 = vperm.xlu1 %7485, %v989_v21   ;;  %v997_v39 = vmul.f32 %v6409_v4, %v989_v21  ;;  %v995_v4 = vld [vmem:[%s5608_s17 + $0x18] sm:$0xff]  ;;  %v8311_v21 = vld [vmem:[%s5626_s28] sm:$0xff]  ;;  %s8393_s17 = sld [smem:[%s9701_s0 + %s7908_s14]]   ;;  %s7918_s14 = smov 24  }
 0x5c1   :  { %v7784_v50 = vpop.eup %7783  ;;  %1006 = vperm.xlu0 %7486, %v988_v33   ;;  %v996_v51 = vmul.f32 %v988_v33, %v856_v15  ;;  %v7701_v33 = vld [vmem:[%s8302_s4] sm:$0xff]  }
 0x5c2   :  { %v7786_v52 = vpop.eup %7785  ;;  %v1001_v53 = vsub.f32 %v993_v34, %v997_v39  ;;  %v991_v27 = vmul.f32 %v7784_v50, %v979_v38  ;;  %v7702_v34 = vld [vmem:[%s8307_s8] sm:$0xff]   ;;  %6455 = vmatprep.mubr.msk.bf16.mxu0 %vm9720_vm1, %v7701_v33  ;;  %v1063_v38 = vmax.f32 %v1059_v7, 0.0  ;;  %v1062_v39 = vmax.f32 %v1058_v16, 0.0  ;;  %v8319_v50 = vld [vmem:[%s5626_s28 + $0x18] sm:$0xff] }
 0x5c3   :  { %v1000_v55 = vsub.f32 %v992_v41, %v996_v51  ;;  %v990_v56 = vmul.f32 %v7786_v52, %v978_v46  ;;  %6487 = vmatprep.mubr.msk.bf16.mxu1 %vm9720_vm1, %v7702_v34  ;;  %v8321_v51 = vld [vmem:[%s5626_s28 + $0x10] sm:$0xff]  ;;  %v1517_v9 = vmax.f32 %v8319_v50, 0.0 }
 0x5c4   :  { %1035 = vperm.xlu1 %7485, %v1001_v53   ;;  %v999_v59 = vmul.f32 %v6412_v36, %v991_v27  ;;  %v1057_v36 = vld [vmem:[%s5624_s22 + $0x8] sm:$0xff]  ;;  %v7492_v52 = vpack.i.bf16 %v1063_v38, %v1062_v39  ;;  %v1516_v45 = vmax.f32 %v8321_v51, 0.0 }
 0x5c5   :  { %1030 = vperm.xlu0 %7486, %v1000_v55   ;;  %v998_v62 = vmul.f32 %v990_v56, %v866_v40  ;;  %v1056_v40 = vld [vmem:[%s5624_s22] sm:$0xff]  ;;  %v1061_v41 = vmax.f32 %v1057_v36, 0.0  ;;  %s7911_s22 = smov 124  }
 0x5c6   :  { %v1003_v2 = vsub.f32 %v995_v4, %v999_v59  ;;  %v1060_v46 = vmax.f32 %v1056_v40, 0.0 }
 0x5c7   :  { %v1002_v15 = vsub.f32 %v994_v63, %v998_v62 }
 0x5c8   :  { %1021 = vperm.xlu1 %7485, %v991_v27   ;;  %v7487_v53 = vpack.i.bf16 %v1061_v41, %v1060_v46 }
 0x5c9   :  { %1016 = vperm.xlu0 %7486, %v990_v56  }
 0x5cc   :  { %1045 = vperm.xlu1 %7485, %v1003_v2  }
 0x5cd   :  { %1040 = vperm.xlu0 %7486, %v1002_v15  }
 0x5d0   :  { %1077 = vperm.xlu1 %7485, %v1057_v36  }
 0x5d1   :  { %1072 = vperm.xlu0 %7486, %v1056_v40  }
 0x5d4   :  { %1087 = vperm.xlu1 %7485, %v1059_v7  }
 0x5d5   :  { %1082 = vperm.xlu0 %7486, %v1058_v16  }
 0x5d8   :  { %1529 = vperm.xlu1 %7485, %v8309_v19  }
 0x5d9   :  { %1524 = vperm.xlu0 %7486, %v8311_v21  }
 0x5dc   :  { %1539 = vperm.xlu1 %7485, %v8319_v50  }
 0x5dd   :  { %1534 = vperm.xlu0 %7486, %v8321_v51   ;;  %v7522_v51 = vpack.i.bf16 %v1517_v9, %v1516_v45  ;;  %v9775_v9 = vmov 0  }
 0x5e0   :  { %7493 = vperm.xlu1 %7485, %v7492_v52   ;;  %v7704_v52 = vld [vmem:[%s8307_s8 + $0x8] sm:$0xff]   ;;  %s8912_s8 = sld [smem:[%s9701_s0 + %s7916_s5]]  }
 0x5e1   :  { %7488 = vperm.xlu0 %7486, %v7487_v53  }
 0x63f   :  { %v1012_v27 = vpop.permute.xlu1 %1011 }
 0x640   :  { %v1007_v55 = vpop.permute.xlu0 %1006  ;;  %v1025_v56 = vmul.f32 %v8271_v57, %v1012_v27 }
 0x641   :  { %v1024_v59 = vmul.f32 %v8267_v10, %v1007_v55 }
 0x643   :  { %v1036_v62 = vpop.permute.xlu1 %1035 }
 0x644   :  { %v1049_v4 = vadd.f32 %v1036_v62, %v1025_v56  ;;  %v1031_v63 = vpop.permute.xlu0 %1030 }
 0x645   :  { %v1048_v2 = vadd.f32 %v1031_v63, %v1024_v59 }
 0x646   :  { %v8327_v15 = vmax.f32 %v1049_v4, 0.0 }
 0x647   :  { %v8329_v36 = vmax.f32 %v1048_v2, 0.0  ;;  %v1022_v40 = vpop.permute.xlu1 %1021 }
 0x648   :  { %9771 = vst [vmem:[#allocation12_spill] sm:$0xff] %v8327_v15  ;;  %v1017_v7 = vpop.permute.xlu0 %1016  ;;  %v1027_v33 = vmul.f32 %v8276_v60, %v1022_v40 }
 0x649   :  { %9772 = vst [vmem:[#allocation13_spill] sm:$0xff] %v8329_v36  ;;  %v8333_v16 = vpack.c.bf16 %v8327_v15, %v8329_v36  ;;  %v1026_v10 = vmul.f32 %v8269_v28, %v1017_v7  ;;  %v7703_v28 = vld [vmem:[%s8302_s4 + $0x8] sm:$0xff]   ;;  %s8862_s4 = sld [smem:[%s9701_s0 + %s7915_s29]]  }
 0x64b   :  { %6451 = vmatprep.subr.bf16.mxu0 %v8333_v16  ;;  %6483 = vmatprep.subr.bf16.mxu1 %v8333_v16  ;;  %v1046_v57 = vpop.permute.xlu1 %1045 }
 0x64c   :  { %v1051_v34 = vadd.f32 %v1046_v57, %v1027_v33  ;;  %6452 = vmatpush3.bf16.msra.mxu0 %v8333_v16  ;;  %6484 = vmatpush3.bf16.msra.mxu1 %v8333_v16  ;;  %v1041_v38 = vpop.permute.xlu0 %1040 }
 0x64d   :  { %v1050_v39 = vadd.f32 %v1041_v38, %v1026_v10 }
 0x64e   :  { %v8341_v41 = vmax.f32 %v1051_v34, 0.0 }
 0x64f   :  { %v8343_v46 = vmax.f32 %v1050_v39, 0.0  ;;  %v1078_v53 = vpop.permute.xlu1 %1077 }
 0x650   :  { %9773 = vst [vmem:[#allocation14_spill] sm:$0xff] %v8341_v41  ;;  %v1073_v27 = vpop.permute.xlu0 %1072 }
 0x651   :  { %9774 = vst [vmem:[#allocation15_spill] sm:$0xff] %v8343_v46  ;;  %v8347_v60 = vpack.c.bf16 %v8341_v41, %v8343_v46 }
 0x653   :  { %6453 = vmatprep.subr.bf16.mxu0 %v8347_v60  ;;  %6485 = vmatprep.subr.bf16.mxu1 %v8347_v60  ;;  %v1088_v55 = vpop.permute.xlu1 %1087 }
 0x654   :  { %6454 = vmatpush3.bf16.msra.mxu0 %v8347_v60  ;;  %6486 = vmatpush3.bf16.msra.mxu1 %v8347_v60  ;;  %v1083_v56 = vpop.permute.xlu0 %1082 }
 0x657   :  { %6456 = vmatmul.mubr.msk.bf16.vlgmr.msra.gmra.mrb[8].mxu0 %vm9720_vm1, %v7703_v28  ;;  %6488 = vmatmul.mubr.msk.bf16.vlgmr.msra.gmra.mrb[16].mxu1 %vm9720_vm1, %v7704_v52  ;;  %v1530_v59 = vpop.permute.xlu1 %1529  ;;  %v1515_v52 = vmax.f32 %v8309_v19, 0.0 }
 0x658   :  { %v1525_v62 = vpop.permute.xlu0 %1524 }
 0x65b   :  { %v1540_v4 = vpop.permute.xlu1 %1539 }
 0x65c   :  { %v1535_v63 = vpop.permute.xlu0 %1534 }
 0x65f   :  { %v8417_v45 = vpop.permute.xlu1 %7493 }
 0x72a   :  { %v6457_v2 = vpop.f32.mrb[8].mxu0  ;;  %v6489_v40 = vpop.f32.mrb[16].mxu1 }
 0x72b   :  { %v1149_v7 = vadd.f32 %v6457_v2, %v1083_v56  ;;  %v1601_v33 = vadd.f32 %v6489_v40, %v1535_v63  ;;  %v1140_v10 = vpop.f32.mrb[9].mxu0  ;;  %v1592_v57 = vpop.f32.mrb[17].mxu1 }
 0x72c   :  { %v1141_v34 = vadd.f32 %v1140_v10, %v1073_v27  ;;  %v1593_v38 = vadd.f32 %v1592_v57, %v1525_v62  ;;  %v6458_v39 = vpop.f32.mrb[10].mxu0  ;;  %v6490_v28 = vpop.f32.mrb[18].mxu1 }
 0x72d   :  { %v1152_v48 = vadd.f32 %v6458_v39, %v1088_v55  ;;  %v1604_v30 = vadd.f32 %v6490_v28, %v1540_v4  ;;  %v1143_v47 = vpop.f32.mrb[11].mxu0  ;;  %v1595_v54 = vpop.f32.mrb[19].mxu1  ;;  %v1157_v56 = vmax.f32 %v1149_v7, 0.0  ;;  %v1609_v63 = vmax.f32 %v1601_v33, 0.0 }
 0x72e   :  { %v1144_v43 = vadd.f32 %v1143_v47, %v1078_v53  ;;  %v1596_v29 = vadd.f32 %v1595_v54, %v1530_v59  ;;  %v1155_v27 = vmax.f32 %v1141_v34, 0.0  ;;  %v1607_v62 = vmax.f32 %v1593_v38, 0.0  ;;  %v7705_v53 = vld [vmem:[%s8363_s13] sm:$0xff]   ;;  %v8420_v7 = vpop.permute.xlu0 %7488 }
 0x72f   :  { %v1158_v2 = vmax.f32 %v1152_v48, 0.0  ;;  %v1610_v40 = vmax.f32 %v1604_v30, 0.0  ;;  %v1514_v48 = vmax.f32 %v8311_v21, 0.0  ;;  %6463 = vmatprep.mubr.msk.bf16.mxu0 %vm9720_vm1, %v7705_v53  ;;  %v7527_v21 = vpack.i.bf16 %v8327_v15, %v8329_v36 }
 0x730   :  { %v1156_v10 = vmax.f32 %v1144_v43, 0.0  ;;  %v1608_v57 = vmax.f32 %v1596_v29, 0.0  ;;  %v7542_v59 = vpack.i.bf16 %v8341_v41, %v8343_v46  ;;  %v7491_v35 = vunpack.i.h.bf16 %v8420_v7 }
 0x731   :  { %v7502_v24 = vpack.i.bf16 %v1158_v2, %v1157_v56  ;;  %v7537_v19 = vpack.i.bf16 %v1610_v40, %v1609_v63  ;;  %v8370_v29 = vpack.c.bf16 %v1158_v2, %v1157_v56  ;;  %v8374_v54 = vpack.c.bf16 %v1610_v40, %v1609_v63 }
 0x732   :  { %v7497_v50 = vpack.i.bf16 %v1156_v10, %v1155_v27  ;;  %v7532_v47 = vpack.i.bf16 %v1608_v57, %v1607_v62  ;;  %v8368_v30 = vpack.c.bf16 %v1156_v10, %v1155_v27  ;;  %v8372_v43 = vpack.c.bf16 %v1608_v57, %v1607_v62  ;;  %v7706_v27 = vld [vmem:[%s8363_s13 + $0x8] sm:$0xff]  }
 0x733   :  { %7503 = vrot.lane.b32.xlu1 %v7502_v24, %s7897_s26  ;;  %v7517_v55 = vpack.i.bf16 %v1515_v52, %v1514_v48  ;;  %v7490_v56 = vunpack.i.l.bf16 %v8420_v7 }
 0x734   :  { %7498 = vrot.lane.b32.xlu0 %v7497_v50, %s7897_s26 }
 0x737   :  { %7508 = vrot.lane.b32.xlu1 %v7502_v24, %s7898_s27  ;;  %v7710_v24 = vld [vmem:[%s8393_s17] sm:$0xff]  }
 0x738   :  { %7513 = vrot.lane.b32.xlu0 %v7497_v50, %s7898_s27  ;;  %6495 = vmatprep.mubr.msk.bf16.mxu1 %vm9720_vm1, %v7710_v24  ;;  %vm1195_vm1 = vmand %vm1191_vm0, %vm1194_vm2  ;;  %v7495_v50 = vunpack.i.l.bf16 %v8417_v45 }
 0x739   :  { %v1196_v4 = vsel %vm1195_vm1, 1, %v9775_v9  ;;  %vm8433_vm0 = vmand %vm1419_vm5, %vm1420_vm11  ;;  %vm9780_vm1 = vcmask 7168  }
 0x73a   :  { %v1200_v33 = vrot.slane %v1196_v4, %v8042_v13  ;;  %vm9781_vm2 = vmmov %vm9780_vm1 }
 0x73b   :  { %7523 = vperm.xlu1 %7485, %v7522_v51   ;;  %vm9784_vm11 = vmmov %vm9780_vm1 }
 0x73c   :  { %7518 = vperm.xlu0 %7486, %v7517_v55   ;;  %vm8441_vm4 = vcmp.eq.s32.totalorder %v1200_v33, 1  ;;  %vm9785_vm5 = vmmov %vm9780_vm1 }
 0x73d   :  { %vm1422_vm14 = vmand %vm8429_vm10, %vm8433_vm0  ;;  %vm1655_vm10 = vcmp.ge.s32.totalorder %v1619_v31, 4294967295  ;;  %vm1656_vm0 = vcmp.lt.s32.totalorder %v1619_v31, 17 }
 0x73e   :  { %v1423_v37 = vsel %vm1422_vm14, 1, %v9775_v9 }
 0x73f   :  { %7528 = vrot.lane.b32.xlu1 %v7527_v21, %s7888_s3  ;;  %v1427_v52 = vrot.slane %v1423_v37, %v8042_v13 }
 0x740   :  { %7533 = vrot.lane.b32.xlu0 %v7532_v47, %s7900_s2 }
 0x743   :  { %7543 = vrot.lane.b32.xlu1 %v7542_v59, %s7888_s3  ;;  %s7910_s3 = smov 21  }
 0x744   :  { %7538 = vrot.lane.b32.xlu0 %v7537_v19, %s7900_s2  ;;  %s8405_s21 = sld [smem:[%s9701_s0 + %s7910_s3]]  }
 0x745   :  { %s9006_s3 = sld [smem:[%s9701_s0 + %s7918_s14]]   ;;  %s7932_s14 = smov 14  }
 0x746   :  { %s9441_s2 = sld [smem:[%s9701_s0 + %s7925_s16]]  }
 0x747   :  { %7548 = vrot.lane.b32.xlu1 %v7527_v21, %s7895_s18 }
 0x748   :  { %7553 = vrot.lane.b32.xlu0 %v7537_v19, %s7895_s18 }
 0x74b   :  { %7558 = vrot.lane.b32.xlu1 %v7527_v21, %s7898_s27 }
 0x74c   :  { %7563 = vrot.lane.b32.xlu0 %v7532_v47, %s7895_s18 }
 0x74f   :  { %7573 = vrot.lane.b32.xlu1 %v7527_v21, %s7909_s19 }
 0x750   :  { %7568 = vrot.lane.b32.xlu0 %v7542_v59, %s7895_s18 }
 0x753   :  { %7583 = vrot.lane.b32.xlu1 %v7542_v59, %s7909_s19 }
 0x754   :  { %7578 = vrot.lane.b32.xlu0 %v7542_v59, %s7898_s27 }
 0x757   :  { %7593 = vrot.lane.b32.xlu1 %v7542_v59, %s7897_s26 }
 0x758   :  { %7588 = vrot.lane.b32.xlu0 %v7527_v21, %s7897_s26 }
 0x75b   :  { %7603 = vrot.lane.b32.xlu1 %v7537_v19, %s7909_s19 }
 0x75c   :  { %7598 = vrot.lane.b32.xlu0 %v7532_v47, %s7909_s19 }
 0x75f   :  { %7613 = vrot.lane.b32.xlu1 %v7537_v19, %s7911_s22  ;;  %v7496_v19 = vunpack.i.h.bf16 %v8417_v45 }
 0x760   :  { %7608 = vrot.lane.b32.xlu0 %v7532_v47, %s7911_s22  ;;  %s7920_s22 = smov 30  }
 0x761   :  { %s9207_s24 = sld [smem:[%s9701_s0 + %s7920_s22]]   ;;  %s7934_s22 = smov 16  }
 0x763   :  { %7623 = vrot.lane.b32.xlu1 %v7542_v59, %s7912_s23  ;;  %v1785_v59 = vadd.s32 4294967294, %v8157_v25 }
 0x764   :  { %7618 = vrot.lane.b32.xlu0 %v7527_v21, %s7912_s23  ;;  %s5634_s23 = sld [smem:[%s9701_s0 + %s7926_s20]]  }
 0x7a5   :  { %v7504_v34 = vpop.permute.xlu1 %7503 }
 0x7a6   :  { %v7506_v38 = vunpack.i.h.bf16 %v7504_v34  ;;  %v7505_v39 = vunpack.i.l.bf16 %v7504_v34  ;;  %v7499_v28 = vpop.permute.xlu0 %7498 }
 0x7a7   :  { %v7501_v63 = vunpack.i.h.bf16 %v7499_v28  ;;  %v7500_v2 = vunpack.i.l.bf16 %v7499_v28 }
 0x7a8   :  { %v1186_v40 = vsel %vm9780_vm1, 0.0, %v7506_v38  ;;  %v1185_v49 = vsel %vm9781_vm2, 0.0, %v7505_v39  ;;  %vm1621_vm1 = vcmp.lt.s32.totalorder %v1619_v31, 16  ;;  %v2235_v38 = vadd.s32 4294967293, %v8157_v25  ;;  %v8578_v31 = vld [vmem:[%s8154_s9] sm:$0x1] }
 0x7a9   :  { %v1189_v62 = vsel %vm8175_vm12, %v1185_v49, 0.0  ;;  %v1184_v10 = vsel %vm9784_vm11, 0.0, %v7501_v63  ;;  %v1183_v57 = vsel %vm9785_vm5, 0.0, %v7500_v2  ;;  %v1190_v53 = vsel %vm8175_vm12, %v1186_v40, 0.0  ;;  %vm8493_vm5 = vmand %vm1655_vm10, %vm1656_vm0  ;;  %v7509_v2 = vpop.permute.xlu1 %7508  ;;  %s7914_s9 = smov 18  }
 0x7aa   :  { %v1188_v47 = vsel %vm8175_vm12, %v1184_v10, 0.0  ;;  %v1187_v48 = vsel %vm8175_vm12, %v1183_v57, 0.0  ;;  %v7514_v51 = vpop.permute.xlu0 %7513  ;;  %v1224_v4 = vsel %vm8441_vm4, %v7495_v50, %v1189_v62  ;;  %vm8476_vm12 = vmand %vm1620_vm13, %vm1621_vm1  ;;  %v1225_v39 = vsel %vm8441_vm4, %v7496_v19, %v1190_v53  ;;  %v7707_v57 = vld [vmem:[%s8363_s13 + $0x10] sm:$0xff]   ;;  %s8818_s28 = sld [smem:[%s9701_s0 + %s7914_s9]]   ;;  %s7935_s9 = smov 39  }
 0x7ab   :  { %v1222_v55 = vsel %vm8441_vm4, %v7490_v56, %v1187_v48  ;;  %v1223_v21 = vsel %vm8441_vm4, %v7491_v35, %v1188_v47  ;;  %v7516_v34 = vunpack.i.h.bf16 %v7514_v51  ;;  %v7515_v32 = vunpack.i.l.bf16 %v7514_v51  ;;  %vm8489_vm11 = vmxor %vm8476_vm12, %vm9727_vm3 }
 0x7ac   :  { %v1226_v24 = vpack.c.bf16 %v1223_v21, %v1222_v55  ;;  %v1227_v28 = vpack.c.bf16 %v1225_v39, %v1224_v4  ;;  %vm1786_vm2 = vcmp.ge.s32.totalorder %v1785_v59, 0  ;;  %vm1787_vm13 = vcmp.lt.s32.totalorder %v1785_v59, 16  ;;  %vm9807_vm15 = vmand %vm8489_vm11, %vm8493_vm5 }
 0x7ad   :  { %vm9792_vm4 = vcmask 1039360   ;;  %vm2236_vm1 = vcmp.ge.s32.totalorder %v2235_v38, 0  ;;  %vm2237_vm7 = vcmp.lt.s32.totalorder %v2235_v38, 16  ;;  %vm8500_vm6 = vmand %vm1786_vm2, %vm1787_vm13  ;;  %vm8504_vm3 = vcmp.eq.s32.totalorder %v1427_v52, 1 }
 0x7ae   :  { %6459 = vmatprep.subr.bf16.mxu0 %v1226_v24  ;;  %v1411_v40 = vsel %vm9792_vm4, %v7516_v34, 0.0  ;;  %vm9793_vm14 = vmmov %vm9792_vm4  ;;  %v8514_v47 = vadd.s32 2, %v8157_v25  ;;  %vm1816_vm0 = vcmp.ge.s32.totalorder %v1785_v59, 4294967295  ;;  %vm1817_vm4 = vcmp.lt.s32.totalorder %v1785_v59, 17 }
 0x7af   :  { %6460 = vmatpush3.bf16.msra.mxu0 %v1226_v24  ;;  %v1410_v49 = vsel %vm9793_vm14, %v7515_v32, 0.0  ;;  %v7511_v48 = vunpack.i.h.bf16 %v7509_v2  ;;  %v7510_v51 = vunpack.i.l.bf16 %v7509_v2  ;;  %v1415_v53 = vsel %vm8215_vm8, %v1411_v40, 0.0  ;;  %vm2238_vm2 = vmand %vm2236_vm1, %vm2237_vm7 }
 0x7b0   :  { %6461 = vmatprep.subr.bf16.mxu0 %v1227_v28  ;;  %v1414_v55 = vsel %vm8215_vm8, %v1410_v49, 0.0  ;;  %vm9798_vm13 = vmmov 1   ;;  %vm9801_vm10 = vcmask 261120   ;;  %vm8531_vm9 = vmand %vm1816_vm0, %vm1817_vm4  ;;  %v1430_v24 = vsel %vm8504_vm3, %v7491_v35, %v1415_v53 }
 0x7b1   :  { %vm8526_vm14 = vmxor %vm8500_vm6, %vm9798_vm13  ;;  %v1429_v59 = vsel %vm8504_vm3, %v7490_v56, %v1414_v55  ;;  %v1644_v4 = vsel %vm8476_vm12, 1, %v9775_v9  ;;  %vm9805_vm1 = vcmask 1039360   ;;  %vm1983_vm0 = vcmp.ge.s32.totalorder %v8514_v47, 0 }
 0x7b2   :  { %vm9804_vm7 = vmmov %vm9801_vm10  ;;  %v1413_v37 = vsel %vm9805_vm1, %v7511_v48, 0.0  ;;  %vm1984_vm4 = vcmp.lt.s32.totalorder %v8514_v47, 16  ;;  %v1659_v7 = vsel %vm9807_vm15, 1, %v9775_v9  ;;  %v2260_v35 = vsel %vm2238_vm2, 1, %v9775_v9 }
 0x7b3   :  { %6462 = vmatpush3.bf16.msra.mxu0 %v1227_v28  ;;  %vm1819_vm12 = vmand %vm8526_vm14, %vm8531_vm9  ;;  %v1433_v33 = vpack.c.bf16 %v1430_v24, %v1429_v59  ;;  %v1805_v34 = vsel %vm8500_vm6, 1, %v9775_v9  ;;  %v1417_v32 = vsel %vm8215_vm8, %v1413_v37, 0.0  ;;  %v1648_v28 = vrot.slane %v1644_v4, %v8042_v13 }
 0x7b4   :  { %6467 = vmatprep.subr.bf16.mxu0 %v8368_v30  ;;  %vm8573_vm15 = vmand %vm1983_vm0, %vm1984_vm4  ;;  %vm2940_vm6 = vcmp.lt.s32.totalorder %v8578_v31, 14  ;;  %v1663_v63 = vrot.slane %v1659_v7, %v8042_v13  ;;  %v2264_v2 = vrot.slane %v2260_v35, %v8042_v13  ;;  %v1820_v40 = vsel %vm1819_vm12, 1, %v9775_v9 }
 0x7b5   :  { %vm2255_vm9 = vcmask 23552   ;;  %vm1639_vm11 = vcmask 31744   ;;  %v2003_v48 = vsel %vm8573_vm15, 1, %v9775_v9  ;;  %vm8600_vm5 = vcmp.eq.s32.totalorder %v1648_v28, 1 }
 0x7b6   :  { %6464 = vmatmul.mubr.msk.bf16.vlgmr.msra.gmra.mrb[12].mxu0 %vm9801_vm10, %v7706_v27  ;;  %vm9806_vm10 = vmmov %vm9805_vm1  ;;  %v7708_v27 = vld [vmem:[%s8363_s13 + $0x18] sm:$0xff]   ;;  %v1824_v45 = vrot.slane %v1820_v40, %v8042_v13  ;;  %vm8610_vm2 = vcmp.eq.s32.totalorder %v2264_v2, 1  ;;  %vm1998_vm4 = vcmask 1031168  }
 0x7b7   :  { %6468 = vmatpush3.bf16.msra.mxu0 %v8368_v30  ;;  %6471 = vmatprep.mubr.msk.bf16.mxu0 %vm9804_vm7, %v7707_v57  ;;  %v1412_v30 = vsel %vm9806_vm10, %v7510_v51, 0.0  ;;  %v1432_v57 = vsel %vm8504_vm3, %v7496_v19, %v1417_v32  ;;  %v8598_v51 = vsel %vm2940_vm6, 1, %v9775_v9  ;;  %vm9818_vm1 = vmmov %vm9804_vm7  ;;  %vm9825_vm6 = vcmask 15360  }
 0x7b8   :  { %6469 = vmatprep.subr.bf16.mxu0 %v8370_v29  ;;  %v1416_v38 = vsel %vm8215_vm8, %v1412_v30, 0.0  ;;  %v2007_v30 = vrot.slane %v2003_v48, %v8042_v13  ;;  %v2945_v7 = vrot.slane %v8598_v51, %v8042_v13  ;;  %vm8635_vm10 = vcmp.eq.s32.totalorder %v1824_v45, 1  ;;  %vm8650_vm0 = vmpackc.low %vm8610_vm2, %vm8610_vm2 }
 0x7b9   :  { %v1431_v62 = vsel %vm8504_vm3, %v7495_v50, %v1416_v38  ;;  %v7709_v50 = vld [vmem:[%s8363_s13 + $0x20] sm:$0xff]   ;;  %vm8606_vm3 = vcmp.eq.s32.totalorder %v1663_v63, 1  ;;  %vm2015_vm2 = vcmp.lt.s32.totalorder %v8514_v47, 17 }
 0x7ba   :  { %v7524_v56 = vpop.permute.xlu1 %7523  ;;  %v1434_v4 = vpack.c.bf16 %v1432_v57, %v1431_v62  ;;  %vm8670_vm12 = vcmp.eq.s32.totalorder %v2007_v30, 1 }
 0x7bb   :  { %v7519_v39 = vpop.permute.xlu0 %7518  ;;  %6470 = vmatpush3.bf16.msra.mxu0 %v8370_v29  ;;  %v1809_v29 = vrot.slane %v1805_v34, %v8042_v13  ;;  %v8654_v45 = vunpack.i.l.bf16 %v7524_v56 }
 0x7bc   :  { %6475 = vmatprep.subr.bf16.mxu0 %v1433_v33  ;;  %v8621_v35 = vunpack.i.h.bf16 %v7519_v39  ;;  %v8623_v34 = vunpack.i.l.bf16 %v7519_v39 }
 0x7bd   :  { %vm8614_vm14 = vcmp.eq.s32.totalorder %v1809_v29, 1 }
 0x7be   :  { %v7529_v49 = vpop.permute.xlu1 %7528 }
 0x7bf   :  { %v7531_v53 = vunpack.i.h.bf16 %v7529_v49  ;;  %v7530_v55 = vunpack.i.l.bf16 %v7529_v49  ;;  %v7534_v21 = vpop.permute.xlu0 %7533 }
 0x7c0   :  { %v7536_v59 = vunpack.i.h.bf16 %v7534_v21  ;;  %v7535_v10 = vunpack.i.l.bf16 %v7534_v21 }
 0x7c1   :  { %v2257_v63 = vsel %vm2255_vm9, 0.0, %v7531_v53  ;;  %v2256_v2 = vsel %vm2255_vm9, 0.0, %v7530_v55  ;;  %v8645_v53 = vunpack.i.h.bf16 %v7524_v56 }
 0x7c2   :  { %v1641_v32 = vsel %vm1639_vm11, 0.0, %v7536_v59  ;;  %v1640_v38 = vsel %vm1639_vm11, 0.0, %v7535_v10  ;;  %v7544_v28 = vpop.permute.xlu1 %7543  ;;  %6472 = vmatmul.mubr.msk.bf16.vlgmr.msra.gmra.mrb[12].mxu0 %vm9804_vm7, %v7708_v27  ;;  %v5746_v59 = vpack.c.bf16 %v2257_v63, %v2256_v2  ;;  %vm9829_vm7 = vcmask 1039360  }
 0x7c3   :  { %v1651_v40 = vsel %vm8600_vm5, %v1641_v32, 0.0  ;;  %v1650_v29 = vsel %vm8600_vm5, %v1640_v38, 0.0  ;;  %6476 = vmatpush3.bf16.msra.mxu0 %v1433_v33  ;;  %v7539_v39 = vpop.permute.xlu0 %7538  ;;  %6479 = vmatprep.mubr.msk.bf16.mxu0 %vm9818_vm1, %v7709_v50  ;;  %v7546_v33 = vunpack.i.h.bf16 %v7544_v28  ;;  %v7545_v55 = vunpack.i.l.bf16 %v7544_v28 }
 0x7c4   :  { %v7541_v62 = vunpack.i.h.bf16 %v7539_v39  ;;  %v7540_v27 = vunpack.i.l.bf16 %v7539_v39  ;;  %6477 = vmatprep.subr.bf16.mxu0 %v1434_v4  ;;  %v1685_v57 = vsel %vm8606_vm3, %v8623_v34, %v1650_v29  ;;  %v1686_v48 = vsel %vm8606_vm3, %v8621_v35, %v1651_v40 }
 0x7c5   :  { %v1689_v21 = vpack.c.bf16 %v1686_v48, %v1685_v57  ;;  %v8677_v48 = vadd.s32 4, %v8578_v31 }
 0x7c6   :  { %v1643_v10 = vsel %vm1639_vm11, 0.0, %v7541_v62  ;;  %v1642_v32 = vsel %vm1639_vm11, 0.0, %v7540_v27  ;;  %v7549_v38 = vpop.permute.xlu1 %7548  ;;  %v2259_v62 = vsel %vm2255_vm9, 0.0, %v7546_v33  ;;  %v2258_v27 = vsel %vm2255_vm9, 0.0, %v7545_v55  ;;  %vm9826_vm11 = vmmov %vm9825_vm6 }
 0x7c7   :  { %v1653_v40 = vsel %vm8600_vm5, %v1643_v10, 0.0  ;;  %v1652_v28 = vsel %vm8600_vm5, %v1642_v32, 0.0  ;;  %v7551_v24 = vunpack.i.h.bf16 %v7549_v38  ;;  %v7550_v29 = vunpack.i.l.bf16 %v7549_v38  ;;  %6478 = vmatpush3.bf16.msra.mxu0 %v1434_v4  ;;  %v7554_v39 = vpop.permute.xlu0 %7553  ;;  %6491 = vmatprep.subr.bf16.mxu1 %v1689_v21  ;;  %vm9827_vm5 = vmmov %vm9825_vm6  ;;  %v7711_v38 = vld [vmem:[%s8363_s13 + $0x28] sm:$0xff]   ;;  %s8974_s13 = sld [smem:[%s9701_s0 + %s7917_s10]]  }
 0x7c8   :  { %v7556_v56 = vunpack.i.h.bf16 %v7554_v39  ;;  %v7555_v63 = vunpack.i.l.bf16 %v7554_v39  ;;  %6531 = vmatprep.subr.msk.bf16.mxu0 %vm8650_vm0, %v5746_v59  ;;  %6492 = vmatpush3.bf16.msra.mxu1 %v1689_v21  ;;  %v1687_v2 = vsel %vm8606_vm3, %v8654_v45, %v1652_v28  ;;  %v1688_v25 = vsel %vm8606_vm3, %v8645_v53, %v1653_v40  ;;  %vm9828_vm3 = vmmov %vm9827_vm5  ;;  %v7730_v4 = vld [vmem:[%s8405_s21 + $0x48] sm:$0xff]  }
 0x7c9   :  { %v1690_v57 = vpack.c.bf16 %v1688_v25, %v1687_v2  ;;  %v2379_v21 = vsel %vm9825_vm6, 0.0, %v7551_v24  ;;  %v2378_v10 = vsel %vm9826_vm11, 0.0, %v7550_v29  ;;  %v7712_v24 = vld [vmem:[%s8393_s17 + $0x8] sm:$0xff]   ;;  %vm2014_vm9 = vcmp.ge.s32.totalorder %v8514_v47, 4294967295  ;;  %vm9830_vm11 = vmmov %vm9828_vm3 }
 0x7ca   :  { %v1804_v19 = vsel %vm9827_vm5, 0.0, %v7556_v56  ;;  %v1803_v30 = vsel %vm9828_vm3, 0.0, %v7555_v63  ;;  %v7559_v32 = vpop.permute.xlu1 %7558  ;;  %v7713_v56 = vld [vmem:[%s8405_s21] sm:$0xff]   ;;  %v5749_v63 = vpack.c.bf16 %v2259_v62, %v2258_v27  ;;  %vm2105_vm1 = vcmp.ge.s32.totalorder %v8677_v48, 0  ;;  %vm8711_vm3 = vmxor %vm8573_vm15, %vm9798_vm13 }
 0x7cb   :  { %v1814_v33 = vsel %vm8614_vm14, %v1804_v19, 0.0  ;;  %v1813_v55 = vsel %vm8614_vm14, %v1803_v30, 0.0  ;;  %v7561_v40 = vunpack.i.h.bf16 %v7559_v32  ;;  %v7560_v28 = vunpack.i.l.bf16 %v7559_v32  ;;  %v7564_v39 = vpop.permute.xlu0 %7563  ;;  %6493 = vmatprep.subr.bf16.mxu1 %v1690_v57  ;;  %v7715_v19 = vld [vmem:[%s8393_s17 + $0x10] sm:$0xff]  }
 0x7cc   :  { %v7566_v2 = vunpack.i.h.bf16 %v7564_v39  ;;  %v7565_v29 = vunpack.i.l.bf16 %v7564_v39  ;;  %6494 = vmatpush3.bf16.msra.mxu1 %v1690_v57  ;;  %vm2106_vm6 = vcmp.lt.s32.totalorder %v8677_v48, 16  ;;  %v8698_v30 = vpack.c.bf16 %v2379_v21, %v2378_v10 }
 0x7cd   :  { %v8693_v25 = vsel %vm9829_vm7, %v7560_v28, 0.0  ;;  %vm9831_vm5 = vcmask 261120   ;;  %v1828_v57 = vsel %vm8635_vm10, %v8654_v45, %v1813_v55  ;;  %v1829_v62 = vsel %vm8635_vm10, %v8645_v53, %v1814_v33  ;;  %v1161_v33 = vld [vmem:[%s8818_s28 + $0x10] sm:$0xff] }
 0x7ce   :  { %v1802_v32 = vsel %vm9830_vm11, 0.0, %v7566_v2  ;;  %v7574_v39 = vpop.permute.xlu1 %7573  ;;  %6480 = vmatmul.mubr.msk.bf16.vlgmr.msra.gmra.mrb[12].mxu0 %vm9831_vm5, %v7711_v38  ;;  %v8716_v21 = vsel %vm9829_vm7, %v7561_v40, 0.0  ;;  %v2648_v10 = vsel %vm8215_vm8, %v8693_v25, 0.0  ;;  %v1801_v55 = vsel %vm9830_vm11, 0.0, %v7565_v29  ;;  %vm9834_vm15 = vmmov %vm9831_vm5  ;;  %v7754_v29 = vld [vmem:[%s9441_s2 + $0x28] sm:$0xff]  }
 0x7cf   :  { %v1812_v38 = vsel %vm8614_vm14, %v1802_v32, 0.0  ;;  %6532 = vmatpush3.bf16.msk.msra.mxu0 %vm8650_vm0, %v5746_v59  ;;  %v7569_v52 = vpop.permute.xlu0 %7568  ;;  %6496 = vmatmul.mubr.msk.bf16.vlgmr.msra.gmra.mrb[20].mxu1 %vm9834_vm15, %v7712_v24  ;;  %vm8730_vm5 = vcmp.eq.s32.totalorder %v2945_v7, 1  ;;  %vm8738_vm7 = vmand %vm2014_vm9, %vm2015_vm2  ;;  %v1811_v59 = vsel %vm8614_vm14, %v1801_v55, 0.0  ;;  %v7576_v28 = vunpack.i.h.bf16 %v7574_v39  ;;  %v7714_v55 = vld [vmem:[%s8405_s21 + $0x8] sm:$0xff]  }
 0x7d0   :  { %v7575_v24 = vunpack.i.l.bf16 %v7574_v39  ;;  %v7571_v2 = vunpack.i.h.bf16 %v7569_v52  ;;  %6533 = vmatprep.subr.msk.bf16.mxu0 %vm8650_vm0, %v5749_v63  ;;  %vm9839_vm11 = vmmov %vm9834_vm15  ;;  %v7570_v51 = vunpack.i.l.bf16 %v7569_v52  ;;  %v1826_v47 = vsel %vm8635_vm10, %v8623_v34, %v1811_v59 }
 0x7d1   :  { %6535 = vmatprep.mubr.msk.bf16.mxu0 %vm9839_vm11, %v7713_v56  ;;  %v1827_v7 = vsel %vm8635_vm10, %v8621_v35, %v1812_v38  ;;  %vm8756_vm9 = vmpackc.low %vm8614_vm14, %vm8614_vm14  ;;  %v1831_v32 = vpack.c.bf16 %v1829_v62, %v1828_v57  ;;  %v2649_v56 = vsel %vm8215_vm8, %v8716_v21, 0.0  ;;  %v8765_v39 = vsel %vm1998_vm4, %v7576_v28, 0.0  ;;  %v7717_v28 = vld [vmem:[%s8405_s21 + $0x10] sm:$0xff]  }
 0x7d2   :  { %vm9842_vm2 = vmmov %vm9839_vm11  ;;  %v8768_v49 = vsel %vm1998_vm4, %v7575_v24, 0.0  ;;  %v7584_v37 = vpop.permute.xlu1 %7583  ;;  %v1830_v38 = vpack.c.bf16 %v1827_v7, %v1826_v47  ;;  %vm9843_vm10 = vcmask 15360   ;;  %v2745_v24 = vsel %vm8670_vm12, %v8765_v39, 0.0 }
 0x7d3   :  { %6503 = vmatprep.mubr.msk.bf16.mxu1 %vm9842_vm2, %v7715_v19  ;;  %vm2017_vm14 = vmand %vm8711_vm3, %vm8738_vm7  ;;  %v2932_v19 = vmax.f32 %v8329_v36, %v2648_v10  ;;  %v2744_v57 = vsel %vm8670_vm12, %v8768_v49, 0.0  ;;  %v2381_v62 = vsel %vm9843_vm10, 0.0, %v7571_v2  ;;  %6534 = vmatpush3.bf16.msk.msra.mxu0 %vm8650_vm0, %v5749_v63  ;;  %v7579_v59 = vpop.permute.xlu0 %7578  ;;  %v7586_v47 = vunpack.i.h.bf16 %v7584_v37 }
 0x7d4   :  { %vm9844_vm15 = vmmov %vm9843_vm10  ;;  %v7585_v7 = vunpack.i.l.bf16 %v7584_v37  ;;  %v7581_v10 = vunpack.i.h.bf16 %v7579_v59  ;;  %6499 = vmatprep.subr.bf16.mxu1 %v1830_v38  ;;  %6539 = vmatprep.subr.msk.bf16.mxu0 %vm8756_vm9, %v8698_v30  ;;  %v2933_v2 = vmax.f32 %v8327_v15, %v2649_v56  ;;  %v8805_v63 = vsel %vm2017_vm14, 1, %v9775_v9 }
 0x7d5   :  { %v2380_v52 = vsel %vm9844_vm15, 0.0, %v7570_v51  ;;  %v7580_v51 = vunpack.i.l.bf16 %v7579_v59  ;;  %6500 = vmatpush3.bf16.msra.mxu1 %v1830_v38  ;;  %vm8795_vm0 = vmand %vm2105_vm1, %vm2106_vm6  ;;  %vm2136_vm11 = vcmp.ge.s32.totalorder %v8677_v48, 4294967295  ;;  %v8809_v37 = vsel %vm1998_vm4, %v7586_v47, 0.0  ;;  %v7716_v47 = vld [vmem:[%s8393_s17 + $0x18] sm:$0xff]  }
 0x7d6   :  { %v5763_v56 = vpack.c.bf16 %v2381_v62, %v2380_v52  ;;  %vm9847_vm2 = vcmask 1039360   ;;  %6501 = vmatprep.subr.bf16.mxu1 %v1831_v32  ;;  %v7594_v59 = vpop.permute.xlu1 %7593  ;;  %vm9848_vm1 = vcmask 261120   ;;  %v2936_v27 = vmax.f32 %v2932_v19, %v2744_v57  ;;  %vm8855_vm14 = vmxor %vm8795_vm0, %vm9798_vm13 }
 0x7d7   :  { %v8812_v38 = vsel %vm9847_vm2, %v7581_v10, 0.0  ;;  %6536 = vmatmul.mubr.msk.bf16.vlgmr.msra.gmra.mrb[16].mxu0 %vm9848_vm1, %v7714_v55  ;;  %v8821_v40 = vsel %vm1998_vm4, %v7585_v7, 0.0  ;;  %v7589_v55 = vpop.permute.xlu0 %7588  ;;  %v2937_v19 = vmax.f32 %v2933_v2, %v2745_v24  ;;  %vm9849_vm6 = vmmov %vm9848_vm1  ;;  %vm2137_vm3 = vcmp.lt.s32.totalorder %v8677_v48, 17 }
 0x7d8   :  { %v2651_v62 = vsel %vm8215_vm8, %v8812_v38, 0.0  ;;  %6540 = vmatpush3.bf16.msk.msra.mxu0 %vm8756_vm9, %v8698_v30  ;;  %6543 = vmatprep.mubr.msk.bf16.mxu0 %vm9849_vm6, %v7717_v28  ;;  %v2747_v57 = vsel %vm8670_vm12, %v8809_v37, 0.0  ;;  %vm9850_vm7 = vmmov %vm9847_vm2  ;;  %v8843_v30 = vsel %vm8795_vm0, 1, %v9775_v9  ;;  %v2022_v28 = vrot.slane %v8805_v63, %v8042_v13 }
 0x7d9   :  { %v8835_v52 = vsel %vm9850_vm7, %v7580_v51, 0.0  ;;  %6541 = vmatprep.subr.msk.bf16.mxu0 %vm8756_vm9, %v5763_v56  ;;  %v2935_v24 = vmax.f32 %v8341_v41, %v2651_v62  ;;  %v7591_v10 = vunpack.i.h.bf16 %v7589_v55  ;;  %v7590_v2 = vunpack.i.l.bf16 %v7589_v55  ;;  %6502 = vmatpush3.bf16.msra.mxu1 %v1831_v32  ;;  %v7719_v51 = vld [vmem:[%s8393_s17 + $0x20] sm:$0xff]   ;;  %vm9857_vm15 = vmmov %vm9848_vm1 }
 0x7da   :  { %v2650_v7 = vsel %vm8215_vm8, %v8835_v52, 0.0  ;;  %v2746_v0 = vsel %vm8670_vm12, %v8821_v40, 0.0  ;;  %v7596_v63 = vunpack.i.h.bf16 %v7594_v59  ;;  %v2947_v50 = vsel %vm8730_vm5, %v2936_v27, 0.0  ;;  %6507 = vmatprep.subr.bf16.mxu1 %v8372_v43  ;;  %v7604_v62 = vpop.permute.xlu1 %7603  ;;  %vm8875_vm8 = vmand %vm2136_vm11, %vm2137_vm3 }
 0x7db   :  { %v2934_v32 = vmax.f32 %v8343_v46, %v2650_v7  ;;  %v7595_v41 = vunpack.i.l.bf16 %v7594_v59  ;;  %vm9855_vm13 = vcmask 7168   ;;  %v2948_v46 = vsel %vm8730_vm5, %v2937_v19, 0.0  ;;  %v7599_v27 = vpop.permute.xlu0 %7598  ;;  %vm9858_vm0 = vmmov %vm9848_vm1  ;;  %v7721_v19 = vld [vmem:[%s8405_s21 + $0x20] sm:$0xff]  }
 0x7dc   :  { %v2475_v15 = vsel %vm9855_vm13, 0.0, %v7591_v10  ;;  %vm9856_vm10 = vmmov %vm9855_vm13  ;;  %6542 = vmatpush3.bf16.msk.msra.mxu0 %vm8756_vm9, %v5763_v56  ;;  %v7627_v22 = vpack.i.bf16 %v2948_v46, %v2947_v50  ;;  %v7606_v48 = vunpack.i.h.bf16 %v7604_v62  ;;  %v7605_v18 = vunpack.i.l.bf16 %v7604_v62  ;;  %6504 = vmatmul.mubr.msk.bf16.vlgmr.msra.gmra.mrb[20].mxu1 %vm9857_vm15, %v7716_v47  ;;  %v7718_v56 = vld [vmem:[%s8405_s21 + $0x18] sm:$0xff]  }
 0x7dd   :  { %v2474_v7 = vsel %vm9856_vm10, 0.0, %v7590_v2  ;;  %v7601_v59 = vunpack.i.h.bf16 %v7599_v27  ;;  %v7600_v10 = vunpack.i.l.bf16 %v7599_v27  ;;  %6508 = vmatpush3.bf16.msra.mxu1 %v8372_v43  ;;  %v2938_v2 = vmax.f32 %v2934_v32, %v2746_v0  ;;  %6511 = vmatprep.mubr.msk.bf16.mxu1 %vm9858_vm0, %v7719_v51  ;;  %vm2139_vm11 = vmand %vm8855_vm14, %vm8875_vm8 }
 0x7de   :  { %v5774_v44 = vpack.c.bf16 %v2475_v15, %v2474_v7  ;;  %v2939_v12 = vmax.f32 %v2935_v24, %v2747_v57  ;;  %7628 = vrot.lane.b32.xlu0 %v7627_v22, %s7897_s26  ;;  %v1159_v15 = vld [vmem:[%s8818_s28] sm:$0xff]  ;;  %6509 = vmatprep.subr.bf16.mxu1 %v8374_v54  ;;  %vm2120_vm2 = vcmask 1014784   ;;  %v2129_v46 = vrot.slane %v8843_v30, %v8042_v13  ;;  %vm9861_vm6 = vmmov %vm9856_vm10 }
 0x7df   :  { %vm8898_vm1 = vcmp.eq.s32.totalorder %v2022_v28, 1  ;;  %v2477_v57 = vsel %vm9861_vm6, 0.0, %v7596_v63  ;;  %vm9862_vm3 = vmmov %vm9861_vm6  ;;  %v2000_v24 = vsel %vm1998_vm4, %v7601_v59, 0.0  ;;  %v1999_v22 = vsel %vm1998_vm4, %v7600_v10, 0.0  ;;  %v7609_v51 = vpop.permute.xlu0 %7608 }
 0x7e0   :  { %v2476_v47 = vsel %vm9862_vm3, 0.0, %v7595_v41  ;;  %vm9863_vm7 = vnez %v9763_v42  ;;  %v2002_v30 = vsel %vm1998_vm4, %v7606_v48, 0.0  ;;  %v2001_v28 = vsel %vm1998_vm4, %v7605_v18, 0.0  ;;  %vm9864_vm13 = vmmov %vm9858_vm0 }
 0x7e1   :  { %6547 = vmatprep.subr.msk.bf16.mxu0 %vm9863_vm7, %v5774_v44  ;;  %v2009_v41 = vsel %vm8670_vm12, %v1999_v22, 0.0  ;;  %v2140_v0 = vsel %vm2139_vm11, 1, %v9775_v9  ;;  %v7611_v32 = vunpack.i.h.bf16 %v7609_v51  ;;  %v7610_v63 = vunpack.i.l.bf16 %v7609_v51  ;;  %6510 = vmatpush3.bf16.msra.mxu1 %v8374_v54  ;;  %v1611_v22 = vld [vmem:[%s8912_s8] sm:$0xff]  ;;  %v7723_v51 = vld [vmem:[%s8393_s17 + $0x30] sm:$0xff]   ;;  %vm9870_vm10 = vmmov %vm9858_vm0 }
 0x7e2   :  { %v2949_v50 = vsel %vm8730_vm5, %v2938_v2, 0.0  ;;  %v2950_v62 = vsel %vm8730_vm5, %v2939_v12, 0.0  ;;  %v5777_v18 = vpack.c.bf16 %v2477_v57, %v2476_v47  ;;  %v2010_v7 = vsel %vm8670_vm12, %v2000_v24, 0.0  ;;  %1295 = vperm.xlu0 %7486, %v1159_v15   ;;  %vm9865_vm5 = vmmov %vm9858_vm0  ;;  %v1160_v2 = vld [vmem:[%s8818_s28 + $0x8] sm:$0xff] }
 0x7e3   :  { %v7632_v36 = vpack.i.bf16 %v2950_v62, %v2949_v50  ;;  %6544 = vmatmul.mubr.msk.bf16.vlgmr.msra.gmra.mrb[16].mxu0 %vm9864_vm13, %v7718_v56  ;;  %v2012_v55 = vsel %vm8670_vm12, %v2002_v30, 0.0  ;;  %v2011_v27 = vsel %vm8670_vm12, %v2001_v28, 0.0  ;;  %v2024_v12 = vsel %vm8898_vm1, %v8623_v34, %v2009_v41  ;;  %v1162_v41 = vld [vmem:[%s8818_s28 + $0x18] sm:$0xff]  ;;  %v1613_v50 = vld [vmem:[%s8912_s8 + $0x10] sm:$0xff]  ;;  %v7722_v62 = vld [vmem:[%s8405_s21 + $0x28] sm:$0xff]   ;;  %s5637_s28 = sld [smem:[%s9701_s0 + %s7935_s9]]  }
 0x7e4   :  { %6548 = vmatpush3.bf16.msk.msra.mxu0 %vm9863_vm7, %v5774_v44  ;;  %v2144_v54 = vrot.slane %v2140_v0, %v8042_v13  ;;  %6551 = vmatprep.mubr.msk.bf16.mxu0 %vm9865_vm5, %v7721_v19  ;;  %vm8944_vm14 = vcmp.eq.s32.totalorder %v2129_v46, 1  ;;  %v2122_v59 = vsel %vm2120_vm2, %v7611_v32, 0.0  ;;  %v2121_v10 = vsel %vm2120_vm2, %v7610_v63, 0.0  ;;  %v7614_v44 = vpop.permute.xlu1 %7613  ;;  %v7720_v46 = vld [vmem:[%s8393_s17 + $0x28] sm:$0xff]   ;;  %vm9871_vm15 = vmmov %vm9858_vm0 }
 0x7e5   :  { %7633 = vrot.lane.b32.xlu1 %v7632_v36, %s7897_s26  ;;  %6549 = vmatprep.subr.msk.bf16.mxu0 %vm9863_vm7, %v5777_v18  ;;  %v2025_v15 = vsel %vm8898_vm1, %v8621_v35, %v2010_v7  ;;  %v2026_v19 = vsel %vm8898_vm1, %v8654_v45, %v2011_v27  ;;  %v2027_v57 = vsel %vm8898_vm1, %v8645_v53, %v2012_v55  ;;  %v2132_v47 = vsel %vm8944_vm14, %v2122_v59, 0.0  ;;  %v1612_v36 = vld [vmem:[%s8912_s8 + $0x8] sm:$0xff]  ;;  %vm9872_vm11 = vmmov %vm9858_vm0 }
 0x7e6   :  { %1305 = vperm.xlu0 %7486, %v1161_v33   ;;  %v2028_v56 = vpack.c.bf16 %v2025_v15, %v2024_v12  ;;  %v2131_v24 = vsel %vm8944_vm14, %v2121_v10, 0.0  ;;  %vm8976_vm8 = vcmp.eq.s32.totalorder %v2144_v54, 1  ;;  %v7616_v30 = vunpack.i.h.bf16 %v7614_v44  ;;  %v2227_v33 = vld [vmem:[%s8974_s13] sm:$0xff]  ;;  %v1614_v12 = vld [vmem:[%s8912_s8 + $0x18] sm:$0xff]  ;;  %v2229_v10 = vld [vmem:[%s8974_s13 + $0x10] sm:$0xff] }
 0x7e7   :  { %v7615_v28 = vunpack.i.l.bf16 %v7614_v44  ;;  %v2029_v0 = vpack.c.bf16 %v2027_v57, %v2026_v19  ;;  %v2146_v32 = vsel %vm8976_vm8, %v8623_v34, %v2131_v24  ;;  %v2147_v63 = vsel %vm8976_vm8, %v8621_v35, %v2132_v47  ;;  %v7725_v34 = vld [vmem:[%s8405_s21 + $0x30] sm:$0xff]   ;;  %v7724_v54 = vld [vmem:[%s8393_s17 + $0x38] sm:$0xff]   ;;  %v7727_v44 = vld [vmem:[%s8393_s17 + $0x40] sm:$0xff]   ;;  %v7619_v24 = vpop.permute.xlu0 %7618 }
 0x7e8   :  { %6550 = vmatpush3.bf16.msk.msra.mxu0 %vm9863_vm7, %v5777_v18  ;;  %6515 = vmatprep.subr.bf16.mxu1 %v2028_v56  ;;  %v2124_v18 = vsel %vm2120_vm2, %v7616_v30, 0.0  ;;  %v2150_v55 = vpack.c.bf16 %v2147_v63, %v2146_v32  ;;  %vm9874_vm1 = vnez %v9769_v11  ;;  %vm9875_vm6 = vmmov %vm9858_vm0  ;;  %v7729_v15 = vld [vmem:[%s8405_s21 + $0x40] sm:$0xff]   ;;  %v7728_v19 = vld [vmem:[%s8393_s17 + $0x48] sm:$0xff]   ;;  %v5810_v57 = vpack.c.bf16 %v8765_v39, %v8768_v49  ;;  %s7919_s17 = smov 29  }
 0x7e9   :  { %1300 = vperm.xlu1 %7485, %v1160_v2   ;;  %6512 = vmatmul.mubr.msk.bf16.vlgmr.msra.gmra.mrb[20].mxu1 %vm9870_vm10, %v7720_v46  ;;  %v2123_v7 = vsel %vm2120_vm2, %v7615_v28, 0.0  ;;  %v2134_v35 = vsel %vm8944_vm14, %v2124_v18, 0.0  ;;  %v2228_v2 = vld [vmem:[%s8974_s13 + $0x8] sm:$0xff]  ;;  %vm9873_vm2 = vmmov %vm9858_vm0  ;;  %v5799_v46 = vpack.c.bf16 %v8812_v38, %v8835_v52  ;;  %v7735_v52 = vld [vmem:[%s8862_s4] sm:$0xff]   ;;  %v7620_v39 = vunpack.i.l.bf16 %v7619_v24 }
 0x7ea   :  { %6555 = vmatprep.subr.bf16.mxu0 %v8333_v16  ;;  %1758 = vperm.xlu0 %7486, %v1611_v22   ;;  %v2133_v27 = vsel %vm8944_vm14, %v2123_v7, 0.0  ;;  %v2149_v59 = vsel %vm8976_vm8, %v8645_v53, %v2134_v35  ;;  %v2824_v53 = vadd.s32 3, %v8578_v31  ;;  %vm9876_vm5 = vmmov %vm9858_vm0  ;;  %v2952_v31 = vld [vmem:[%s9006_s3 + $0x8] sm:$0xff]  ;;  %v2954_v22 = vld [vmem:[%s9006_s3 + $0x18] sm:$0xff]  ;;  %v5813_v30 = vpack.c.bf16 %v8809_v37, %v8821_v40 }
 0x7eb   :  { %6516 = vmatpush3.bf16.msra.mxu1 %v2028_v56  ;;  %6519 = vmatprep.mubr.msk.bf16.mxu1 %vm9871_vm15, %v7723_v51  ;;  %v2148_v48 = vsel %vm8976_vm8, %v8654_v45, %v2133_v27  ;;  %v2953_v56 = vld [vmem:[%s9006_s3 + $0x10] sm:$0xff]  ;;  %vm9877_vm14 = vmmov %vm9858_vm0  ;;  %v7621_v51 = vunpack.i.h.bf16 %v7619_v24  ;;  %v7732_v32 = vld [vmem:[%s8405_s21 + $0x58] sm:$0xff]  }
 0x7ec   :  { %6517 = vmatprep.subr.bf16.mxu1 %v2029_v0  ;;  %v2151_v45 = vpack.c.bf16 %v2149_v59, %v2148_v48  ;;  %vm2825_vm3 = vcmp.ge.s32.totalorder %v2824_v53, 0  ;;  %vm2826_vm13 = vcmp.lt.s32.totalorder %v2824_v53, 16  ;;  %vm9048_vm10 = vmpackc.low %vm8670_vm12, %vm8670_vm12  ;;  %v7731_v49 = vld [vmem:[%s8405_s21 + $0x50] sm:$0xff]   ;;  %v7734_v7 = vld [vmem:[%s8405_s21 + $0x68] sm:$0xff]  }
 0x7ed   :  { %1310 = vperm.xlu1 %7485, %v1162_v41   ;;  %vm2827_vm8 = vmand %vm2825_vm3, %vm2826_vm13 }
 0x7ee   :  { %1768 = vperm.xlu0 %7486, %v1613_v50   ;;  %v2845_v47 = vsel %vm2827_vm8, 1, %v9775_v9  ;;  %vm9880_vm15 = vmmov %vm9858_vm0  ;;  %vm9886_vm8 = vcmask 7168  }
 0x7ef   :  { %6518 = vmatpush3.bf16.msra.mxu1 %v2029_v0  ;;  %6552 = vmatmul.mubr.msk.bf16.vlgmr.msra.gmra.mrb[16].mxu0 %vm9858_vm0, %v7722_v62  ;;  %vm9881_vm12 = vmmov %vm9858_vm0  ;;  %v2849_v43 = vrot.slane %v2845_v47, %v8042_v13  ;;  %vm2840_vm0 = vcmask 1022976   ;;  %v7624_v13 = vpop.permute.xlu1 %7623  ;;  %v7733_v62 = vld [vmem:[%s8405_s21 + $0x60] sm:$0xff]  }
 0x7f0   :  { %6523 = vmatprep.subr.bf16.mxu1 %v2150_v55  ;;  %6556 = vmatpush3.bf16.msra.mxu0 %v8333_v16  ;;  %v5796_v16 = vpack.c.bf16 %v8716_v21, %v8693_v25  ;;  %v2951_v25 = vld [vmem:[%s9006_s3] sm:$0xff]  ;;  %v7726_v21 = vld [vmem:[%s8405_s21 + $0x38] sm:$0xff]   ;;  %v2842_v28 = vsel %vm2840_vm0, %v7621_v51, 0.0  ;;  %v2841_v41 = vsel %vm2840_vm0, %v7620_v39, 0.0  ;;  %v7626_v37 = vunpack.i.h.bf16 %v7624_v13  ;;  %vm9884_vm13 = vmmov %vm9876_vm5  ;;  %s5627_s21 = sld [smem:[%s9701_s0 + %s7919_s17]]   ;;  %s7933_s17 = smov 15  }
 0x7f1   :  { %1763 = vperm.xlu1 %7485, %v1612_v36   ;;  %6557 = vmatprep.subr.bf16.mxu0 %v8347_v60  ;;  %v5824_v0 = vpack.c.bf16 %v2842_v28, %v2841_v41  ;;  %v7625_v40 = vunpack.i.l.bf16 %v7624_v13  ;;  %v9891_v51 = vmov 0.0   ;;  %s5612_s3 = sld [smem:[%s9701_s0 + %s7932_s14]]  }
 0x7f2   :  { %6559 = vmatprep.mubr.msk.bf16.mxu0 %vm9872_vm11, %v7725_v34  ;;  %2339 = vperm.xlu0 %7486, %v2227_v33   ;;  %vm9882_vm11 = vmmov %vm9873_vm2  ;;  %v2844_v63 = vsel %vm2840_vm0, %v7626_v37, 0.0 }
 0x7f3   :  { %v2843_v50 = vsel %vm2840_vm0, %v7625_v40, 0.0  ;;  %vm9889_vm0 = vmmov %vm9886_vm8 }
 0x7f4   :  { %6558 = vmatpush3.bf16.msra.mxu0 %v8347_v60  ;;  %v2230_v60 = vld [vmem:[%s8974_s13 + $0x18] sm:$0xff]  ;;  %v5827_v18 = vpack.c.bf16 %v2844_v63, %v2843_v50 }
 0x7f5   :  { %1773 = vperm.xlu1 %7485, %v1614_v12   ;;  %6520 = vmatmul.mubr.msk.bf16.vlgmr.msra.gmra.mrb[20].mxu1 %vm9873_vm2, %v7724_v54  ;;  %vm2850_vm2 = vcmp.eq.s32.totalorder %v2849_v43, 1 }
 0x7f6   :  { %6563 = vmatprep.subr.msk.bf16.mxu0 %vm9874_vm1, %v5796_v16  ;;  %2349 = vperm.xlu0 %7486, %v2229_v10   ;;  %vm5823_vm3 = vmpackc.low %vm2850_vm2, %vm2850_vm2  ;;  %vm9892_vm2 = vmmov 0  }
 0x7f7   :  { %6524 = vmatpush3.bf16.msra.mxu1 %v2150_v55  ;;  %6527 = vmatprep.mubr.msk.bf16.mxu1 %vm9875_vm6, %v7727_v44  ;;  %vm9883_vm6 = vmmov %vm9876_vm5  ;;  %v7736_v44 = vld [vmem:[%s8862_s4 + $0x8] sm:$0xff]  }
 0x7f8   :  { %6525 = vmatprep.subr.bf16.mxu1 %v2151_v45 }
 0x7f9   :  { %2344 = vperm.xlu1 %7485, %v2228_v2  }
 0x7fa   :  { %3052 = vperm.xlu0 %7486, %v2951_v25  }
 0x7fb   :  { %6526 = vmatpush3.bf16.msra.mxu1 %v2151_v45  ;;  %6560 = vmatmul.mubr.msk.bf16.vlgmr.msra.gmra.mrb[16].mxu0 %vm9876_vm5, %v7726_v21 }
 0x7fc   :  { %6564 = vmatpush3.bf16.msk.msra.mxu0 %vm9874_vm1, %v5796_v16  ;;  %6567 = vmatprep.mubr.msk.bf16.mxu0 %vm9877_vm14, %v7729_v15  ;;  %vm9885_vm14 = vmmov %vm9876_vm5 }
 0x7fd   :  { %2354 = vperm.xlu1 %7485, %v2230_v60   ;;  %6565 = vmatprep.subr.msk.bf16.mxu0 %vm9874_vm1, %v5799_v46 }
 0x7fe   :  { %3062 = vperm.xlu0 %7486, %v2953_v56  }
 0x800   :  { %6566 = vmatpush3.bf16.msk.msra.mxu0 %vm9874_vm1, %v5799_v46 }
 0x801   :  { %3057 = vperm.xlu1 %7485, %v2952_v31   ;;  %6528 = vmatmul.mubr.msk.bf16.vlgmr.msra.gmra.mrb[20].mxu1 %vm9880_vm15, %v7728_v19  ;;  %vm9887_vm15 = vmmov %vm9886_vm8 }
 0x802   :  { %6571 = vmatprep.subr.msk.bf16.mxu0 %vm9048_vm10, %v5810_v57  ;;  %6591 = vmatprep.mubr.msk.bf16.mxu1 %vm9881_vm12, %v7735_v52  ;;  %vm9888_vm12 = vmmov %vm9886_vm8 }
 0x805   :  { %3067 = vperm.xlu1 %7485, %v2954_v22  }
 0x807   :  { %6568 = vmatmul.mubr.msk.bf16.vlgmr.msra.gmra.mrb[16].mxu0 %vm9882_vm11, %v7730_v4  ;;  %vm9890_vm11 = vmmov %vm9876_vm5 }
 0x808   :  { %6572 = vmatpush3.bf16.msk.msra.mxu0 %vm9048_vm10, %v5810_v57  ;;  %6575 = vmatprep.mubr.msk.bf16.mxu0 %vm9883_vm6, %v7731_v49  ;;  %vm9893_vm6 = vcmask 15360  }
 0x809   :  { %6573 = vmatprep.subr.msk.bf16.mxu0 %vm9048_vm10, %v5813_v30 }
 0x80c   :  { %6574 = vmatpush3.bf16.msk.msra.mxu0 %vm9048_vm10, %v5813_v30 }
 0x80d   :  { %6579 = vmatprep.subr.msk.bf16.mxu0 %vm5823_vm3, %v5824_v0 }
 0x813   :  { %6576 = vmatmul.mubr.msk.bf16.vlgmr.msra.gmra.mrb[16].mxu0 %vm9884_vm13, %v7732_v32 }
 0x814   :  { %6580 = vmatpush3.bf16.msk.msra.mxu0 %vm5823_vm3, %v5824_v0  ;;  %6583 = vmatprep.mubr.msk.bf16.mxu0 %vm9876_vm5, %v7733_v62  ;;  %vm9896_vm5 = vmmov %vm9893_vm6 }
 0x815   :  { %6581 = vmatprep.subr.msk.bf16.mxu0 %vm5823_vm3, %v5827_v18 }
 0x818   :  { %6582 = vmatpush3.bf16.msk.msra.mxu0 %vm5823_vm3, %v5827_v18  ;;  %vm9894_vm3 = vcmask 1040384  }
 0x819   :  { %6615 = vmatprep.subr.bf16.mxu0 %v7955_v3  ;;  %vm9895_vm13 = vmmov %vm9894_vm3 }
 0x81f   :  { %6584 = vmatmul.mubr.msk.bf16.vlgmr.msra.gmra.mrb[16].mxu0 %vm9885_vm14, %v7734_v7  ;;  %vm9897_vm14 = vmmov %vm9896_vm5 }
 0x820   :  { %6616 = vmatpush3.bf16.msra.mxu0 %v7955_v3 }
 0x821   :  { %6617 = vmatprep.subr.bf16.mxu0 %v7958_v5 }
 0x824   :  { %6618 = vmatpush3.bf16.msra.mxu0 %v7958_v5 }
 0x825   :  { %6619 = vmatprep.subr.bf16.mxu0 %v7965_v8 }
 0x828   :  { %6620 = vmatpush3.bf16.msra.mxu0 %v7965_v8 }
 0x829   :  { %6621 = vmatprep.subr.bf16.mxu0 %v7979_v14 }
 0x82c   :  { %6622 = vmatpush3.bf16.msra.mxu0 %v7979_v14 }
 0x82d   :  { %6623 = vmatprep.subr.bf16.mxu0 %v7985_v17 }
 0x830   :  { %6624 = vmatpush3.bf16.msra.mxu0 %v7985_v17 }
 0x831   :  { %6625 = vmatprep.subr.bf16.mxu0 %v7991_v20 }
 0x834   :  { %6626 = vmatpush3.bf16.msra.mxu0 %v7991_v20 }
 0x835   :  { %6627 = vmatprep.subr.bf16.mxu0 %v7997_v23 }
 0x838   :  { %6628 = vmatpush3.bf16.msra.mxu0 %v7997_v23 }
 0x839   :  { %6629 = vmatprep.subr.bf16.mxu0 %v8003_v26 }
 0x83c   :  { %6630 = vmatpush3.bf16.msra.mxu0 %v8003_v26 }
 0x83d   :  { %6655 = vmatprep.subr.bf16.mxu0 %v7955_v3 }
 0x850   :  { %v7629_v36 = vpop.permute.xlu0 %7628 }
 0x851   :  { %v7631_v55 = vunpack.i.h.bf16 %v7629_v36  ;;  %v7630_v34 = vunpack.i.l.bf16 %v7629_v36 }
 0x853   :  { %v2976_v35 = vsel %vm9886_vm8, 0.0, %v7631_v55  ;;  %v2975_v27 = vsel %vm9887_vm15, 0.0, %v7630_v34  ;;  %vm9898_vm8 = vmmov %vm9896_vm5 }
 0x854   :  { %v5834_v33 = vpack.c.bf16 %v2976_v35, %v2975_v27  ;;  %vm9899_vm15 = vmmov %vm9896_vm5 }
 0x856   :  { %6587 = vmatprep.subr.msk.bf16.mxu1 %vm9863_vm7, %v5834_v33 }
 0x857   :  { %v7634_v12 = vpop.permute.xlu1 %7633  ;;  %6588 = vmatpush3.bf16.msk.msra.mxu1 %vm9863_vm7, %v5834_v33 }
 0x858   :  { %v7636_v54 = vunpack.i.h.bf16 %v7634_v12  ;;  %v7635_v48 = vunpack.i.l.bf16 %v7634_v12 }
 0x85a   :  { %v2978_v59 = vsel %vm9888_vm12, 0.0, %v7636_v54  ;;  %v2977_v16 = vsel %vm9889_vm0, 0.0, %v7635_v48  ;;  %vm9901_vm12 = vmmov %vm9896_vm5 }
 0x85b   :  { %v5837_v10 = vpack.c.bf16 %v2978_v59, %v2977_v16  ;;  %vm9902_vm0 = vmmov %vm9896_vm5 }
 0x85d   :  { %6589 = vmatprep.subr.msk.bf16.mxu1 %vm9863_vm7, %v5837_v10 }
 0x85e   :  { %6590 = vmatpush3.bf16.msk.msra.mxu1 %vm9863_vm7, %v5837_v10 }
 0x85f   :  { %6595 = vmatprep.subr.bf16.mxu1 %v7955_v3 }
 0x861   :  { %6592 = vmatmul.mubr.msk.bf16.vlgmr.msra.gmra.mrb[24].mxu1 %vm9890_vm11, %v7736_v44  ;;  %v1296_v2 = vpop.permute.xlu0 %1295  ;;  %vm9905_vm11 = vmmov %vm9902_vm0 }
 0x862   :  { %6596 = vmatpush3.bf16.msra.mxu1 %v7955_v3 }
 0x863   :  { %6597 = vmatprep.subr.bf16.mxu1 %v7958_v5 }
 0x865   :  { %v1306_v53 = vpop.permute.xlu0 %1305 }
 0x866   :  { %6598 = vmatpush3.bf16.msra.mxu1 %v7958_v5 }
 0x867   :  { %6599 = vmatprep.subr.bf16.mxu1 %v7965_v8 }
 0x868   :  { %v1301_v45 = vpop.permute.xlu1 %1300 }
 0x869   :  { %v1759_v39 = vpop.permute.xlu0 %1758 }
 0x86a   :  { %6600 = vmatpush3.bf16.msra.mxu1 %v7965_v8 }
 0x86b   :  { %6601 = vmatprep.subr.bf16.mxu1 %v7979_v14 }
 0x86c   :  { %v1311_v15 = vpop.permute.xlu1 %1310 }
 0x86d   :  { %v1769_v30 = vpop.permute.xlu0 %1768 }
 0x86e   :  { %6602 = vmatpush3.bf16.msra.mxu1 %v7979_v14 }
 0x86f   :  { %6603 = vmatprep.subr.bf16.mxu1 %v7985_v17 }
 0x870   :  { %v1764_v49 = vpop.permute.xlu1 %1763 }
 0x871   :  { %v2340_v35 = vpop.permute.xlu0 %2339 }
 0x872   :  { %6604 = vmatpush3.bf16.msra.mxu1 %v7985_v17 }
 0x873   :  { %6605 = vmatprep.subr.bf16.mxu1 %v7991_v20 }
 0x874   :  { %v1774_v0 = vpop.permute.xlu1 %1773 }
 0x875   :  { %v2350_v33 = vpop.permute.xlu0 %2349 }
 0x876   :  { %6606 = vmatpush3.bf16.msra.mxu1 %v7991_v20 }
 0x877   :  { %6607 = vmatprep.subr.bf16.mxu1 %v7997_v23 }
 0x878   :  { %v2345_v27 = vpop.permute.xlu1 %2344 }
 0x87a   :  { %6608 = vmatpush3.bf16.msra.mxu1 %v7997_v23 }
 0x87b   :  { %6609 = vmatprep.subr.bf16.mxu1 %v8003_v26 }
 0x87c   :  { %v2355_v59 = vpop.permute.xlu1 %2354 }
 0x87e   :  { %6610 = vmatpush3.bf16.msra.mxu1 %v8003_v26 }
 0x87f   :  { %6635 = vmatprep.subr.bf16.mxu1 %v7955_v3 }
 0x8a1   :  { %v6481_v25 = vpop.f32.mrb[12].mxu0 }
 0x8a2   :  { %v7303_v21 = vadd.f32 %v6481_v25, %v1306_v53  ;;  %v1485_v60 = vpop.f32.mrb[13].mxu0 }
 0x8a3   :  { %v7304_v46 = vadd.f32 %v1485_v60, %v1296_v2  ;;  %v6482_v56 = vpop.f32.mrb[14].mxu0 }
 0x8a4   :  { %v7305_v31 = vadd.f32 %v6482_v56, %v1311_v15  ;;  %v1488_v19 = vpop.f32.mrb[15].mxu0  ;;  %v1506_v57 = vmax.f32 %v7303_v21, 0.0  ;;  %v3053_v56 = vpop.permute.xlu0 %3052 }
 0x8a5   :  { %v7306_v52 = vadd.f32 %v1488_v19, %v1301_v45  ;;  %v1504_v24 = vmax.f32 %v7304_v46, 0.0 }
 0x8a6   :  { %v1507_v47 = vmax.f32 %v7305_v31, 0.0  ;;  %v3058_v31 = vpop.permute.xlu1 %3057 }
 0x8a7   :  { %v1505_v22 = vmax.f32 %v7306_v52, 0.0 }
 0x8a8   :  { %v9134_v4 = vpack.c.bf16 %v1507_v47, %v1506_v57  ;;  %v3063_v19 = vpop.permute.xlu0 %3062 }
 0x8a9   :  { %v9136_v43 = vpack.c.bf16 %v1505_v22, %v1504_v24 }
 0x8aa   :  { %v3068_v24 = vpop.permute.xlu1 %3067 }
 0x8ab   :  { %6611 = vmatprep.mubr.bf16.mxu1 %v9136_v43 }
 0x8ac   :  { %6612 = vmatmul.mubr.bf16.vlgmr.msra.gmra.mrb[28].mxu1 %v9134_v4 }
 0x8ad   :  { %6636 = vmatpush3.bf16.msra.mxu1 %v7955_v3 }
 0x8ae   :  { %6637 = vmatprep.subr.bf16.mxu1 %v7958_v5 }
 0x8b1   :  { %6638 = vmatpush3.bf16.msra.mxu1 %v7958_v5 }
 0x8b2   :  { %6639 = vmatprep.subr.bf16.mxu1 %v7965_v8 }
 0x8b5   :  { %6640 = vmatpush3.bf16.msra.mxu1 %v7965_v8 }
 0x8b6   :  { %6641 = vmatprep.subr.bf16.mxu1 %v7979_v14 }
 0x8b9   :  { %6642 = vmatpush3.bf16.msra.mxu1 %v7979_v14 }
 0x8ba   :  { %6643 = vmatprep.subr.bf16.mxu1 %v7985_v17 }
 0x8bd   :  { %6644 = vmatpush3.bf16.msra.mxu1 %v7985_v17 }
 0x8be   :  { %6645 = vmatprep.subr.bf16.mxu1 %v7991_v20 }
 0x8c1   :  { %6646 = vmatpush3.bf16.msra.mxu1 %v7991_v20 }
 0x8c2   :  { %6647 = vmatprep.subr.bf16.mxu1 %v7997_v23 }
 0x8c5   :  { %6648 = vmatpush3.bf16.msra.mxu1 %v7997_v23 }
 0x8c6   :  { %6649 = vmatprep.subr.bf16.mxu1 %v8003_v26 }
 0x8c9   :  { %6650 = vmatpush3.bf16.msra.mxu1 %v8003_v26 }
 0x8ca   :  { %6675 = vmatprep.subr.bf16.mxu1 %v9891_v51 }
 0x8d4   :  { %v6529_v28 = vpop.f32.mrb[20].mxu1 }
 0x8d5   :  { %v7307_v41 = vadd.f32 %v6529_v28, %v1769_v30  ;;  %v2202_v13 = vpop.f32.mrb[21].mxu1 }
 0x8d6   :  { %v7308_v37 = vadd.f32 %v2202_v13, %v1759_v39  ;;  %v6530_v40 = vpop.f32.mrb[22].mxu1 }
 0x8d7   :  { %v7309_v32 = vadd.f32 %v6530_v40, %v1774_v0  ;;  %v2205_v63 = vpop.f32.mrb[23].mxu1  ;;  %v2223_v62 = vmax.f32 %v7307_v41, 0.0 }
 0x8d8   :  { %v7310_v50 = vadd.f32 %v2205_v63, %v1764_v49  ;;  %v2221_v7 = vmax.f32 %v7308_v37, 0.0 }
 0x8d9   :  { %v2224_v18 = vmax.f32 %v7309_v32, 0.0 }
 0x8da   :  { %v2222_v36 = vmax.f32 %v7310_v50, 0.0 }
 0x8db   :  { %v9156_v55 = vpack.c.bf16 %v2224_v18, %v2223_v62 }
 0x8dc   :  { %v9158_v34 = vpack.c.bf16 %v2222_v36, %v2221_v7 }
 0x8de   :  { %6631 = vmatprep.mubr.bf16.mxu0 %v9158_v34 }
 0x8df   :  { %6632 = vmatmul.mubr.bf16.vlgmr.msra.gmra.mrb[20].mxu0 %v9156_v55 }
 0x8e0   :  { %6656 = vmatpush3.bf16.msra.mxu0 %v7955_v3 }
 0x8e1   :  { %6657 = vmatprep.subr.bf16.mxu0 %v7958_v5 }
 0x8e4   :  { %6658 = vmatpush3.bf16.msra.mxu0 %v7958_v5 }
 0x8e5   :  { %6659 = vmatprep.subr.bf16.mxu0 %v7965_v8 }
 0x8e8   :  { %6660 = vmatpush3.bf16.msra.mxu0 %v7965_v8 }
 0x8e9   :  { %6661 = vmatprep.subr.bf16.mxu0 %v7979_v14 }
 0x8ec   :  { %6662 = vmatpush3.bf16.msra.mxu0 %v7979_v14 }
 0x8ed   :  { %6663 = vmatprep.subr.bf16.mxu0 %v7985_v17 }
 0x8f0   :  { %6664 = vmatpush3.bf16.msra.mxu0 %v7985_v17 }
 0x8f1   :  { %6665 = vmatprep.subr.bf16.mxu0 %v7991_v20 }
 0x8f2   :  { %v6585_v12 = vpop.f32.mrb[16].mxu0 }
 0x8f3   :  { %v7311_v54 = vadd.f32 %v6585_v12, %v2350_v33  ;;  %v2907_v48 = vpop.f32.mrb[17].mxu0 }
 0x8f4   :  { %v7312_v16 = vadd.f32 %v2907_v48, %v2340_v35  ;;  %v6586_v10 = vpop.f32.mrb[18].mxu0  ;;  %6666 = vmatpush3.bf16.msra.mxu0 %v7991_v20 }
 0x8f5   :  { %v7313_v44 = vadd.f32 %v6586_v10, %v2355_v59  ;;  %v2910_v2 = vpop.f32.mrb[19].mxu0  ;;  %6667 = vmatprep.subr.bf16.mxu0 %v7997_v23  ;;  %v2928_v53 = vmax.f32 %v7311_v54, 0.0 }
 0x8f6   :  { %v7314_v45 = vadd.f32 %v2910_v2, %v2345_v27  ;;  %v2926_v21 = vmax.f32 %v7312_v16, 0.0 }
 0x8f7   :  { %v2929_v25 = vmax.f32 %v7313_v44, 0.0 }
 0x8f8   :  { %v2927_v60 = vmax.f32 %v7314_v45, 0.0  ;;  %6668 = vmatpush3.bf16.msra.mxu0 %v7997_v23 }
 0x8f9   :  { %v9175_v15 = vpack.c.bf16 %v2929_v25, %v2928_v53  ;;  %6669 = vmatprep.subr.bf16.mxu0 %v8003_v26 }
 0x8fa   :  { %v9178_v46 = vpack.c.bf16 %v2927_v60, %v2926_v21 }
 0x8fc   :  { %6651 = vmatprep.mubr.bf16.mxu1 %v9178_v46  ;;  %6670 = vmatpush3.bf16.msra.mxu0 %v8003_v26 }
 0x8fd   :  { %6652 = vmatmul.mubr.bf16.vlgmr.msra.gmra.mrb[32].mxu1 %v9175_v15 }
 0x8fe   :  { %6691 = vmatprep.mubr.msk.bf16.mxu1 %vm9892_vm2, %v9891_v51 }
 0x934   :  { %v6593_v52 = vpop.f32.mrb[24].mxu1 }
 0x935   :  { %v3072_v57 = vadd.f32 %v6593_v52, %v3063_v19  ;;  %v3035_v47 = vpop.f32.mrb[25].mxu1  ;;  %v3276_v19 = vld [vmem:[%s5627_s21] sm:$0x1]  ;;  %s5613_s21 = sld [smem:[%s9701_s0 + %s7933_s17]]  }
 0x936   :  { %v3070_v22 = vadd.f32 %v3053_v56, %v3035_v47  ;;  %v6594_v39 = vpop.f32.mrb[26].mxu1  ;;  %v7737_v52 = vld [vmem:[%s9207_s24] sm:$0xff]  }
 0x937   :  { %v3073_v49 = vadd.f32 %v6594_v39, %v3068_v24  ;;  %v3038_v30 = vpop.f32.mrb[27].mxu1  ;;  %v3076_v41 = vmax.f32 %v3072_v57, 0.0 }
 0x938   :  { %v3071_v28 = vadd.f32 %v3058_v31, %v3038_v30  ;;  %v3074_v0 = vmax.f32 %v3070_v22, 0.0 }
 0x939   :  { %v3077_v13 = vmax.f32 %v3073_v49, 0.0 }
 0x93a   :  { %v3075_v37 = vmax.f32 %v3071_v28, 0.0  ;;  %v7738_v28 = vld [vmem:[%s9207_s24 + $0x8] sm:$0xff]  }
 0x93b   :  { %v9185_v40 = vpack.c.bf16 %v3077_v13, %v3076_v41  ;;  %v7739_v41 = vld [vmem:[%s9207_s24 + $0x10] sm:$0xff]   ;;  %v7740_v13 = vld [vmem:[%s9207_s24 + $0x18] sm:$0xff]  }
 0x93c   :  { %v9187_v32 = vpack.c.bf16 %v3075_v37, %v3074_v0  ;;  %v7741_v0 = vld [vmem:[%s9207_s24 + $0x20] sm:$0xff]   ;;  %v7742_v37 = vld [vmem:[%s9207_s24 + $0x28] sm:$0xff]  }
 0x93e   :  { %6671 = vmatprep.mubr.bf16.mxu0 %v9187_v32 }
 0x93f   :  { %6672 = vmatmul.mubr.bf16.vlgmr.msra.gmra.mrb[24].mxu0 %v9185_v40 }
 0x940   :  { %6697 = vmatprep.mubr.msk.bf16.mxu0 %vm9893_vm6, %v7737_v52 }
 0x97f   :  { %v6613_v63 = vpop.f32.mrb[28].mxu1 }
 0x980   :  { %v3114_v50 = vpop.f32.mrb[29].mxu1 }
 0x981   :  { %v6614_v62 = vpop.f32.mrb[30].mxu1 }
 0x982   :  { %v3278_v18 = vpack.c.bf16 %v6614_v62, %v6613_v63  ;;  %v3117_v7 = vpop.f32.mrb[31].mxu1  ;;  %v7743_v63 = vld [vmem:[%s9207_s24 + $0x30] sm:$0xff]   ;;  %v9903_v62 = vld [vmem:[#allocation9_spill] sm:$0xff] }
 0x983   :  { %v3277_v36 = vpack.c.bf16 %v3117_v7, %v3114_v50  ;;  %v9900_v50 = vld [vmem:[#allocation8_spill] sm:$0xff]  ;;  %v9904_v7 = vld [vmem:[#allocation10_spill] sm:$0xff] }
 0x985   :  { %6676 = vmatpush3.bf16.msra.mxu1 %v3277_v36  ;;  %v9906_v36 = vld [vmem:[#allocation11_spill] sm:$0xff] }
 0x986   :  { %6677 = vmatprep.subr.bf16.mxu1 %v9891_v51 }
 0x989   :  { %6678 = vmatpush3.bf16.msra.mxu1 %v3278_v18  ;;  %v7744_v18 = vld [vmem:[%s9207_s24 + $0x38] sm:$0xff]  }
 0x98a   :  { %6679 = vmatprep.subr.bf16.mxu1 %v9891_v51 }
 0x9b2   :  { %v6633_v35 = vpop.f32.mrb[20].mxu0 }
 0x9b3   :  { %v3163_v27 = vpop.f32.mrb[21].mxu0 }
 0x9b4   :  { %v6634_v33 = vpop.f32.mrb[22].mxu0 }
 0x9b5   :  { %v3280_v12 = vpack.c.bf16 %v6634_v33, %v6633_v35  ;;  %v3166_v54 = vpop.f32.mrb[23].mxu0 }
 0x9b6   :  { %v3279_v48 = vpack.c.bf16 %v3166_v54, %v3163_v27 }
 0x9b8   :  { %6680 = vmatpush3.bf16.msra.mxu1 %v3279_v48 }
 0x9b9   :  { %6681 = vmatprep.subr.bf16.mxu1 %v9891_v51 }
 0x9bc   :  { %6682 = vmatpush3.bf16.msra.mxu1 %v3280_v12 }
 0x9bd   :  { %6683 = vmatprep.subr.bf16.mxu1 %v9891_v51 }
 0x9d0   :  { %v6653_v59 = vpop.f32.mrb[32].mxu1 }
 0x9d1   :  { %v3212_v16 = vpop.f32.mrb[33].mxu1 }
 0x9d2   :  { %v6654_v10 = vpop.f32.mrb[34].mxu1 }
 0x9d3   :  { %v3282_v44 = vpack.c.bf16 %v6654_v10, %v6653_v59  ;;  %v3215_v2 = vpop.f32.mrb[35].mxu1 }
 0x9d4   :  { %v3281_v45 = vpack.c.bf16 %v3215_v2, %v3212_v16 }
 0x9d6   :  { %6684 = vmatpush3.bf16.msra.mxu1 %v3281_v45 }
 0x9d7   :  { %6685 = vmatprep.subr.bf16.mxu1 %v9891_v51 }
 0x9da   :  { %6686 = vmatpush3.bf16.msra.mxu1 %v3282_v44 }
 0x9db   :  { %6687 = vmatprep.subr.bf16.mxu1 %v9891_v51 }
 0xa12   :  { %v6673_v53 = vpop.f32.mrb[24].mxu0 }
 0xa13   :  { %v3261_v25 = vpop.f32.mrb[25].mxu0 }
 0xa14   :  { %v6674_v21 = vpop.f32.mrb[26].mxu0 }
 0xa15   :  { %v3284_v60 = vpack.c.bf16 %v6674_v21, %v6673_v53  ;;  %v3264_v56 = vpop.f32.mrb[27].mxu0 }
 0xa16   :  { %v3283_v31 = vpack.c.bf16 %v3264_v56, %v3261_v25 }
 0xa18   :  { %6688 = vmatpush3.bf16.msra.mxu1 %v3283_v31 }
 0xa19   :  { %6689 = vmatprep.subr.bf16.mxu1 %v9891_v51 }
 0xa1c   :  { %6690 = vmatpush3.bf16.msra.mxu1 %v3284_v60 }
 0xa1d   :  { %6713 = vmatprep.subr.bf16.mxu1 %v9891_v51 }
 0xa1f   :  { %6692 = vmatmul.mubr.bf16.vlgmr.msra.gmra.mrb[36].mxu1 %v3276_v19 }
 0xa20   :  { %6717 = vmatprep.mubr.msk.bf16.mxu1 %vm9892_vm2, %v9891_v51 }
 0xaf2   :  { %v3319_v57 = vpop.f32.mrb[36].mxu1 }
 0xaf3   :  { %v3325_v47 = vmax.f32 %v3319_v57, 0.0  ;;  %v6693_v24 = vpop.f32.mrb[37].mxu1 }
 0xaf4   :  { %v3322_v22 = vpop.f32.mrb[38].mxu1 }
 0xaf5   :  { %v3342_v39 = vpack.c.bf16 %v3325_v47, %v3325_v47  ;;  %v6694_v49 = vpop.f32.mrb[39].mxu1 }
 0xaf7   :  { %v3408_v30 = vsel %vm9894_vm3, %v3342_v39, 0  ;;  %7410 = vmatprep.subr.msk.bf16.mxu0 %vm9895_vm13, %v3342_v39  ;;  %vm9912_vm13 = vcmask 261120  }
 0xaf8   :  { %6696 = vmatpush3.bf16.msra.mxu0 %v3408_v30 }
 0xaf9   :  { %7108 = vmatprep.subr.bf16.mxu0 %v8110_v58 }
 0xafb   :  { %6698 = vmatmul.mubr.msk.bf16.vlgmr.msra.gmra.mrb[28].mxu0 %vm9896_vm5, %v7738_v28  ;;  %vm9913_vm5 = vmmov %vm9912_vm13 }
 0xafc   :  { %6701 = vmatprep.mubr.msk.bf16.mxu0 %vm9897_vm14, %v7739_v41  ;;  %7110 = vmatpush3.bf16.msra.mxu0 %v8110_v58  ;;  %vm9914_vm14 = vmmov %vm9913_vm5 }
 0xafd   :  { %7112 = vmatprep.subr.bf16.mxu0 %v8114_v61 }
 0xb00   :  { %7114 = vmatpush3.bf16.msra.mxu0 %v8114_v61 }
 0xb01   :  { %7116 = vmatprep.subr.bf16.mxu0 %v8121_v1 }
 0xb03   :  { %6702 = vmatmul.mubr.msk.bf16.gmra.mrb[32].mxu0 %vm9898_vm8, %v7740_v13  ;;  %vm9915_vm8 = vmmov %vm9913_vm5 }
 0xb04   :  { %6705 = vmatprep.mubr.msk.bf16.mxu0 %vm9899_vm15, %v7741_v0  ;;  %7118 = vmatpush3.bf16.msra.mxu0 %v8121_v1  ;;  %vm4275_vm15 = vcmask 130048  }
 0xb05   :  { %7120 = vmatprep.subr.bf16.mxu0 %v8127_v6 }
 0xb08   :  { %7122 = vmatpush3.bf16.msra.mxu0 %v8127_v6 }
 0xb09   :  { %7124 = vmatprep.subr.bf16.mxu0 %v9900_v50 }
 0xb0b   :  { %6706 = vmatmul.mubr.msk.bf16.gmra.mrb[36].mxu0 %vm9901_vm12, %v7742_v37  ;;  %vm9916_vm12 = vmmov %vm9902_vm0 }
 0xb0c   :  { %6709 = vmatprep.mubr.msk.bf16.mxu0 %vm9902_vm0, %v7743_v63  ;;  %7126 = vmatpush3.bf16.msra.mxu0 %v9900_v50 }
 0xb0d   :  { %7128 = vmatprep.subr.bf16.mxu0 %v9903_v62 }
 0xb10   :  { %7130 = vmatpush3.bf16.msra.mxu0 %v9903_v62 }
 0xb11   :  { %7132 = vmatprep.subr.bf16.mxu0 %v9904_v7 }
 0xb13   :  { %6710 = vmatmul.mubr.msk.bf16.gmra.mrb[40].mxu0 %vm9905_vm11, %v7744_v18 }
 0xb14   :  { %7134 = vmatpush3.bf16.msra.mxu0 %v9904_v7 }
 0xb15   :  { %7136 = vmatprep.subr.bf16.mxu0 %v9906_v36 }
 0xb18   :  { %7138 = vmatpush3.bf16.msra.mxu0 %v9906_v36 }
 0xb19   :  { %7140 = vmatprep.subr.bf16.mxu0 %v8110_v58 }
 0xbce   :  { %v6699_v35 = vpop.f32.mrb[28].mxu0 }
 0xbcf   :  { %v5859_v27 = vmul.f32 -1.442695, %v6699_v35  ;;  %v3444_v33 = vpop.f32.mrb[29].mxu0 }
 0xbd0   :  { %v5857_v12 = vmul.f32 -1.442695, %v3444_v33  ;;  %v6700_v54 = vpop.f32.mrb[30].mxu0 }
 0xbd1   :  { %7787 = vpow2.f32 %v5859_v27  ;;  %v3447_v48 = vpop.f32.mrb[31].mxu0  ;;  %v5860_v59 = vmul.f32 -1.442695, %v6700_v54 }
 0xbd2   :  { %7789 = vpow2.f32 %v5857_v12  ;;  %v5858_v10 = vmul.f32 -1.442695, %v3447_v48  ;;  %v9907_v12 = vmov 1  }
 0xbd3   :  { %7791 = vpow2.f32 %v5860_v59 }
 0xbd6   :  { %v6703_v16 = vpop.f32.mrb[32].mxu0 }
 0xbd7   :  { %v3460_v44 = vpop.f32.mrb[33].mxu0  ;;  %v5863_v19 = vmul.f32 -1.442695, %v6703_v16 }
 0xbd8   :  { %v5861_v2 = vmul.f32 -1.442695, %v3460_v44  ;;  %v6704_v45 = vpop.f32.mrb[34].mxu0 }
 0xbd9   :  { %v3463_v53 = vpop.f32.mrb[35].mxu0  ;;  %v5864_v47 = vmul.f32 -1.442695, %v6704_v45 }
 0xbda   :  { %7793 = vpow2.f32 %v5861_v2  ;;  %v5862_v59 = vmul.f32 -1.442695, %v3463_v53 }
 0xbdb   :  { %v7788_v25 = vpop.eup %7787  ;;  %7795 = vpow2.f32 %v5858_v10 }
 0xbdc   :  { %v7790_v21 = vpop.eup %7789  ;;  %v3557_v60 = vadd.f32 1.0, %v7788_v25 }
 0xbdd   :  { %v3555_v56 = vadd.f32 1.0, %v7790_v21  ;;  %v7792_v57 = vpop.eup %7791 }
 0xbde   :  { %7797 = vrcp.f32 %v3557_v60  ;;  %v6707_v31 = vpop.f32.mrb[36].mxu0  ;;  %v3558_v39 = vadd.f32 1.0, %v7792_v57 }
 0xbdf   :  { %7799 = vrcp.f32 %v3555_v56  ;;  %v3476_v52 = vpop.f32.mrb[37].mxu0  ;;  %v5867_v53 = vmul.f32 -1.442695, %v6707_v31 }
 0xbe0   :  { %v6708_v24 = vpop.f32.mrb[38].mxu0  ;;  %7801 = vpow2.f32 %v5863_v19  ;;  %v5865_v30 = vmul.f32 -1.442695, %v3476_v52 }
 0xbe1   :  { %v9244_v22 = vpop.f32.mrb[39].mxu0  ;;  %7803 = vpow2.f32 %v5864_v47  ;;  %v5868_v48 = vmul.f32 -1.442695, %v6708_v24 }
 0xbe2   :  { %7805 = vrcp.f32 %v3558_v39 }
 0xbe3   :  { %7807 = vpow2.f32 %v5865_v30 }
 0xbe4   :  { %v7794_v49 = vpop.eup %7793 }
 0xbe5   :  { %v7796_v28 = vpop.eup %7795  ;;  %v3559_v13 = vadd.f32 1.0, %v7794_v49 }
 0xbe6   :  { %v9246_v41 = vpop.f32.mrb[40].mxu0  ;;  %v3556_v63 = vadd.f32 1.0, %v7796_v28 }
 0xbe7   :  { %v3492_v0 = vpop.f32.mrb[41].mxu0  ;;  %7809 = vrcp.f32 %v3559_v13  ;;  %v5866_v13 = vmul.f32 -1.442695, %v9244_v22 }
 0xbe8   :  { %v7798_v37 = vpop.eup %7797  ;;  %v6712_v18 = vpop.f32.mrb[42].mxu0  ;;  %7811 = vrcp.f32 %v3556_v63  ;;  %v5869_v45 = vmul.f32 -1.442695, %v3492_v0 }
 0xbe9   :  { %v7800_v35 = vpop.eup %7799  ;;  %3617 = vperm.xlu1 %7485, %v7798_v37   ;;  %v9248_v27 = vpop.f32.mrb[43].mxu0  ;;  %7813 = vpow2.f32 %v5868_v48  ;;  %v5872_v19 = vmul.f32 -1.442695, %v6712_v18 }
 0xbea   :  { %3607 = vperm.xlu0 %7486, %v7800_v35   ;;  %v7802_v33 = vpop.eup %7801  ;;  %7815 = vpow2.f32 %v5862_v59  ;;  %v5870_v59 = vmul.f32 -1.442695, %v9248_v27 }
 0xbeb   :  { %v7804_v54 = vpop.eup %7803  ;;  %v3561_v16 = vadd.f32 1.0, %v7802_v33  ;;  %v5871_v33 = vmul.f32 -1.442695, %v9246_v41 }
 0xbec   :  { %v7806_v10 = vpop.eup %7805  ;;  %v3562_v44 = vadd.f32 1.0, %v7804_v54 }
 0xbed   :  { %7637 = vset.pattern.permute.xlu1 %v9907_v12  ;;  %v7808_v2 = vpop.eup %7807  ;;  %7817 = vrcp.f32 %v3561_v16 }
 0xbee   :  { %3638 = vperm.xlu1 %7637, %v7798_v37   ;;  %7638 = vset.pattern.permute.xlu0 %v9907_v12  ;;  %7819 = vrcp.f32 %v3562_v44  ;;  %v3563_v21 = vadd.f32 1.0, %v7808_v2  ;;  %v3603_v44 = vld [vmem:[%s9273_s6] sm:$0xff] }
 0xbef   :  { %3630 = vperm.xlu0 %7638, %v7800_v35   ;;  %7821 = vpow2.f32 %v5869_v45 }
 0xbf0   :  { %7823 = vrcp.f32 %v3563_v21 }
 0xbf1   :  { %v7810_v25 = vpop.eup %7809  ;;  %7825 = vpow2.f32 %v5867_v53  ;;  %v3604_v53 = vld [vmem:[%s9273_s6 + $0x8] sm:$0xff]  ;;  %s5610_s6 = sld [smem:[%s9701_s0 + %s7929_s1]]  }
 0xbf2   :  { %3642 = vperm.xlu1 %7637, %v7806_v10   ;;  %v7812_v60 = vpop.eup %7811  ;;  %7827 = vpow2.f32 %v5872_v19 }
 0xbf3   :  { %7639 = vset.pattern.permute.xlu0 %v9775_v9  ;;  %v7814_v56 = vpop.eup %7813 }
 0xbf4   :  { %3622 = vperm.xlu0 %7639, %v7806_v10   ;;  %v7816_v52 = vpop.eup %7815  ;;  %v3566_v24 = vadd.f32 1.0, %v7814_v56 }
 0xbf5   :  { %v3560_v49 = vadd.f32 1.0, %v7816_v52 }
 0xbf6   :  { %7640 = vset.pattern.permute.xlu1 %v9775_v9  ;;  %7829 = vrcp.f32 %v3566_v24 }
 0xbf7   :  { %3612 = vperm.xlu1 %7640, %v7812_v60   ;;  %v7818_v57 = vpop.eup %7817  ;;  %7831 = vrcp.f32 %v3560_v49  ;;  %v9908_v49 = vld [vmem:[#allocation2_spill] sm:$0xff] }
 0xbf8   :  { %3724 = vperm.xlu0 %7639, %v7810_v25   ;;  %v7820_v47 = vpop.eup %7819  ;;  %vm9909_vm6 = vnez %v9908_v49 }
 0xbf9   :  { %v7822_v39 = vpop.eup %7821 }
 0xbfa   :  { %v7824_v31 = vpop.eup %7823  ;;  %v3567_v30 = vadd.f32 1.0, %v7822_v39 }
 0xbfb   :  { %7641 = vset.pattern.permute.xlu1 %v9907_v12  ;;  %v7826_v28 = vpop.eup %7825 }
 0xbfc   :  { %3634 = vperm.xlu1 %7641, %v7812_v60   ;;  %7644 = vset.pattern.permute.xlu0 %v9907_v12  ;;  %7833 = vrcp.f32 %v3567_v30  ;;  %v3565_v0 = vadd.f32 1.0, %v7826_v28  ;;  %v7828_v37 = vpop.eup %7827  ;;  %v9910_v28 = vld [vmem:[#allocation3_spill] sm:$0xff] }
 0xbfd   :  { %3747 = vperm.xlu0 %7644, %v7810_v25   ;;  %7835 = vpow2.f32 %v5866_v13  ;;  %v3570_v18 = vadd.f32 1.0, %v7828_v37  ;;  %vm9911_vm3 = vnez %v9910_v28  ;;  %v3652_v37 = vunpack.c.h.bf16 %v9136_v43 }
 0xbfe   :  { %7837 = vrcp.f32 %v3565_v0 }
 0xbff   :  { %7839 = vrcp.f32 %v3570_v18 }
 0xc00   :  { %7642 = vset.pattern.permute.xlu1 %v9775_v9  ;;  %v7830_v63 = vpop.eup %7829  ;;  %7841 = vpow2.f32 %v5871_v33 }
 0xc01   :  { %3734 = vperm.xlu1 %7642, %v7818_v57   ;;  %7645 = vset.pattern.permute.xlu0 %v9775_v9  ;;  %v7832_v35 = vpop.eup %7831 }
 0xc02   :  { %3739 = vperm.xlu0 %7645, %v7820_v47  }
 0xc05   :  { %7643 = vset.pattern.permute.xlu1 %v9907_v12 }
 0xc06   :  { %3755 = vperm.xlu1 %7643, %v7818_v57   ;;  %3832 = vperm.xlu0 %7645, %v7824_v31   ;;  %v7834_v22 = vpop.eup %7833 }
 0xc07   :  { %v7836_v54 = vpop.eup %7835 }
 0xc08   :  { %v7838_v48 = vpop.eup %7837  ;;  %v3564_v41 = vadd.f32 1.0, %v7836_v54  ;;  %v3654_v54 = vunpack.c.h.bf16 %v9134_v4 }
 0xc09   :  { %v7840_v16 = vpop.eup %7839 }
 0xc0a   :  { %3759 = vperm.xlu1 %7643, %v7820_v47   ;;  %7650 = vset.pattern.permute.xlu0 %v9907_v12  ;;  %7843 = vrcp.f32 %v3564_v41  ;;  %v7842_v10 = vpop.eup %7841 }
 0xc0b   :  { %3855 = vperm.xlu0 %7650, %v7824_v31   ;;  %7845 = vpow2.f32 %v5870_v59  ;;  %v3569_v2 = vadd.f32 1.0, %v7842_v10 }
 0xc0d   :  { %7847 = vrcp.f32 %v3569_v2 }
 0xc0e   :  { %7646 = vset.pattern.permute.xlu1 %v9775_v9 }
 0xc0f   :  { %3729 = vperm.xlu1 %7646, %v7832_v35   ;;  %7651 = vset.pattern.permute.xlu0 %v9775_v9 }
 0xc10   :  { %3847 = vperm.xlu0 %7651, %v7830_v63  }
 0xc13   :  { %7647 = vset.pattern.permute.xlu1 %v9907_v12 }
 0xc14   :  { %3751 = vperm.xlu1 %7647, %v7832_v35   ;;  %3940 = vperm.xlu0 %7651, %v7834_v22   ;;  %v7844_v45 = vpop.eup %7843 }
 0xc15   :  { %v7846_v27 = vpop.eup %7845 }
 0xc16   :  { %v3568_v25 = vadd.f32 1.0, %v7846_v27  ;;  %v7745_v27 = vld [vmem:[%s9268_s30] sm:$0xff]  }
 0xc17   :  { %v7848_v21 = vpop.eup %7847 }
 0xc18   :  { %7648 = vset.pattern.permute.xlu1 %v9775_v9  ;;  %7655 = vset.pattern.permute.xlu0 %v9907_v12  ;;  %7849 = vrcp.f32 %v3568_v25 }
 0xc19   :  { %3842 = vperm.xlu1 %7648, %v7838_v48   ;;  %3963 = vperm.xlu0 %7655, %v7834_v22  }
 0xc1d   :  { %7649 = vset.pattern.permute.xlu1 %v9907_v12  ;;  %7656 = vset.pattern.permute.xlu0 %v9775_v9 }
 0xc1e   :  { %3863 = vperm.xlu1 %7649, %v7838_v48   ;;  %3955 = vperm.xlu0 %7656, %v7840_v16  }
 0xc22   :  { %3867 = vperm.xlu1 %7649, %v7830_v63   ;;  %3712 = vperm.xlu0 %7656, %v3603_v44   ;;  %v7850_v60 = vpop.eup %7849 }
 0xc26   :  { %7652 = vset.pattern.permute.xlu1 %v9775_v9 }
 0xc27   :  { %3837 = vperm.xlu1 %7652, %v7844_v45  }
 0xc2b   :  { %7653 = vset.pattern.permute.xlu1 %v9907_v12 }
 0xc2c   :  { %3859 = vperm.xlu1 %7653, %v7844_v45  }
 0xc30   :  { %7654 = vset.pattern.permute.xlu1 %v9775_v9 }
 0xc31   :  { %3950 = vperm.xlu1 %7654, %v7848_v21  }
 0xc35   :  { %7657 = vset.pattern.permute.xlu1 %v9907_v12 }
 0xc36   :  { %3971 = vperm.xlu1 %7657, %v7848_v21  }
 0xc3a   :  { %7658 = vset.pattern.permute.xlu1 %v9775_v9 }
 0xc3b   :  { %3945 = vperm.xlu1 %7658, %v7850_v60  }
 0xc3f   :  { %7659 = vset.pattern.permute.xlu1 %v9907_v12 }
 0xc40   :  { %3967 = vperm.xlu1 %7659, %v7850_v60  }
 0xc44   :  { %3975 = vperm.xlu1 %7659, %v7840_v16  }
 0xc48   :  { %7660 = vset.pattern.permute.xlu1 %v9775_v9  ;;  %v3651_v9 = vunpack.c.l.bf16 %v9136_v43  ;;  %v3653_v43 = vunpack.c.l.bf16 %v9134_v4 }
 0xc49   :  { %3717 = vperm.xlu1 %7660, %v3604_v53  }
 0xc68   :  { %v3618_v56 = vpop.permute.xlu1 %3617 }
 0xc69   :  { %v3608_v19 = vpop.permute.xlu0 %3607  ;;  %v3627_v33 = vsel %vm9909_vm6, %v3618_v56, 0.0 }
 0xc6a   :  { %v3625_v31 = vsel %vm9909_vm6, %v3608_v19, 0.0 }
 0xc6d   :  { %v3639_v52 = vpop.permute.xlu1 %3638 }
 0xc6e   :  { %v3631_v57 = vpop.permute.xlu0 %3630  ;;  %v3647_v41 = vsel %vm9911_vm3, %v3639_v52, %v3627_v33  ;;  %v3769_v52 = vunpack.c.l.bf16 %v9158_v34 }
 0xc6f   :  { %v3645_v13 = vsel %vm9911_vm3, %v3631_v57, %v3625_v31  ;;  %v3657_v44 = vmul.f32 %v3653_v43, %v3647_v41 }
 0xc70   :  { %v3655_v22 = vmul.f32 %v3651_v9, %v3645_v13 }
 0xc71   :  { %v3643_v47 = vpop.permute.xlu1 %3642 }
 0xc73   :  { %v3623_v24 = vpop.permute.xlu0 %3622 }
 0xc74   :  { %v3628_v30 = vsel %vm9909_vm6, %v3623_v24, 0.0  ;;  %v3770_v24 = vunpack.c.h.bf16 %v9158_v34  ;;  %v3771_v34 = vunpack.c.l.bf16 %v9156_v55 }
 0xc75   :  { %v3648_v18 = vsel %vm9911_vm3, %v3643_v47, %v3628_v30 }
 0xc76   :  { %v3613_v39 = vpop.permute.xlu1 %3612  ;;  %v3658_v59 = vmul.f32 %v3654_v54, %v3648_v18 }
 0xc77   :  { %v3626_v0 = vsel %vm9909_vm6, %v3613_v39, 0.0  ;;  %v3725_v45 = vpop.permute.xlu0 %3724 }
 0xc78   :  { %v3660_v2 = vpack.c.bf16 %v3658_v59, %v3657_v44  ;;  %v3742_v53 = vsel %vm9909_vm6, %v3725_v45, 0.0  ;;  %v3877_v45 = vunpack.c.l.bf16 %v9178_v46 }
 0xc7b   :  { %v3635_v63 = vpop.permute.xlu1 %3634 }
 0xc7c   :  { %v3646_v35 = vsel %vm9911_vm3, %v3635_v63, %v3626_v0  ;;  %v3748_v4 = vpop.permute.xlu0 %3747  ;;  %v3772_v0 = vunpack.c.h.bf16 %v9156_v55 }
 0xc7d   :  { %v3656_v48 = vmul.f32 %v3652_v37, %v3646_v35  ;;  %v3762_v19 = vsel %vm9911_vm3, %v3748_v4, %v3742_v53 }
 0xc7e   :  { %v3773_v13 = vmul.f32 %v3769_v52, %v3762_v19  ;;  %v3880_v52 = vunpack.c.h.bf16 %v9175_v15 }
 0xc7f   :  { %v3659_v16 = vpack.c.bf16 %v3656_v48, %v3655_v22  ;;  %v7746_v48 = vld [vmem:[%s9268_s30 + $0x8] sm:$0xff]  }
 0xc80   :  { %v3735_v10 = vpop.permute.xlu1 %3734 }
 0xc81   :  { %6714 = vmatpush3.bf16.msra.mxu1 %v3659_v16  ;;  %v3740_v56 = vpop.permute.xlu0 %3739  ;;  %v3744_v9 = vsel %vm9909_vm6, %v3735_v10, 0.0 }
 0xc82   :  { %6715 = vmatprep.subr.bf16.mxu1 %v9891_v51  ;;  %v3745_v57 = vsel %vm9909_vm6, %v3740_v56, 0.0 }
 0xc85   :  { %6716 = vmatpush3.bf16.msra.mxu1 %v3660_v2  ;;  %v3756_v25 = vpop.permute.xlu1 %3755  ;;  %v3833_v43 = vpop.permute.xlu0 %3832 }
 0xc86   :  { %6721 = vmatprep.subr.bf16.mxu1 %v9891_v51  ;;  %v3764_v63 = vsel %vm9911_vm3, %v3756_v25, %v3744_v9  ;;  %v3850_v10 = vsel %vm9909_vm6, %v3833_v43, 0.0  ;;  %v7747_v9 = vld [vmem:[%s9268_s30 + $0x10] sm:$0xff]  }
 0xc87   :  { %v3775_v22 = vmul.f32 %v3771_v34, %v3764_v63 }
 0xc88   :  { %6718 = vmatmul.mubr.msk.bf16.vlgmr.msra.gmra.mrb[40].mxu1 %vm9912_vm13, %v7745_v27 }
 0xc89   :  { %v3760_v21 = vpop.permute.xlu1 %3759  ;;  %6725 = vmatprep.mubr.msk.bf16.mxu1 %vm9892_vm2, %v9891_v51 }
 0xc8a   :  { %v3765_v31 = vsel %vm9911_vm3, %v3760_v21, %v3745_v57  ;;  %v3856_v55 = vpop.permute.xlu0 %3855  ;;  %v3878_v21 = vunpack.c.h.bf16 %v9178_v46  ;;  %v3879_v46 = vunpack.c.l.bf16 %v9175_v15 }
 0xc8b   :  { %v3776_v18 = vmul.f32 %v3772_v0, %v3765_v31  ;;  %v3870_v44 = vsel %vm9911_vm3, %v3856_v55, %v3850_v10 }
 0xc8c   :  { %v3881_v56 = vmul.f32 %v3877_v45, %v3870_v44  ;;  %v3987_v44 = vunpack.c.l.bf16 %v9185_v40 }
 0xc8d   :  { %v3778_v54 = vpack.c.bf16 %v3776_v18, %v3775_v22  ;;  %v3986_v22 = vunpack.c.h.bf16 %v9187_v32 }
 0xc8e   :  { %v3730_v60 = vpop.permute.xlu1 %3729 }
 0xc8f   :  { %v3743_v47 = vsel %vm9909_vm6, %v3730_v60, 0.0  ;;  %v3848_v2 = vpop.permute.xlu0 %3847 }
 0xc90   :  { %v3853_v27 = vsel %vm9909_vm6, %v3848_v2, 0.0  ;;  %v3988_v2 = vunpack.c.h.bf16 %v9185_v40 }
 0xc93   :  { %v3752_v39 = vpop.permute.xlu1 %3751  ;;  %v3941_v0 = vpop.permute.xlu0 %3940 }
 0xc94   :  { %v3763_v30 = vsel %vm9911_vm3, %v3752_v39, %v3743_v47  ;;  %v3958_v63 = vsel %vm9909_vm6, %v3941_v0, 0.0 }
 0xc95   :  { %v3774_v37 = vmul.f32 %v3770_v24, %v3763_v30 }
 0xc97   :  { %v3777_v35 = vpack.c.bf16 %v3774_v37, %v3773_v13 }
 0xc98   :  { %v3843_v33 = vpop.permute.xlu1 %3842  ;;  %v3964_v34 = vpop.permute.xlu0 %3963 }
 0xc99   :  { %6722 = vmatpush3.bf16.msra.mxu1 %v3777_v35  ;;  %v3852_v19 = vsel %vm9909_vm6, %v3843_v33, 0.0  ;;  %v3978_v18 = vsel %vm9911_vm3, %v3964_v34, %v3958_v63  ;;  %v3985_v35 = vunpack.c.l.bf16 %v9187_v32 }
 0xc9a   :  { %6723 = vmatprep.subr.bf16.mxu1 %v9891_v51 }
 0xc9b   :  { %v3989_v43 = vmul.f32 %v3985_v35, %v3978_v18 }
 0xc9d   :  { %6724 = vmatpush3.bf16.msra.mxu1 %v3778_v54  ;;  %v3864_v41 = vpop.permute.xlu1 %3863 }
 0xc9e   :  { %6729 = vmatprep.subr.bf16.mxu1 %v9891_v51  ;;  %v3872_v47 = vsel %vm9911_vm3, %v3864_v41, %v3852_v19 }
 0xc9f   :  { %v3883_v30 = vmul.f32 %v3879_v46, %v3872_v47 }
 0xca0   :  { %6726 = vmatmul.mubr.msk.bf16.vlgmr.msra.gmra.mrb[40].mxu1 %vm9913_vm5, %v7746_v48  ;;  %v3956_v48 = vpop.permute.xlu0 %3955 }
 0xca1   :  { %v3868_v59 = vpop.permute.xlu1 %3867  ;;  %6733 = vmatprep.mubr.msk.bf16.mxu1 %vm9892_vm2, %v9891_v51  ;;  %v3961_v10 = vsel %vm9909_vm6, %v3956_v48, 0.0 }
 0xca2   :  { %v3873_v60 = vsel %vm9911_vm3, %v3868_v59, %v3853_v27 }
 0xca3   :  { %v3884_v24 = vmul.f32 %v3880_v52, %v3873_v60  ;;  %v7748_v60 = vld [vmem:[%s9268_s30 + $0x18] sm:$0xff]   ;;  %s5636_s30 = sld [smem:[%s9701_s0 + %s7928_s25]]  }
 0xca5   :  { %v3886_v13 = vpack.c.bf16 %v3884_v24, %v3883_v30 }
 0xca6   :  { %v3838_v16 = vpop.permute.xlu1 %3837 }
 0xca7   :  { %v3851_v25 = vsel %vm9909_vm6, %v3838_v16, 0.0 }
 0xcab   :  { %v3860_v4 = vpop.permute.xlu1 %3859 }
 0xcac   :  { %v3871_v53 = vsel %vm9911_vm3, %v3860_v4, %v3851_v25 }
 0xcad   :  { %v3882_v57 = vmul.f32 %v3878_v21, %v3871_v53  ;;  %v3713_v53 = vpop.permute.xlu0 %3712 }
 0xcaf   :  { %v3885_v39 = vpack.c.bf16 %v3882_v57, %v3881_v56 }
 0xcb0   :  { %v3951_v31 = vpop.permute.xlu1 %3950 }
 0xcb1   :  { %6730 = vmatpush3.bf16.msra.mxu1 %v3885_v39  ;;  %v3960_v59 = vsel %vm9909_vm6, %v3951_v31, 0.0 }
 0xcb2   :  { %6731 = vmatprep.subr.bf16.mxu1 %v9891_v51 }
 0xcb5   :  { %6732 = vmatpush3.bf16.msra.mxu1 %v3886_v13  ;;  %v3972_v37 = vpop.permute.xlu1 %3971 }
 0xcb6   :  { %6737 = vmatprep.subr.bf16.mxu1 %v9891_v51  ;;  %v3980_v16 = vsel %vm9911_vm3, %v3972_v37, %v3960_v59 }
 0xcb7   :  { %v3991_v25 = vmul.f32 %v3987_v44, %v3980_v16 }
 0xcb8   :  { %6734 = vmatmul.mubr.msk.bf16.vlgmr.msra.gmra.mrb[40].mxu1 %vm9914_vm14, %v7747_v9  ;;  %vm9927_vm14 = vcmask 1039360  }
 0xcb9   :  { %6741 = vmatprep.mubr.msk.bf16.mxu1 %vm9892_vm2, %v9891_v51 }
 0xcba   :  { %v3946_v15 = vpop.permute.xlu1 %3945 }
 0xcbb   :  { %v3959_v33 = vsel %vm9909_vm6, %v3946_v15, 0.0 }
 0xcbf   :  { %v3968_v54 = vpop.permute.xlu1 %3967 }
 0xcc0   :  { %v3979_v41 = vsel %vm9911_vm3, %v3968_v54, %v3959_v33  ;;  %v4204_v54 = vld [vmem:[%s5631_s11] sm:$0xff] }
 0xcc1   :  { %v3990_v55 = vmul.f32 %v3986_v22, %v3979_v41  ;;  %v4205_v22 = vld [vmem:[%s5631_s11 + $0x8] sm:$0xff]  ;;  %s9542_s11 = sld [smem:[%s9701_s0 + %s7930_s7]]  }
 0xcc3   :  { %v3993_v32 = vpack.c.bf16 %v3990_v55, %v3989_v43  ;;  %v3976_v45 = vpop.permute.xlu1 %3975  ;;  %v4213_v55 = vld [vmem:[%s5632_s15 + $0x8] sm:$0xff] }
 0xcc4   :  { %v3981_v27 = vsel %vm9911_vm3, %v3976_v45, %v3961_v10  ;;  %v4212_v10 = vld [vmem:[%s5632_s15] sm:$0xff] }
 0xcc5   :  { %v3992_v21 = vmul.f32 %v3988_v2, %v3981_v27  ;;  %6738 = vmatpush3.bf16.msra.mxu1 %v3993_v32 }
 0xcc6   :  { %6739 = vmatprep.subr.bf16.mxu1 %v9891_v51 }
 0xcc7   :  { %v3994_v4 = vpack.c.bf16 %v3992_v21, %v3991_v25 }
 0xcc8   :  { %v3718_v19 = vpop.permute.xlu1 %3717 }
 0xcc9   :  { %6740 = vmatpush3.bf16.msra.mxu1 %v3994_v4 }
 0xccc   :  { %6742 = vmatmul.mubr.msk.bf16.vlgmr.msra.gmra.mrb[40].mxu1 %vm9915_vm8, %v7748_v60  ;;  %vm9928_vm8 = vmmov %vm9927_vm14 }
 0xd9f   :  { %v4037_v56 = vpop.f32.mrb[40].mxu1 }
 0xda0   :  { %v9390_v52 = vadd.f32 %v4037_v56, %v3713_v53  ;;  %v6743_v40 = vpop.f32.mrb[41].mxu1 }
 0xda1   :  { %v4040_v57 = vpop.f32.mrb[42].mxu1 }
 0xda2   :  { %v9392_v47 = vadd.f32 %v4040_v57, %v3718_v19  ;;  %v6744_v46 = vpop.f32.mrb[43].mxu1  ;;  %6777 = vmatprep.mubr.f32.mxu0 %v9390_v52  ;;  %v4121_v24 = vmul.f32 %v9390_v52, %v9390_v52  ;;  %v7749_v19 = vld [vmem:[%s9441_s2] sm:$0xff]  }
 0xda3   :  { %6817 = vmatprep.mubr.msk.bf16.mxu1 %vm4275_vm15, %v7749_v19 }
 0xda4   :  { %6778 = vmatmul.mubr.f32.vlgmr.msra.gmra.mrb[44].mxu0 %v9392_v47  ;;  %v4122_v39 = vmul.f32 %v9392_v47, %v9392_v47 }
 0xda5   :  { %7142 = vmatpush3.bf16.msra.mxu0 %v8110_v58  ;;  %6812 = vmatprep.mubr.f32.mxu0 %v4121_v24 }
 0xda6   :  { %7144 = vmatprep.subr.bf16.mxu0 %v8114_v61 }
 0xda9   :  { %7146 = vmatpush3.bf16.msra.mxu0 %v8114_v61 }
 0xdaa   :  { %7148 = vmatprep.subr.bf16.mxu0 %v8121_v1 }
 0xdad   :  { %7150 = vmatpush3.bf16.msra.mxu0 %v8121_v1 }
 0xdae   :  { %7152 = vmatprep.subr.bf16.mxu0 %v8127_v6 }
 0xdb1   :  { %7154 = vmatpush3.bf16.msra.mxu0 %v8127_v6 }
 0xdb2   :  { %7156 = vmatprep.subr.bf16.mxu0 %v9900_v50 }
 0xdb5   :  { %7158 = vmatpush3.bf16.msra.mxu0 %v9900_v50 }
 0xdb6   :  { %7160 = vmatprep.subr.bf16.mxu0 %v9903_v62 }
 0xdb9   :  { %7162 = vmatpush3.bf16.msra.mxu0 %v9903_v62 }
 0xdba   :  { %7164 = vmatprep.subr.bf16.mxu0 %v9904_v7 }
 0xdbd   :  { %7166 = vmatpush3.bf16.msra.mxu0 %v9904_v7 }
 0xdbe   :  { %7168 = vmatprep.subr.bf16.mxu0 %v9906_v36 }
 0xdc1   :  { %7170 = vmatpush3.bf16.msra.mxu0 %v9906_v36 }
 0xdc2   :  { %7204 = vmatprep.subr.bf16.mxu0 %v8110_v58 }
 0xdc4   :  { %6813 = vmatmul.mubr.f32.vlgmr.msra.gmra.mrb[46].mxu0 %v4122_v39  ;;  %v4247_v39 = vld [vmem:[%s5634_s23 + $0x18] sm:$0xff] }
 0xdc5   :  { %7206 = vmatpush3.bf16.msra.mxu0 %v8110_v58 }
 0xdc6   :  { %7208 = vmatprep.subr.bf16.mxu0 %v8114_v61 }
 0xdc9   :  { %7210 = vmatpush3.bf16.msra.mxu0 %v8114_v61 }
 0xdca   :  { %7212 = vmatprep.subr.bf16.mxu0 %v8121_v1 }
 0xdcd   :  { %7214 = vmatpush3.bf16.msra.mxu0 %v8121_v1 }
 0xdce   :  { %7216 = vmatprep.subr.bf16.mxu0 %v8127_v6 }
 0xdd1   :  { %7218 = vmatpush3.bf16.msra.mxu0 %v8127_v6 }
 0xdd2   :  { %7220 = vmatprep.subr.bf16.mxu0 %v9900_v50 }
 0xdd5   :  { %7222 = vmatpush3.bf16.msra.mxu0 %v9900_v50 }
 0xdd6   :  { %7224 = vmatprep.subr.bf16.mxu0 %v9903_v62 }
 0xdd9   :  { %7226 = vmatpush3.bf16.msra.mxu0 %v9903_v62 }
 0xdda   :  { %7228 = vmatprep.subr.bf16.mxu0 %v9904_v7 }
 0xddd   :  { %7230 = vmatpush3.bf16.msra.mxu0 %v9904_v7 }
 0xdde   :  { %7232 = vmatprep.subr.bf16.mxu0 %v9906_v36 }
 0xde1   :  { %7234 = vmatpush3.bf16.msra.mxu0 %v9906_v36 }
 0xde2   :  { %7236 = vmatprep.subr.bf16.mxu0 %v8110_v58 }
 0xe77   :  { %v6779_v31 = vpop.f32.mrb[44].mxu0 }
 0xe78   :  { %v4112_v30 = vpop.f32.mrb[45].mxu0  ;;  %v4199_v13 = vmul.f32 %v6779_v31, %v6779_v31 }
 0xe79   :  { %v4198_v9 = vmul.f32 %v4112_v30, %v4112_v30 }
 0xe97   :  { %v6814_v0 = vpop.f32.mrb[46].mxu0 }
 0xe98   :  { %v4201_v37 = vsub.f32 %v6814_v0, %v4199_v13  ;;  %v4189_v15 = vpop.f32.mrb[47].mxu0 }
 0xe99   :  { %v4200_v63 = vsub.f32 %v4189_v15, %v4198_v9 }
 0xe9a   :  { %v4203_v34 = vmax.f32 %v4201_v37, 0.0 }
 0xe9b   :  { %v4202_v18 = vmax.f32 %v4200_v63, 0.0 }
 0xe9c   :  { %v4207_v35 = vadd.f32 1e-05, %v4203_v34 }
 0xe9d   :  { %v4206_v33 = vadd.f32 1e-05, %v4202_v18 }
 0xe9e   :  { %7851 = vrsqrt.f32 %v4207_v35  ;;  %v7750_v35 = vld [vmem:[%s9441_s2 + $0x8] sm:$0xff]  }
 0xe9f   :  { %7853 = vrsqrt.f32 %v4206_v33 }
 0xea8   :  { %v7852_v48 = vpop.eup %7851 }
 0xea9   :  { %v7854_v41 = vpop.eup %7853  ;;  %v4211_v43 = vmul.f32 %v7852_v48, %v4205_v22 }
 0xeaa   :  { %v4210_v59 = vmul.f32 %v7854_v41, %v4204_v54  ;;  %v7751_v54 = vld [vmem:[%s9441_s2 + $0x10] sm:$0xff]   ;;  %v7752_v41 = vld [vmem:[%s9441_s2 + $0x18] sm:$0xff]  }
 0xeab   :  { %4225 = vperm.xlu1 %7660, %v4211_v43   ;;  %v4215_v16 = vmul.f32 %v6779_v31, %v4211_v43  ;;  %v4246_v31 = vld [vmem:[%s5634_s23 + $0x10] sm:$0xff]  ;;  %v7753_v43 = vld [vmem:[%s9441_s2 + $0x20] sm:$0xff]  }
 0xeac   :  { %4220 = vperm.xlu0 %7656, %v4210_v59   ;;  %v4214_v44 = vmul.f32 %v4210_v59, %v4112_v30 }
 0xead   :  { %v4217_v32 = vsub.f32 %v4213_v55, %v4215_v16 }
 0xeae   :  { %v4216_v2 = vsub.f32 %v4212_v10, %v4214_v44 }
 0xeaf   :  { %4237 = vperm.xlu1 %7660, %v4217_v32  }
 0xeb0   :  { %4232 = vperm.xlu0 %7656, %v4216_v2  }
 0xf2a   :  { %v4226_v45 = vpop.permute.xlu1 %4225 }
 0xf2b   :  { %v4221_v27 = vpop.permute.xlu0 %4220  ;;  %v4229_v25 = vmul.f32 %v9392_v47, %v4226_v45  ;;  %v4244_v47 = vld [vmem:[%s5634_s23] sm:$0xff] }
 0xf2c   :  { %v4228_v21 = vmul.f32 %v9390_v52, %v4221_v27  ;;  %v4245_v52 = vld [vmem:[%s5634_s23 + $0x8] sm:$0xff] }
 0xf2e   :  { %v4238_v4 = vpop.permute.xlu1 %4237 }
 0xf2f   :  { %v4241_v60 = vadd.f32 %v4238_v4, %v4229_v25  ;;  %v4233_v53 = vpop.permute.xlu0 %4232 }
 0xf30   :  { %v4240_v56 = vadd.f32 %v4233_v53, %v4228_v21 }
 0xf31   :  { %v4243_v40 = vmax.f32 %v4241_v60, 0.0 }
 0xf32   :  { %v4242_v57 = vmax.f32 %v4240_v56, 0.0 }
 0xf34   :  { %v7666_v46 = vpack.i.bf16 %v4243_v40, %v4242_v57  ;;  %v4360_v24 = vpack.c.bf16 %v4243_v40, %v4242_v57 }
 0xf36   :  { %7667 = vrot.lane.b32.xlu1 %v7666_v46, %s7909_s19  ;;  %7662 = vrot.lane.b32.xlu0 %v7666_v46, %s7895_s18  ;;  %s7927_s18 = smov 37   ;;  %s5614_s19 = sld [smem:[%s9701_s0 + %s7934_s22]]  }
 0xf37   :  { %s5635_s24 = sld [smem:[%s9701_s0 + %s7927_s18]]  }
 0xf3a   :  { %4338 = vperm.xlu1 %7660, %v4245_v52   ;;  %4333 = vperm.xlu0 %7656, %v4244_v47  }
 0xf3e   :  { %4348 = vperm.xlu1 %7660, %v4247_v39   ;;  %4343 = vperm.xlu0 %7656, %v4246_v31  }
 0xfa8   :  { %v7668_v30 = vpop.permute.xlu1 %7667  ;;  %v7663_v13 = vpop.permute.xlu0 %7662 }
 0xfa9   :  { %v7665_v9 = vunpack.i.h.bf16 %v7663_v13  ;;  %v7664_v0 = vunpack.i.l.bf16 %v7663_v13  ;;  %v7670_v37 = vunpack.i.h.bf16 %v7668_v30  ;;  %v7669_v15 = vunpack.i.l.bf16 %v7668_v30 }
 0xfab   :  { %v4261_v63 = vsel %vm9916_vm12, 0.0, %v7665_v9  ;;  %v4260_v34 = vsel %vm9902_vm0, 0.0, %v7664_v0  ;;  %v4442_v33 = vsel %vm1998_vm4, %v7670_v37, 0.0  ;;  %v4441_v22 = vsel %vm1998_vm4, %v7669_v15, 0.0  ;;  %vm9921_vm4 = vmmov %vm9913_vm5 }
 0xfac   :  { %v5890_v18 = vpack.c.bf16 %v4261_v63, %v4260_v34  ;;  %v5909_v48 = vpack.c.bf16 %v4442_v33, %v4441_v22  ;;  %vm9926_vm5 = vmmov %vm9921_vm4 }
 0xfad   :  { %vm9932_vm0 = vmmov %vm9921_vm4 }
 0xfae   :  { %6815 = vmatprep.subr.msk.bf16.mxu1 %vm8756_vm9, %v5890_v18 }
 0xfaf   :  { %6816 = vmatpush3.bf16.msk.msra.mxu1 %vm8756_vm9, %v5890_v18  ;;  %vm9922_vm9 = vcmask 7168  }
 0xfb0   :  { %6821 = vmatprep.subr.bf16.mxu1 %v4360_v24  ;;  %vm9924_vm11 = vmmov %vm9922_vm9 }
 0xfb1   :  { %vm9925_vm13 = vmmov %vm9922_vm9 }
 0xfb2   :  { %6818 = vmatmul.mubr.msk.bf16.vlgmr.msra.gmra.mrb[44].mxu1 %vm4275_vm15, %v7750_v35 }
 0xfb3   :  { %6822 = vmatpush3.bf16.msra.mxu1 %v4360_v24  ;;  %6823 = vmatprep.mubr.msk.bf16.mxu1 %vm4275_vm15, %v7751_v54 }
 0xfb4   :  { %6827 = vmatprep.subr.msk.bf16.mxu1 %vm9048_vm10, %v5909_v48 }
 0xfb9   :  { %v4334_v38 = vpop.permute.xlu0 %4333  ;;  %v4339_v59 = vpop.permute.xlu1 %4338 }
 0xfbd   :  { %v4344_v10 = vpop.permute.xlu0 %4343  ;;  %v4349_v21 = vpop.permute.xlu1 %4348 }
 0xfbe   :  { %6824 = vmatmul.mubr.msk.bf16.vlgmr.msra.gmra.mrb[44].mxu1 %vm4275_vm15, %v7752_v41 }
 0xfbf   :  { %6828 = vmatpush3.bf16.msk.msra.mxu1 %vm9048_vm10, %v5909_v48  ;;  %6829 = vmatprep.mubr.msk.bf16.mxu1 %vm4275_vm15, %v7753_v43  ;;  %v4702_v43 = vld [vmem:[%s5635_s24 + $0x8] sm:$0xff]  ;;  %vm9923_vm10 = vmmov %vm9922_vm9 }
 0xfc0   :  { %7172 = vmatprep.subr.bf16.mxu1 %v8110_v58 }
 0xfca   :  { %6830 = vmatmul.mubr.msk.bf16.vlgmr.msra.gmra.mrb[44].mxu1 %vm4275_vm15, %v7754_v29  ;;  %v4701_v29 = vld [vmem:[%s5635_s24] sm:$0xff]  ;;  %vm9929_vm15 = vmmov %vm9921_vm4 }
 0xfcb   :  { %7174 = vmatpush3.bf16.msra.mxu1 %v8110_v58 }
 0xfcc   :  { %7176 = vmatprep.subr.bf16.mxu1 %v8114_v61 }
 0xfcf   :  { %7178 = vmatpush3.bf16.msra.mxu1 %v8114_v61 }
 0xfd0   :  { %7180 = vmatprep.subr.bf16.mxu1 %v8121_v1 }
 0xfd3   :  { %7182 = vmatpush3.bf16.msra.mxu1 %v8121_v1 }
 0xfd4   :  { %7184 = vmatprep.subr.bf16.mxu1 %v8127_v6 }
 0xfd7   :  { %7186 = vmatpush3.bf16.msra.mxu1 %v8127_v6 }
 0xfd8   :  { %7188 = vmatprep.subr.bf16.mxu1 %v9900_v50 }
 0xfdb   :  { %7190 = vmatpush3.bf16.msra.mxu1 %v9900_v50 }
 0xfdc   :  { %7192 = vmatprep.subr.bf16.mxu1 %v9903_v62 }
 0xfdf   :  { %7194 = vmatpush3.bf16.msra.mxu1 %v9903_v62 }
 0xfe0   :  { %7196 = vmatprep.subr.bf16.mxu1 %v9904_v7 }
 0xfe3   :  { %7198 = vmatpush3.bf16.msra.mxu1 %v9904_v7 }
 0xfe4   :  { %7200 = vmatprep.subr.bf16.mxu1 %v9906_v36 }
 0xfe7   :  { %7202 = vmatpush3.bf16.msra.mxu1 %v9906_v36 }
0x109d   :  { %v6831_v55 = vpop.f32.mrb[44].mxu1 }
0x109e   :  { %v4496_v16 = vpop.f32.mrb[45].mxu1  ;;  %v9492_v2 = vadd.f32 %v6831_v55, %v4344_v10  ;;  %v4718_v10 = vld [vmem:[%s5636_s30 + $0x8] sm:$0xff] }
0x109f   :  { %v9490_v44 = vadd.f32 %v4496_v16, %v4334_v38  ;;  %v6832_v32 = vpop.f32.mrb[46].mxu1 }
0x10a0   :  { %v4499_v45 = vpop.f32.mrb[47].mxu1  ;;  %v9499_v4 = vadd.f32 %v6832_v32, %v4349_v21  ;;  %v4602_v53 = vmul.f32 %v9492_v2, %v9492_v2  ;;  %v4704_v32 = vld [vmem:[%s5635_s24 + $0x18] sm:$0xff]  ;;  %v4703_v21 = vld [vmem:[%s5635_s24 + $0x10] sm:$0xff] }
0x10a1   :  { %v9494_v27 = vadd.f32 %v4499_v45, %v4339_v59  ;;  %6865 = vmatprep.mubr.f32.mxu1 %v9490_v44  ;;  %v4600_v25 = vmul.f32 %v9490_v44, %v9490_v44 }
0x10a2   :  { %v4603_v56 = vmul.f32 %v9499_v4, %v9499_v4 }
0x10a3   :  { %v4601_v60 = vmul.f32 %v9494_v27, %v9494_v27  ;;  %6866 = vmatmul.mubr.f32.vlgmr.msra.gmra.mrb[48].mxu1 %v9494_v27  ;;  %6903 = vmatprep.mubr.f32.mxu0 %v4600_v25  ;;  %v4717_v25 = vld [vmem:[%s5636_s30] sm:$0xff] }
0x10a4   :  { %6868 = vmatprep.mubr.f32.mxu1 %v9492_v2 }
0x10a5   :  { %6904 = vmatmul.mubr.f32.vlgmr.msra.gmra.mrb[48].mxu0 %v4601_v60 }
0x10a6   :  { %6906 = vmatprep.mubr.f32.mxu0 %v4602_v53  ;;  %7238 = vmatpush3.bf16.msra.mxu0 %v8110_v58 }
0x10a7   :  { %6869 = vmatmul.mubr.f32.gmra.mrb[50].mxu1 %v9499_v4  ;;  %7240 = vmatprep.subr.bf16.mxu0 %v8114_v61 }
0x10a9   :  { %6907 = vmatmul.mubr.f32.gmra.mrb[50].mxu0 %v4603_v56 }
0x10aa   :  { %7242 = vmatpush3.bf16.msra.mxu0 %v8114_v61 }
0x10ab   :  { %7244 = vmatprep.subr.bf16.mxu0 %v8121_v1 }
0x10ae   :  { %7246 = vmatpush3.bf16.msra.mxu0 %v8121_v1 }
0x10af   :  { %7248 = vmatprep.subr.bf16.mxu0 %v8127_v6 }
0x10b2   :  { %7250 = vmatpush3.bf16.msra.mxu0 %v8127_v6 }
0x10b3   :  { %7252 = vmatprep.subr.bf16.mxu0 %v9900_v50 }
0x10b6   :  { %7254 = vmatpush3.bf16.msra.mxu0 %v9900_v50 }
0x10b7   :  { %7256 = vmatprep.subr.bf16.mxu0 %v9903_v62 }
0x10ba   :  { %7258 = vmatpush3.bf16.msra.mxu0 %v9903_v62 }
0x10bb   :  { %7260 = vmatprep.subr.bf16.mxu0 %v9904_v7 }
0x10be   :  { %7262 = vmatpush3.bf16.msra.mxu0 %v9904_v7 }
0x10bf   :  { %7264 = vmatprep.subr.bf16.mxu0 %v9906_v36 }
0x10c2   :  { %7266 = vmatpush3.bf16.msra.mxu0 %v9906_v36 }
0x10c3   :  { %7009 = vmatprep.subr.bf16.mxu0 %v7955_v3 }
0x1176   :  { %v6867_v19 = vpop.f32.mrb[48].mxu1 }
0x1177   :  { %v4690_v40 = vmul.f32 %v6867_v19, %v6867_v19  ;;  %v4581_v57 = vpop.f32.mrb[49].mxu1 }
0x1178   :  { %v4689_v46 = vmul.f32 %v4581_v57, %v4581_v57  ;;  %v6905_v24 = vpop.f32.mrb[48].mxu0 }
0x1179   :  { %v4694_v52 = vsub.f32 %v6905_v24, %v4690_v40  ;;  %v4670_v47 = vpop.f32.mrb[49].mxu0 }
0x117a   :  { %v4693_v39 = vsub.f32 %v4670_v47, %v4689_v46  ;;  %v6870_v31 = vpop.f32.mrb[50].mxu1 }
0x117b   :  { %v4698_v30 = vmax.f32 %v4694_v52, 0.0  ;;  %v4692_v13 = vmul.f32 %v6870_v31, %v6870_v31  ;;  %v4591_v9 = vpop.f32.mrb[51].mxu1 }
0x117c   :  { %v4697_v0 = vmax.f32 %v4693_v39, 0.0  ;;  %v4691_v37 = vmul.f32 %v4591_v9, %v4591_v9  ;;  %v6908_v15 = vpop.f32.mrb[50].mxu0 }
0x117d   :  { %v4706_v63 = vadd.f32 1e-05, %v4698_v30  ;;  %v4696_v34 = vsub.f32 %v6908_v15, %v4692_v13  ;;  %v4680_v18 = vpop.f32.mrb[51].mxu0  ;;  %v4720_v30 = vld [vmem:[%s5636_s30 + $0x18] sm:$0xff]  ;;  %v4719_v13 = vld [vmem:[%s5636_s30 + $0x10] sm:$0xff] }
0x117e   :  { %v4705_v35 = vadd.f32 1e-05, %v4697_v0  ;;  %v4695_v33 = vsub.f32 %v4680_v18, %v4691_v37 }
0x117f   :  { %7855 = vrsqrt.f32 %v4706_v63  ;;  %v4700_v22 = vmax.f32 %v4696_v34, 0.0 }
0x1180   :  { %7857 = vrsqrt.f32 %v4705_v35  ;;  %v4699_v54 = vmax.f32 %v4695_v33, 0.0  ;;  %v9917_v33 = vld [vmem:[#allocation12_spill] sm:$0xff] }
0x1181   :  { %v4708_v48 = vadd.f32 1e-05, %v4700_v22  ;;  %v9918_v22 = vld [vmem:[#allocation13_spill] sm:$0xff] }
0x1182   :  { %v4707_v41 = vadd.f32 1e-05, %v4699_v54 }
0x1183   :  { %7859 = vrsqrt.f32 %v4708_v48 }
0x1184   :  { %7861 = vrsqrt.f32 %v4707_v41 }
0x1189   :  { %v7856_v38 = vpop.eup %7855 }
0x118a   :  { %v7858_v59 = vpop.eup %7857  ;;  %v4714_v55 = vmul.f32 %v7856_v38, %v4702_v43 }
0x118b   :  { %v4713_v16 = vmul.f32 %v7858_v59, %v4701_v29 }
0x118c   :  { %4736 = vperm.xlu1 %7660, %v4714_v55   ;;  %v4722_v45 = vmul.f32 %v6867_v19, %v4714_v55 }
0x118d   :  { %v7860_v60 = vpop.eup %7859  ;;  %4731 = vperm.xlu0 %7656, %v4713_v16   ;;  %v4721_v53 = vmul.f32 %v4713_v16, %v4581_v57 }
0x118e   :  { %v7862_v56 = vpop.eup %7861  ;;  %v4726_v40 = vsub.f32 %v4718_v10, %v4722_v45  ;;  %v4716_v46 = vmul.f32 %v7860_v60, %v4704_v32  ;;  %v7755_v10 = vld [vmem:[%s9542_s11] sm:$0xff]  }
0x118f   :  { %v4725_v24 = vsub.f32 %v4717_v25, %v4721_v53  ;;  %v4715_v52 = vmul.f32 %v7862_v56, %v4703_v21  ;;  %v9919_v32 = vld [vmem:[#allocation14_spill] sm:$0xff]  ;;  %v9920_v21 = vld [vmem:[#allocation15_spill] sm:$0xff]  ;;  %6913 = vmatprep.mubr.msk.bf16.mxu1 %vm9921_vm4, %v7755_v10  ;;  %vm9933_vm4 = vmmov %vm9932_vm0 }
0x1190   :  { %4760 = vperm.xlu1 %7660, %v4726_v40   ;;  %v4724_v47 = vmul.f32 %v6870_v31, %v4716_v46  ;;  %v4781_v25 = vld [vmem:[%s5610_s6] sm:$0xff]  ;;  %v4782_v56 = vld [vmem:[%s5610_s6 + $0x8] sm:$0xff]  ;;  %v4784_v40 = vld [vmem:[%s5610_s6 + $0x18] sm:$0xff] }
0x1191   :  { %4755 = vperm.xlu0 %7656, %v4725_v24   ;;  %v4723_v39 = vmul.f32 %v4715_v52, %v4591_v9 }
0x1192   :  { %v4728_v0 = vsub.f32 %v4720_v30, %v4724_v47 }
0x1193   :  { %v4727_v19 = vsub.f32 %v4719_v13, %v4723_v39 }
0x1194   :  { %4746 = vperm.xlu1 %7660, %v4716_v46  }
0x1195   :  { %4741 = vperm.xlu0 %7656, %v4715_v52  }
0x1198   :  { %4770 = vperm.xlu1 %7660, %v4728_v0  }
0x1199   :  { %4765 = vperm.xlu0 %7656, %v4727_v19  }
0x120b   :  { %v4737_v37 = vpop.permute.xlu1 %4736 }
0x120c   :  { %v4732_v15 = vpop.permute.xlu0 %4731  ;;  %v4750_v57 = vmul.f32 %v9494_v27, %v4737_v37 }
0x120d   :  { %v4749_v63 = vmul.f32 %v9490_v44, %v4732_v15 }
0x120f   :  { %v4761_v34 = vpop.permute.xlu1 %4760 }
0x1210   :  { %v4774_v18 = vadd.f32 %v4761_v34, %v4750_v57  ;;  %v4756_v35 = vpop.permute.xlu0 %4755  ;;  %v7756_v34 = vld [vmem:[%s9542_s11 + $0x8] sm:$0xff]  }
0x1211   :  { %v4773_v31 = vadd.f32 %v4756_v35, %v4749_v63 }
0x1212   :  { %v4778_v9 = vadd.f32 %v4774_v18, %v9917_v33 }
0x1213   :  { %v4777_v54 = vadd.f32 %v4773_v31, %v9918_v22  ;;  %v4747_v48 = vpop.permute.xlu1 %4746  ;;  %v7757_v31 = vld [vmem:[%s9542_s11 + $0x10] sm:$0xff]  }
0x1214   :  { %v4742_v44 = vpop.permute.xlu0 %4741  ;;  %v4752_v43 = vmul.f32 %v9499_v4, %v4747_v48 }
0x1215   :  { %v7671_v27 = vpack.i.bf16 %v4778_v9, %v4777_v54  ;;  %v4909_v41 = vpack.c.bf16 %v4778_v9, %v4777_v54  ;;  %v4751_v29 = vmul.f32 %v9492_v2, %v4742_v44  ;;  %v4783_v2 = vld [vmem:[%s5610_s6 + $0x10] sm:$0xff]  ;;  %v7758_v44 = vld [vmem:[%s9542_s11 + $0x18] sm:$0xff]  }
0x1217   :  { %v4771_v38 = vpop.permute.xlu1 %4770  ;;  %7672 = vrot.lane.b32.xlu0 %v7671_v27, %s7897_s26 }
0x1218   :  { %v4776_v59 = vadd.f32 %v4771_v38, %v4752_v43  ;;  %v4766_v55 = vpop.permute.xlu0 %4765 }
0x1219   :  { %v4775_v16 = vadd.f32 %v4766_v55, %v4751_v29  ;;  %v7759_v29 = vld [vmem:[%s9542_s11 + $0x20] sm:$0xff]  }
0x121a   :  { %v4780_v45 = vadd.f32 %v4776_v59, %v9919_v32 }
0x121b   :  { %v4779_v60 = vadd.f32 %v4775_v16, %v9920_v21  ;;  %7682 = vrot.lane.b32.xlu0 %v7671_v27, %s7898_s27 }
0x121d   :  { %v7676_v53 = vpack.i.bf16 %v4780_v45, %v4779_v60  ;;  %v4910_v4 = vpack.c.bf16 %v4780_v45, %v4779_v60 }
0x121f   :  { %4882 = vperm.xlu0 %7656, %v4781_v25   ;;  %7677 = vrot.lane.b32.xlu1 %v7676_v53, %s7897_s26  ;;  %s7931_s26 = smov 13  }
0x1220   :  { %s5611_s13 = sld [smem:[%s9701_s0 + %s7931_s26]]  }
0x1223   :  { %4892 = vperm.xlu0 %7656, %v4783_v2   ;;  %7687 = vrot.lane.b32.xlu1 %v7676_v53, %s7898_s27 }
0x1227   :  { %4887 = vperm.xlu1 %7660, %v4782_v56  }
0x122b   :  { %4897 = vperm.xlu1 %7660, %v4784_v40  }
0x1289   :  { %v7673_v46 = vpop.permute.xlu0 %7672 }
0x128a   :  { %v7675_v24 = vunpack.i.h.bf16 %v7673_v46  ;;  %v7674_v52 = vunpack.i.l.bf16 %v7673_v46 }
0x128c   :  { %v4806_v47 = vsel %vm9922_vm9, 0.0, %v7675_v24  ;;  %v4805_v39 = vsel %vm9923_vm10, 0.0, %v7674_v52  ;;  %vm9934_vm9 = vmmov %vm9932_vm0  ;;  %vm5458_vm10 = vcmask 1043456  }
0x128d   :  { %v5916_v30 = vpack.c.bf16 %v4806_v47, %v4805_v39  ;;  %v7683_v57 = vpop.permute.xlu0 %7682 }
0x128e   :  { %v7685_v18 = vunpack.i.h.bf16 %v7683_v57  ;;  %v7684_v35 = vunpack.i.l.bf16 %v7683_v57 }
0x128f   :  { %6909 = vmatprep.subr.msk.bf16.mxu1 %vm9863_vm7, %v5916_v30 }
0x1290   :  { %6910 = vmatpush3.bf16.msk.msra.mxu1 %vm9863_vm7, %v5916_v30  ;;  %v4998_v33 = vsel %vm9927_vm14, %v7685_v18, 0.0  ;;  %v4997_v9 = vsel %vm9928_vm8, %v7684_v35, 0.0  ;;  %v5265_v35 = vld [vmem:[%s5611_s13 + $0x18] sm:$0xff] }
0x1291   :  { %v7678_v13 = vpop.permute.xlu1 %7677  ;;  %v5938_v54 = vpack.c.bf16 %v4998_v33, %v4997_v9 }
0x1292   :  { %v7680_v0 = vunpack.i.h.bf16 %v7678_v13  ;;  %v7679_v19 = vunpack.i.l.bf16 %v7678_v13 }
0x1294   :  { %v4808_v37 = vsel %vm9924_vm11, 0.0, %v7680_v0  ;;  %v4807_v15 = vsel %vm9925_vm13, 0.0, %v7679_v19 }
0x1295   :  { %v5919_v63 = vpack.c.bf16 %v4808_v37, %v4807_v15  ;;  %v7688_v22 = vpop.permute.xlu1 %7687  ;;  %v5263_v37 = vld [vmem:[%s5611_s13 + $0x8] sm:$0xff]  ;;  %v5262_v15 = vld [vmem:[%s5611_s13] sm:$0xff] }
0x1296   :  { %v7690_v48 = vunpack.i.h.bf16 %v7688_v22  ;;  %v7689_v42 = vunpack.i.l.bf16 %v7688_v22 }
0x1297   :  { %6911 = vmatprep.subr.msk.bf16.mxu1 %vm9863_vm7, %v5919_v63 }
0x1298   :  { %6912 = vmatpush3.bf16.msk.msra.mxu1 %vm9863_vm7, %v5919_v63  ;;  %vm9930_vm7 = vmmov %vm9928_vm8 }
0x1299   :  { %6917 = vmatprep.subr.bf16.mxu1 %v4909_v41  ;;  %v5000_v27 = vsel %vm9930_vm7, %v7690_v48, 0.0  ;;  %vm9931_vm12 = vmmov %vm9930_vm7 }
0x129a   :  { %v4999_v43 = vsel %vm9931_vm12, %v7689_v42, 0.0 }
0x129b   :  { %6914 = vmatmul.mubr.msk.bf16.vlgmr.msra.gmra.mrb[52].mxu1 %vm9926_vm5, %v7756_v34  ;;  %v5941_v38 = vpack.c.bf16 %v5000_v27, %v4999_v43  ;;  %v5278_v27 = vld [vmem:[%s5612_s3] sm:$0xff] }
0x129c   :  { %6918 = vmatpush3.bf16.msra.mxu1 %v4909_v41  ;;  %6921 = vmatprep.mubr.msk.bf16.mxu1 %vm9929_vm15, %v7757_v31  ;;  %v7760_v41 = vld [vmem:[%s9542_s11 + $0x28] sm:$0xff]   ;;  %v5264_v31 = vld [vmem:[%s5611_s13 + $0x10] sm:$0xff] }
0x129d   :  { %6919 = vmatprep.subr.bf16.mxu1 %v4910_v4 }
0x12a0   :  { %6920 = vmatpush3.bf16.msra.mxu1 %v4910_v4 }
0x12a1   :  { %6925 = vmatprep.subr.msk.bf16.mxu1 %vm9874_vm1, %v5938_v54 }
0x12a7   :  { %6922 = vmatmul.mubr.msk.bf16.vlgmr.msra.gmra.mrb[52].mxu1 %vm9932_vm0, %v7758_v44  ;;  %v5279_v44 = vld [vmem:[%s5612_s3 + $0x8] sm:$0xff] }
0x12a8   :  { %6926 = vmatpush3.bf16.msk.msra.mxu1 %vm9874_vm1, %v5938_v54  ;;  %6929 = vmatprep.mubr.msk.bf16.mxu1 %vm9933_vm4, %v7759_v29 }
0x12a9   :  { %6927 = vmatprep.subr.msk.bf16.mxu1 %vm9874_vm1, %v5941_v38 }
0x12ac   :  { %6928 = vmatpush3.bf16.msk.msra.mxu1 %vm9874_vm1, %v5941_v38  ;;  %vm9935_vm1 = vmmov %vm9932_vm0 }
0x12ad   :  { %7268 = vmatprep.subr.bf16.mxu1 %v8110_v58 }
0x12b3   :  { %6930 = vmatmul.mubr.msk.bf16.vlgmr.msra.gmra.mrb[52].mxu1 %vm9934_vm9, %v7760_v41 }
0x12b4   :  { %7270 = vmatpush3.bf16.msra.mxu1 %v8110_v58  ;;  %v4883_v58 = vpop.permute.xlu0 %4882 }
0x12b5   :  { %7272 = vmatprep.subr.bf16.mxu1 %v8114_v61 }
0x12b8   :  { %7274 = vmatpush3.bf16.msra.mxu1 %v8114_v61  ;;  %v4888_v61 = vpop.permute.xlu1 %4887  ;;  %v4893_v11 = vpop.permute.xlu0 %4892 }
0x12b9   :  { %7276 = vmatprep.subr.bf16.mxu1 %v8121_v1 }
0x12bc   :  { %7278 = vmatpush3.bf16.msra.mxu1 %v8121_v1 }
0x12bd   :  { %7280 = vmatprep.subr.bf16.mxu1 %v8127_v6 }
0x12c0   :  { %7282 = vmatpush3.bf16.msra.mxu1 %v8127_v6 }
0x12c1   :  { %7284 = vmatprep.subr.bf16.mxu1 %v9900_v50 }
0x12c4   :  { %7286 = vmatpush3.bf16.msra.mxu1 %v9900_v50 }
0x12c5   :  { %7288 = vmatprep.subr.bf16.mxu1 %v9903_v62 }
0x12c8   :  { %7290 = vmatpush3.bf16.msra.mxu1 %v9903_v62 }
0x12c9   :  { %7292 = vmatprep.subr.bf16.mxu1 %v9904_v7 }
0x12cc   :  { %7294 = vmatpush3.bf16.msra.mxu1 %v9904_v7 }
0x12cd   :  { %7296 = vmatprep.subr.bf16.mxu1 %v9906_v36 }
0x12d0   :  { %7298 = vmatpush3.bf16.msra.mxu1 %v9906_v36  ;;  %v4898_v36 = vpop.permute.xlu1 %4897 }
0x12d1   :  { %7029 = vmatprep.subr.bf16.mxu1 %v9891_v51 }
0x1386   :  { %v6931_v1 = vpop.f32.mrb[52].mxu1 }
0x1387   :  { %v5057_v6 = vpop.f32.mrb[53].mxu1  ;;  %v9607_v55 = vadd.f32 %v6931_v1, %v4893_v11 }
0x1388   :  { %v9605_v50 = vadd.f32 %v5057_v6, %v4883_v58  ;;  %v6932_v59 = vpop.f32.mrb[54].mxu1  ;;  %v5281_v58 = vld [vmem:[%s5612_s3 + $0x18] sm:$0xff] }
0x1389   :  { %v5060_v62 = vpop.f32.mrb[55].mxu1  ;;  %v9614_v10 = vadd.f32 %v6932_v59, %v4898_v36  ;;  %v5163_v45 = vmul.f32 %v9607_v55, %v9607_v55 }
0x138a   :  { %v9609_v16 = vadd.f32 %v5060_v62, %v4888_v61  ;;  %6965 = vmatprep.mubr.f32.mxu0 %v9605_v50  ;;  %v5161_v7 = vmul.f32 %v9605_v50, %v9605_v50  ;;  %v5280_v61 = vld [vmem:[%s5612_s3 + $0x10] sm:$0xff] }
0x138b   :  { %v5164_v25 = vmul.f32 %v9614_v10, %v9614_v10 }
0x138c   :  { %v5162_v32 = vmul.f32 %v9609_v16, %v9609_v16  ;;  %6966 = vmatmul.mubr.f32.vlgmr.msra.gmra.mrb[52].mxu0 %v9609_v16  ;;  %7003 = vmatprep.mubr.f32.mxu1 %v5161_v7 }
0x138d   :  { %6968 = vmatprep.mubr.f32.mxu0 %v9607_v55  ;;  %7010 = vmatpush3.bf16.msra.mxu0 %v7955_v3 }
0x138e   :  { %7004 = vmatmul.mubr.f32.vlgmr.msra.gmra.mrb[56].mxu1 %v5162_v32  ;;  %7011 = vmatprep.subr.bf16.mxu0 %v7958_v5 }
0x138f   :  { %7006 = vmatprep.mubr.f32.mxu1 %v5163_v45 }
0x1390   :  { %6969 = vmatmul.mubr.f32.gmra.mrb[54].mxu0 %v9614_v10 }
0x1391   :  { %7012 = vmatpush3.bf16.msra.mxu0 %v7958_v5 }
0x1392   :  { %7007 = vmatmul.mubr.f32.gmra.mrb[58].mxu1 %v5164_v25  ;;  %7013 = vmatprep.subr.bf16.mxu0 %v7965_v8 }
0x1393   :  { %7033 = vmatprep.mubr.msk.bf16.mxu1 %vm9892_vm2, %v9891_v51  ;;  %vm5451_vm2 = vcmask 64512  }
0x1395   :  { %7014 = vmatpush3.bf16.msra.mxu0 %v7965_v8 }
0x1396   :  { %7015 = vmatprep.subr.bf16.mxu0 %v7979_v14 }
0x1399   :  { %7016 = vmatpush3.bf16.msra.mxu0 %v7979_v14 }
0x139a   :  { %7017 = vmatprep.subr.bf16.mxu0 %v7985_v17 }
0x139d   :  { %7018 = vmatpush3.bf16.msra.mxu0 %v7985_v17 }
0x139e   :  { %7019 = vmatprep.subr.bf16.mxu0 %v7991_v20 }
0x13a1   :  { %7020 = vmatpush3.bf16.msra.mxu0 %v7991_v20 }
0x13a2   :  { %7021 = vmatprep.subr.bf16.mxu0 %v7997_v23 }
0x13a5   :  { %7022 = vmatpush3.bf16.msra.mxu0 %v7997_v23 }
0x13a6   :  { %7023 = vmatprep.subr.bf16.mxu0 %v8003_v26 }
0x13a9   :  { %7024 = vmatpush3.bf16.msra.mxu0 %v8003_v26 }
0x145f   :  { %v6967_v3 = vpop.f32.mrb[52].mxu0 }
0x1460   :  { %v5251_v5 = vmul.f32 %v6967_v3, %v6967_v3  ;;  %v5142_v8 = vpop.f32.mrb[53].mxu0 }
0x1461   :  { %v5250_v14 = vmul.f32 %v5142_v8, %v5142_v8  ;;  %v7005_v21 = vpop.f32.mrb[56].mxu1 }
0x1462   :  { %v5255_v60 = vsub.f32 %v7005_v21, %v5251_v5  ;;  %v5231_v53 = vpop.f32.mrb[57].mxu1 }
0x1463   :  { %v5254_v17 = vsub.f32 %v5231_v53, %v5250_v14  ;;  %v6970_v4 = vpop.f32.mrb[54].mxu0 }
0x1464   :  { %v5259_v2 = vmax.f32 %v5255_v60, 0.0  ;;  %v5253_v56 = vmul.f32 %v6970_v4, %v6970_v4  ;;  %v5152_v20 = vpop.f32.mrb[55].mxu0 }
0x1465   :  { %v5258_v40 = vmax.f32 %v5254_v17, 0.0  ;;  %v5252_v46 = vmul.f32 %v5152_v20, %v5152_v20  ;;  %v7008_v24 = vpop.f32.mrb[58].mxu1 }
0x1466   :  { %v5267_v23 = vadd.f32 1e-05, %v5259_v2  ;;  %v5257_v52 = vsub.f32 %v7008_v24, %v5253_v56  ;;  %v5241_v47 = vpop.f32.mrb[59].mxu1 }
0x1467   :  { %v5266_v39 = vadd.f32 1e-05, %v5258_v40  ;;  %v5256_v26 = vsub.f32 %v5241_v47, %v5252_v46  ;;  %v5389_v40 = vld [vmem:[%s5613_s21] sm:$0xf] }
0x1468   :  { %7863 = vrsqrt.f32 %v5267_v23  ;;  %v5261_v30 = vmax.f32 %v5257_v52, 0.0  ;;  %v7761_v46 = vld [vmem:[%s5614_s19] sm:$0xff]  }
0x1469   :  { %7865 = vrsqrt.f32 %v5266_v39  ;;  %v5260_v13 = vmax.f32 %v5256_v26, 0.0 }
0x146a   :  { %v5269_v0 = vadd.f32 1e-05, %v5261_v30  ;;  %v7762_v30 = vld [vmem:[%s5614_s19 + $0x8] sm:$0xff]  }
0x146b   :  { %v5268_v19 = vadd.f32 1e-05, %v5260_v13 }
0x146c   :  { %7867 = vrsqrt.f32 %v5269_v0 }
0x146d   :  { %7869 = vrsqrt.f32 %v5268_v19 }
0x1472   :  { %v7864_v57 = vpop.eup %7863 }
0x1473   :  { %v7866_v63 = vpop.eup %7865  ;;  %v5275_v34 = vmul.f32 %v7864_v57, %v5263_v37 }
0x1474   :  { %v5274_v18 = vmul.f32 %v7866_v63, %v5262_v15 }
0x1475   :  { %5297 = vperm.xlu1 %7660, %v5275_v34   ;;  %v5283_v33 = vmul.f32 %v6967_v3, %v5275_v34 }
0x1476   :  { %v7868_v9 = vpop.eup %7867  ;;  %5292 = vperm.xlu0 %7656, %v5274_v18   ;;  %v5282_v22 = vmul.f32 %v5274_v18, %v5142_v8 }
0x1477   :  { %v7870_v54 = vpop.eup %7869  ;;  %v5277_v48 = vmul.f32 %v7868_v9, %v5265_v35  ;;  %v5287_v38 = vsub.f32 %v5279_v44, %v5283_v33 }
0x1478   :  { %v5276_v42 = vmul.f32 %v7870_v54, %v5264_v31  ;;  %v5286_v41 = vsub.f32 %v5278_v27, %v5282_v22 }
0x1479   :  { %5307 = vperm.xlu1 %7660, %v5277_v48   ;;  %v5285_v43 = vmul.f32 %v6970_v4, %v5277_v48 }
0x147a   :  { %5302 = vperm.xlu0 %7656, %v5276_v42   ;;  %v5284_v29 = vmul.f32 %v5276_v42, %v5152_v20 }
0x147b   :  { %v5289_v1 = vsub.f32 %v5281_v58, %v5285_v43 }
0x147c   :  { %v5288_v6 = vsub.f32 %v5280_v61, %v5284_v29 }
0x147d   :  { %5321 = vperm.xlu1 %7660, %v5287_v38  }
0x147e   :  { %5316 = vperm.xlu0 %7656, %v5286_v41  }
0x1481   :  { %5331 = vperm.xlu1 %7660, %v5289_v1  }
0x1482   :  { %5326 = vperm.xlu0 %7656, %v5288_v6  }
0x14f4   :  { %v5298_v11 = vpop.permute.xlu1 %5297 }
0x14f5   :  { %v5293_v59 = vpop.permute.xlu0 %5292  ;;  %v5311_v36 = vmul.f32 %v9609_v16, %v5298_v11 }
0x14f6   :  { %v5310_v32 = vmul.f32 %v9605_v50, %v5293_v59 }
0x14f8   :  { %v5308_v62 = vpop.permute.xlu1 %5307 }
0x14f9   :  { %v5303_v7 = vpop.permute.xlu0 %5302  ;;  %v5313_v8 = vmul.f32 %v9614_v10, %v5308_v62 }
0x14fa   :  { %v5312_v14 = vmul.f32 %v9607_v55, %v5303_v7 }
0x14fc   :  { %v5322_v45 = vpop.permute.xlu1 %5321 }
0x14fd   :  { %v9650_v25 = vadd.f32 %v5322_v45, %v5311_v36  ;;  %v5317_v3 = vpop.permute.xlu0 %5316  ;;  %v9936_v36 = vld [vmem:[#allocation4_spill] sm:$0xff] }
0x14fe   :  { %v9652_v5 = vadd.f32 %v5317_v3, %v5310_v32 }
0x1500   :  { %v5338_v21 = vpack.c.bf16 %v9650_v25, %v9652_v5  ;;  %v5332_v60 = vpop.permute.xlu1 %5331 }
0x1501   :  { %v9658_v53 = vadd.f32 %v5332_v60, %v5313_v8  ;;  %v5327_v17 = vpop.permute.xlu0 %5326 }
0x1502   :  { %v9660_v16 = vadd.f32 %v5327_v17, %v5312_v14  ;;  %7025 = vmatprep.mubr.bf16.mxu0 %v5338_v21 }
0x1504   :  { %v5339_v50 = vpack.c.bf16 %v9658_v53, %v9660_v16 }
0x1506   :  { %7026 = vmatmul.mubr.bf16.vlgmr.msra.gmra.mrb[56].mxu0 %v5339_v50 }
0x15d9   :  { %v7027_v4 = vpop.f32.mrb[56].mxu0 }
0x15da   :  { %v5374_v2 = vpop.f32.mrb[57].mxu0 }
0x15db   :  { %v7028_v56 = vpop.f32.mrb[58].mxu0 }
0x15dc   :  { %v5391_v55 = vpack.c.bf16 %v7028_v56, %v7027_v4  ;;  %v5377_v10 = vpop.f32.mrb[59].mxu0  ;;  %v9938_v56 = vld [vmem:[#allocation7_spill] sm:$0xff] }
0x15dd   :  { %v5390_v20 = vpack.c.bf16 %v5377_v10, %v5374_v2 }
0x15df   :  { %7030 = vmatpush3.bf16.msra.mxu1 %v5390_v20  ;;  %v9939_v20 = vld [vmem:[#allocation6_spill] sm:$0xff] }
0x15e0   :  { %7031 = vmatprep.subr.bf16.mxu1 %v9891_v51 }
0x15e3   :  { %7032 = vmatpush3.bf16.msra.mxu1 %v5391_v55 }
0x15e6   :  { %7034 = vmatmul.mubr.msk.bf16.vlgmr.msra.gmra.mrb[60].mxu1 %vm9935_vm1, %v5389_v40 }
0x15e7   :  { %7039 = vmatprep.mubr.msk.bf16.mxu1 %vm5451_vm2, %v7761_v46 }
0x16b9   :  { %v5429_v24 = vpop.f32.mrb[60].mxu1 }
0x16ba   :  { %v5435_v23 = vmax.f32 %v5429_v24, 0.0  ;;  %v7035_v52 = vpop.f32.mrb[61].mxu1 }
0x16bb   :  { %v5432_v47 = vpop.f32.mrb[62].mxu1 }
0x16bc   :  { %v5440_v39 = vpack.c.bf16 %v5435_v23, %v5435_v23  ;;  %v7036_v26 = vpop.f32.mrb[63].mxu1 }
0x16be   :  { %v5460_v51 = vsel %vm5458_vm10, %v5440_v39, 0  ;;  %7411 = vmatprep.subr.msk.bf16.mxu1 %vm5458_vm10, %v5440_v39 }
0x16bf   :  { %7038 = vmatpush3.bf16.msra.mxu1 %v5460_v51 }
0x16c2   :  { %7040 = vmatmul.mubr.msk.bf16.vlgmr.msra.gmra.mrb[64].mxu1 %vm5451_vm2, %v7762_v30 }
0x1795   :  { %v7041_v13 = vpop.f32.mrb[64].mxu1 }
0x1796   :  { %v5952_v0 = vmul.f32 -1.442695, %v7041_v13  ;;  %v5496_v19 = vpop.f32.mrb[65].mxu1 }
0x1797   :  { %v5950_v37 = vmul.f32 -1.442695, %v5496_v19  ;;  %v7042_v15 = vpop.f32.mrb[66].mxu1 }
0x1798   :  { %7871 = vpow2.f32 %v5952_v0  ;;  %v5953_v57 = vmul.f32 -1.442695, %v7042_v15  ;;  %v5499_v63 = vpop.f32.mrb[67].mxu1 }
0x1799   :  { %7873 = vpow2.f32 %v5950_v37  ;;  %v5951_v34 = vmul.f32 -1.442695, %v5499_v63 }
0x179a   :  { %7875 = vpow2.f32 %v5953_v57 }
0x179b   :  { %7877 = vpow2.f32 %v5951_v34 }
0x17a2   :  { %v7872_v18 = vpop.eup %7871 }
0x17a3   :  { %v7874_v35 = vpop.eup %7873  ;;  %v5525_v31 = vadd.f32 1.0, %v7872_v18 }
0x17a4   :  { %v7876_v33 = vpop.eup %7875  ;;  %v5523_v22 = vadd.f32 1.0, %v7874_v35 }
0x17a5   :  { %v7878_v9 = vpop.eup %7877  ;;  %7879 = vrcp.f32 %v5525_v31  ;;  %v5526_v54 = vadd.f32 1.0, %v7876_v33 }
0x17a6   :  { %v5524_v48 = vadd.f32 1.0, %v7878_v9 }
0x17a7   :  { %7881 = vrcp.f32 %v5526_v54 }
0x17a8   :  { %7883 = vrcp.f32 %v5523_v22 }
0x17a9   :  { %7885 = vrcp.f32 %v5524_v48 }
0x17af   :  { %v7880_v42 = vpop.eup %7879 }
0x17b0   :  { %5547 = vperm.xlu0 %7656, %v7880_v42  }
0x17b1   :  { %v7882_v44 = vpop.eup %7881 }
0x17b2   :  { %5552 = vperm.xlu1 %7660, %v7882_v44   ;;  %v7884_v27 = vpop.eup %7883 }
0x17b3   :  { %v7886_v43 = vpop.eup %7885 }
0x17b4   :  { %5537 = vperm.xlu0 %7656, %v7884_v27  }
0x17b6   :  { %5542 = vperm.xlu1 %7660, %v7886_v43  }
0x17b8   :  { %7691 = vset.pattern.permute.xlu0 %v9907_v12 }
0x17b9   :  { %5560 = vperm.xlu0 %7691, %v7884_v27  }
0x17ba   :  { %7692 = vset.pattern.permute.xlu1 %v9907_v12 }
0x17bb   :  { %5564 = vperm.xlu1 %7692, %v7886_v43  }
0x17bd   :  { %5572 = vperm.xlu0 %7691, %v7882_v44  }
0x17bf   :  { %5568 = vperm.xlu1 %7692, %v7880_v42  }
0x182f   :  { %v5548_v29 = vpop.permute.xlu0 %5547 }
0x1830   :  { %v5557_v14 = vsel %vm9909_vm6, %v5548_v29, 0.0 }
0x1831   :  { %v5553_v38 = vpop.permute.xlu1 %5552 }
0x1832   :  { %v5558_v7 = vsel %vm9909_vm6, %v5553_v38, 0.0 }
0x1833   :  { %v5538_v41 = vpop.permute.xlu0 %5537 }
0x1834   :  { %v5555_v61 = vsel %vm9909_vm6, %v5538_v41, 0.0 }
0x1835   :  { %v5543_v58 = vpop.permute.xlu1 %5542 }
0x1836   :  { %v5556_v12 = vsel %vm9909_vm6, %v5543_v58, 0.0 }
0x1838   :  { %v5561_v1 = vpop.permute.xlu0 %5560 }
0x1839   :  { %v5575_v6 = vsel %vm9911_vm3, %v5561_v1, %v5555_v61 }
0x183a   :  { %v5579_v11 = vmul.f32 %v5575_v6, %v9652_v5  ;;  %v5565_v59 = vpop.permute.xlu1 %5564  ;;  %v9937_v5 = vld [vmem:[#allocation5_spill] sm:$0xff] }
0x183b   :  { %v5576_v62 = vsel %vm9911_vm3, %v5565_v59, %v5556_v12 }
0x183c   :  { %v5583_v32 = vadd.f32 %v5579_v11, %v9936_v36  ;;  %v5580_v45 = vmul.f32 %v5576_v62, %v9650_v25  ;;  %v5573_v3 = vpop.permute.xlu0 %5572 }
0x183d   :  { %v5578_v8 = vsel %vm9911_vm3, %v5573_v3, %v5558_v7 }
0x183e   :  { %v5587_v21 = vmax.f32 %v5583_v32, 0.0  ;;  %v5584_v60 = vadd.f32 %v5580_v45, %v9937_v5  ;;  %v5582_v17 = vmul.f32 %v5578_v8, %v9658_v53  ;;  %v5569_v50 = vpop.permute.xlu1 %5568 }
0x183f   :  { %v5577_v4 = vsel %vm9911_vm3, %v5569_v50, %v5557_v14 }
0x1840   :  { %5591 = vst [vmem:[%s5637_s28] sm:$0xff] %v5587_v21  ;;  %v5588_v2 = vmax.f32 %v5584_v60, 0.0  ;;  %v5586_v25 = vadd.f32 %v5582_v17, %v9938_v56  ;;  %v5581_v55 = vmul.f32 %v5577_v4, %v9660_v16 }
0x1842   :  { %5592 = vst [vmem:[%s5637_s28 + $0x8] sm:$0xff] %v5588_v2  ;;  %v5590_v10 = vmax.f32 %v5586_v25, 0.0  ;;  %v5585_v49 = vadd.f32 %v5581_v55, %v9939_v20 }
0x1844   :  { %5594 = vst [vmem:[%s5637_s28 + $0x18] sm:$0xff] %v5590_v10  ;;  %v5589_v40 = vmax.f32 %v5585_v49, 0.0 }
0x1846   :  { %5593 = vst [vmem:[%s5637_s28 + $0x10] sm:$0xff] %v5589_v40 }

</bundles_post_ra>
